<compile_context>
chip_gen: v7x
topology: tpu7x:2x2x1
jax: 0.10.0
libtpu: 0.0.40
codegen_flags: <defaults>
</compile_context>

<pallas_src>
import functools
import math

import jax
import jax.numpy as jnp
from jax.experimental import pallas as pl
from jax.experimental.pallas import tpu as pltpu

LN_EPS = 1e-5
NEG_INF = -1e9


# ----------------------------- in-kernel building blocks -----------------------------

def _layernorm(x, g, b):
    mean = jnp.mean(x, axis=-1, keepdims=True)
    var = jnp.mean(jnp.square(x - mean), axis=-1, keepdims=True)
    return (x - mean) * jax.lax.rsqrt(var + LN_EPS) * g + b


def _split_heads(x, num_heads, head_dim):
    # (S, H*Dh) -> (H, S, Dh): lane slices stacked along a new leading (batch) axis.
    # Equivalent to reshape(S,H,Dh)+transpose(1,0,2) but expressed with slice+concat so it
    # lowers robustly in Mosaic.
    # TODO(synk): switch to reshape+transpose once leading-dim transposes lower everywhere.
    return jnp.stack(
        [x[:, h * head_dim:(h + 1) * head_dim] for h in range(num_heads)], axis=0)


def _merge_heads(x):
    # (H, S, Dh) -> (S, H*Dh)
    return jnp.concatenate([x[h] for h in range(x.shape[0])], axis=-1)


def _mha(x_q, x_kv, kv_len, wq, bq, wkv, bkv, wo, bo, *, num_heads, causal):
    """All-heads attention for one batch element.
    Fused Q / K|V projections and the O-projection are full-K (K=D) MXU matmuls; the
    per-head score/context products are head-batched einsums (leading H axis) instead of
    a Python per-head loop of K=Dh matmuls.
    x_q: (Sq, D) f32, x_kv: (Sk, D) f32, kv_len: scalar int32; weights bf16, biases f32."""
    Sq, D = x_q.shape
    Sk = x_kv.shape[0]
    Dh = D // num_heads
    scale = 1.0 / math.sqrt(Dh)

    # projections (bf16 operands, f32 accumulation); 1/sqrt(Dh) folded into q
    q = (jnp.dot(x_q.astype(jnp.bfloat16), wq,
                 preferred_element_type=jnp.float32) + bq) * scale            # (Sq, D)
    kv = jnp.dot(x_kv.astype(jnp.bfloat16), wkv,
                 preferred_element_type=jnp.float32) + bkv                    # (Sk, 2D)
    k = kv[:, :D]   # D % 128 == 0 -> tile-aligned lane split (no relayout copy)
    v = kv[:, D:]

    # heads to a leading batch axis once
    qh = _split_heads(q, num_heads, Dh).astype(jnp.bfloat16)                  # (H,Sq,Dh)
    kh = _split_heads(k, num_heads, Dh).astype(jnp.bfloat16)                  # (H,Sk,Dh)
    vh = _split_heads(v, num_heads, Dh).astype(jnp.bfloat16)                  # (H,Sk,Dh)

    # head-batched scores (single batched matmul, not H tiny ones)
    s = jnp.einsum("hqd,hkd->hqk", qh, kh,
                   preferred_element_type=jnp.float32)                        # (H,Sq,Sk)

    # pad (and causal) mask rebuilt in-kernel from the scalar valid-key length
    cols = jax.lax.broadcasted_iota(jnp.int32, (Sq, Sk), 1)
    valid = cols < kv_len
    if causal:
        rows = jax.lax.broadcasted_iota(jnp.int32, (Sq, Sk), 0)
        valid = jnp.logical_and(valid, rows >= cols)
    s = jnp.where(valid[None, :, :], s, NEG_INF)

    s = s - jnp.max(s, axis=-1, keepdims=True)
    p = jnp.exp(s)
    p = p * pl.reciprocal(jnp.sum(p, axis=-1, keepdims=True), approx=True)

    ctx = jnp.einsum("hqk,hkd->hqd", p.astype(jnp.bfloat16), vh,
                     preferred_element_type=jnp.float32)                      # (H,Sq,Dh)
    ctx = _merge_heads(ctx)                                                   # (Sq, D)

    # single full-K output projection (one (Sq,D)@(D,D) matmul)
    return jnp.dot(ctx.astype(jnp.bfloat16), wo,
                   preferred_element_type=jnp.float32) + bo


def _ffn(x, w1, b1, w2, b2):
    h = jnp.dot(x.astype(jnp.bfloat16), w1, preferred_element_type=jnp.float32) + b1
    h = jnp.maximum(h, 0.0)
    return jnp.dot(h.astype(jnp.bfloat16), w2, preferred_element_type=jnp.float32) + b2


# ----------------------------- fused per-layer kernels -----------------------------

def _encoder_layer_kernel(srclen_ref, x_ref,
                          wq_ref, bq_ref, wkv_ref, bkv_ref, wo_ref, bo_ref,
                          g1_ref, be1_ref,
                          w1_ref, b1_ref, w2_ref, b2_ref,
                          g2_ref, be2_ref,
                          o_ref, *, num_heads):
    """One full encoder layer (self-MHA + Add&LN + FFN + Add&LN) per batch element."""
    b = pl.program_id(0)
    x = x_ref[0].astype(jnp.float32)                                          # (S, D)

    attn = _mha(x, x, srclen_ref[b],
                wq_ref[...], bq_ref[...], wkv_ref[...], bkv_ref[...],
                wo_ref[...], bo_ref[...], num_heads=num_heads, causal=False)
    h = _layernorm(x + attn, g1_ref[...], be1_ref[...])

    f = _ffn(h, w1_ref[...], b1_ref[...], w2_ref[...], b2_ref[...])
    y = _layernorm(h + f, g2_ref[...], be2_ref[...])
    o_ref[...] = y[None].astype(o_ref.dtype)


def _decoder_layer_kernel(tgtlen_ref, srclen_ref, y_ref, enc_ref,
                          swq_ref, sbq_ref, swkv_ref, sbkv_ref, swo_ref, sbo_ref,
                          g1_ref, be1_ref,
                          cwq_ref, cbq_ref, cwkv_ref, cbkv_ref, cwo_ref, cbo_ref,
                          g2_ref, be2_ref,
                          w1_ref, b1_ref, w2_ref, b2_ref,
                          g3_ref, be3_ref,
                          o_ref, *, num_heads):
    """One full decoder layer (causal self-MHA + Add&LN + cross-MHA + Add&LN + FFN +
    Add&LN) per batch element."""
    b = pl.program_id(0)
    y = y_ref[0].astype(jnp.float32)                                          # (St, D)
    enc = enc_ref[0].astype(jnp.float32)                                      # (Ss, D)

    sa = _mha(y, y, tgtlen_ref[b],
              swq_ref[...], sbq_ref[...], swkv_ref[...], sbkv_ref[...],
              swo_ref[...], sbo_ref[...], num_heads=num_heads, causal=True)
    h = _layernorm(y + sa, g1_ref[...], be1_ref[...])

    ca = _mha(h, enc, srclen_ref[b],
              cwq_ref[...], cbq_ref[...], cwkv_ref[...], cbkv_ref[...],
              cwo_ref[...], cbo_ref[...], num_heads=num_heads, causal=False)
    h = _layernorm(h + ca, g2_ref[...], be2_ref[...])

    f = _ffn(h, w1_ref[...], b1_ref[...], w2_ref[...], b2_ref[...])
    out = _layernorm(h + f, g3_ref[...], be3_ref[...])
    o_ref[...] = out[None].astype(o_ref.dtype)


def _head_kernel(x_ref, w_ref, b_ref, o_ref):
    """Vocab head: lane-dense (128-padded) output matmul."""
    x = x_ref[0].astype(jnp.bfloat16)                                         # (S, D)
    y = jnp.dot(x, w_ref[...], preferred_element_type=jnp.float32) + b_ref[...]
    o_ref[...] = y[None].astype(o_ref.dtype)


# ----------------------------- pallas_call wrappers -----------------------------

def _compiler_params():
    # TODO(synk): re-derive the VMEM budget / tile sizes per chip (64 MiB total on v7x)
    # once D reaches production size; 64 MiB scoped is ample for the demo weights.
    return pltpu.CompilerParams(
        dimension_semantics=("parallel",),
        vmem_limit_bytes=64 * 1024 * 1024,
    )


def _weight_spec(shape, index_map):
    # constant-index weight block: single-buffer it (double-buffering a block whose index
    # never changes only wastes VMEM — the second buffer is pure overhead on v7x's 64 MiB).
    return pl.BlockSpec(shape, index_map, pipeline_mode=pl.Buffered(1))


def encoder_layer(x, src_len, p, num_heads):
    B, S, D = x.shape
    H = p["ffn"]["w1"].shape[1]
    xmap = lambda b, sl: (b, 0, 0)
    wmap = lambda b, sl: (0, 0)
    ws = lambda shp: _weight_spec(shp, wmap)
    a, f = p["attn"], p["ffn"]
    return pl.pallas_call(
        functools.partial(_encoder_layer_kernel, num_heads=num_heads),
        out_shape=jax.ShapeDtypeStruct((B, S, D), jnp.bfloat16),
        grid_spec=pltpu.PrefetchScalarGridSpec(
            num_scalar_prefetch=1,
            grid=(B,),
            in_specs=[
                pl.BlockSpec((1, S, D), xmap),                 # x
                ws((D, D)), ws((1, D)),                        # wq, bq
                ws((D, 2 * D)), ws((1, 2 * D)),                # wkv, bkv (fused K|V)
                ws((D, D)), ws((1, D)),                        # wo, bo
                ws((1, D)), ws((1, D)),                        # ln1 gamma, beta
                ws((D, H)), ws((1, H)),                        # w1, b1
                ws((H, D)), ws((1, D)),                        # w2, b2
                ws((1, D)), ws((1, D)),                        # ln2 gamma, beta
            ],
            out_specs=pl.BlockSpec((1, S, D), xmap),
        ),
        compiler_params=_compiler_params(),
    )(src_len, x,
      a["wq"], a["bq"], a["wkv"], a["bkv"], a["wo"], a["bo"],
      p["ln1_g"], p["ln1_b"],
      f["w1"], f["b1"], f["w2"], f["b2"],
      p["ln2_g"], p["ln2_b"])


def decoder_layer(y, enc, tgt_len, src_len, p, num_heads):
    B, St, D = y.shape
    Ss = enc.shape[1]
    H = p["ffn"]["w1"].shape[1]
    ymap = lambda b, tl, sl: (b, 0, 0)
    wmap = lambda b, tl, sl: (0, 0)
    ws = lambda shp: _weight_spec(shp, wmap)
    sa, ca, f = p["self_attn"], p["cross_attn"], p["ffn"]
    return pl.pallas_call(
        functools.partial(_decoder_layer_kernel, num_heads=num_heads),
        out_shape=jax.ShapeDtypeStruct((B, St, D), jnp.bfloat16),
        grid_spec=pltpu.PrefetchScalarGridSpec(
            num_scalar_prefetch=2,
            grid=(B,),
            in_specs=[
                pl.BlockSpec((1, St, D), ymap),                # decoder stream
                pl.BlockSpec((1, Ss, D), ymap),                # encoder memory
                ws((D, D)), ws((1, D)), ws((D, 2 * D)), ws((1, 2 * D)),   # self-attn
                ws((D, D)), ws((1, D)),
                ws((1, D)), ws((1, D)),                        # ln1
                ws((D, D)), ws((1, D)), ws((D, 2 * D)), ws((1, 2 * D)),   # cross-attn
                ws((D, D)), ws((1, D)),
                ws((1, D)), ws((1, D)),                        # ln2
                ws((D, H)), ws((1, H)), ws((H, D)), ws((1, D)),           # ffn
                ws((1, D)), ws((1, D)),                        # ln3
            ],
            out_specs=pl.BlockSpec((1, St, D), ymap),
        ),
        compiler_params=_compiler_params(),
    )(tgt_len, src_len, y, enc,
      sa["wq"], sa["bq"], sa["wkv"], sa["bkv"], sa["wo"], sa["bo"],
      p["ln1_g"], p["ln1_b"],
      ca["wq"], ca["bq"], ca["wkv"], ca["bkv"], ca["wo"], ca["bo"],
      p["ln2_g"], p["ln2_b"],
      f["w1"], f["b1"], f["w2"], f["b2"],
      p["ln3_g"], p["ln3_b"])


def output_head(x, w_padded, b_padded):
    B, S, D = x.shape
    Np = w_padded.shape[1]
    xmap = lambda i: (i, 0, 0)
    wmap = lambda i: (0, 0)
    return pl.pallas_call(
        _head_kernel,
        out_shape=jax.ShapeDtypeStruct((B, S, Np), jnp.float32),
        grid=(B,),
        in_specs=[
            pl.BlockSpec((1, S, D), xmap),
            _weight_spec((D, Np), wmap),
            _weight_spec((1, Np), wmap),
        ],
        out_specs=pl.BlockSpec((1, S, Np), xmap),
        compiler_params=_compiler_params(),
    )(x, w_padded, b_padded)


# ----------------------------- model glue (plain JAX) -----------------------------

def sinusoidal_pe(max_len, d):
    pos = jnp.arange(max_len, dtype=jnp.float32)[:, None]
    i = jnp.arange(0, d, 2, dtype=jnp.float32)
    div = jnp.exp(-math.log(10000.0) * i / d)
    pe = jnp.zeros((max_len, d), jnp.float32)
    pe = pe.at[:, 0::2].set(jnp.sin(pos * div))
    pe = pe.at[:, 1::2].set(jnp.cos(pos * div))
    return pe


def token_embedding(tokens, emb_table, pe, d_model):
    # TODO(synk): embedding gather stays in plain JAX (no clean Pallas gather at this size).
    x = jnp.take(emb_table, tokens, axis=0) * math.sqrt(d_model)
    x = x + pe[: tokens.shape[1]][None, :, :]
    return x.astype(jnp.bfloat16)


def transformer_forward(params, x, y, cfg):
    D = cfg["emb"]
    # TODO(synk): scalar valid-key lengths assume right-padded sequences (standard seq2seq
    # layout); arbitrary interior padding would need per-key mask rows again.
    src_len = jnp.sum(x != cfg["src_pad_id"], axis=1).astype(jnp.int32)
    tgt_len = jnp.sum(y != cfg["tgt_pad_id"], axis=1).astype(jnp.int32)

    h = token_embedding(x, params["in_emb"], params["pe"], D)
    o = token_embedding(y, params["out_emb"], params["pe"], D)

    for lp in params["enc_layers"]:
        h = encoder_layer(h, src_len, lp, cfg["enc_heads"])

    for lp in params["dec_layers"]:
        o = decoder_layer(o, h, tgt_len, src_len, lp, cfg["dec_heads"])

    logits_p = output_head(o, params["out_w_p"], params["out_b_p"])   # (B, St, 128)
    return logits_p[..., : cfg["out_vocab"]]


# ----------------------------- deterministic init -----------------------------

def _init_linear(key, fan_in, fan_out):
    k1, k2 = jax.random.split(key)
    bound = 1.0 / math.sqrt(fan_in)
    w = jax.random.uniform(k1, (fan_in, fan_out), jnp.float32, -bound, bound)
    b = jax.random.uniform(k2, (fan_out,), jnp.float32, -bound, bound)
    return w, b


def _init_attn(key, d):
    ks = jax.random.split(key, 4)
    wq, bq = _init_linear(ks[0], d, d)
    wk, bk = _init_linear(ks[1], d, d)
    wv, bv = _init_linear(ks[2], d, d)
    wo, bo = _init_linear(ks[3], d, d)
    return {"wq": wq.astype(jnp.bfloat16), "bq": bq.reshape(1, d),
            "wkv": jnp.concatenate([wk, wv], axis=1).astype(jnp.bfloat16),   # [D, 2D]
            "bkv": jnp.concatenate([bk, bv], axis=0).reshape(1, 2 * d),
            "wo": wo.astype(jnp.bfloat16), "bo": bo.reshape(1, d)}


def _init_ffn(key, d):
    k1, k2 = jax.random.split(key)
    w1, b1 = _init_linear(k1, d, 4 * d)
    w2, b2 = _init_linear(k2, 4 * d, d)
    return {"w1": w1.astype(jnp.bfloat16), "b1": b1.reshape(1, 4 * d),
            "w2": w2.astype(jnp.bfloat16), "b2": b2.reshape(1, d)}


def init_params(key, cfg):
    D = cfg["emb"]
    keys = jax.random.split(key, 8)
    params = {
        "in_emb": jax.random.normal(keys[0], (cfg["in_vocab"], D), jnp.float32),
        "out_emb": jax.random.normal(keys[1], (cfg["out_vocab"], D), jnp.float32),
        "pe": sinusoidal_pe(cfg["max_len"], D),
        "enc_layers": [],
        "dec_layers": [],
    }
    ek = jax.random.split(keys[2], cfg["enc_layers"])
    for k in ek:
        k1, k2 = jax.random.split(k)
        params["enc_layers"].append({
            "attn": _init_attn(k1, D), "ffn": _init_ffn(k2, D),
            "ln1_g": jnp.ones((1, D), jnp.float32), "ln1_b": jnp.zeros((1, D), jnp.float32),
            "ln2_g": jnp.ones((1, D), jnp.float32), "ln2_b": jnp.zeros((1, D), jnp.float32),
        })
    dk = jax.random.split(keys[3], cfg["dec_layers"])
    for k in dk:
        k1, k2, k3 = jax.random.split(k, 3)
        params["dec_layers"].append({
            "self_attn": _init_attn(k1, D), "cross_attn": _init_attn(k2, D),
            "ffn": _init_ffn(k3, D),
            "ln1_g": jnp.ones((1, D), jnp.float32), "ln1_b": jnp.zeros((1, D), jnp.float32),
            "ln2_g": jnp.ones((1, D), jnp.float32), "ln2_b": jnp.zeros((1, D), jnp.float32),
            "ln3_g": jnp.ones((1, D), jnp.float32), "ln3_b": jnp.zeros((1, D), jnp.float32),
        })
    # vocab head zero-padded to a lane-dense (multiple-of-128) output width
    ow, ob = _init_linear(keys[4], D, cfg["out_vocab"])
    vpad = ((cfg["out_vocab"] + 127) // 128) * 128
    w_p = jnp.zeros((D, vpad), jnp.float32).at[:, : cfg["out_vocab"]].set(ow)
    b_p = jnp.zeros((vpad,), jnp.float32).at[: cfg["out_vocab"]].set(ob)
    params["out_w_p"] = w_p.astype(jnp.bfloat16)
    params["out_b_p"] = b_p.reshape(1, vpad)
    return params


# ----------------------------- main -----------------------------

if __name__ == "__main__":
    cfg = dict(in_vocab=11, out_vocab=13, emb=128, max_len=16,
               enc_layers=2, dec_layers=2, enc_heads=4, dec_heads=4,
               src_pad_id=0, tgt_pad_id=0)

    key = jax.random.PRNGKey(0)
    kp, kx, ky = jax.random.split(key, 3)
    params = init_params(kp, cfg)

    B, Ss, St = 2, 8, 8
    x = jax.random.randint(kx, (B, Ss), 1, cfg["in_vocab"], dtype=jnp.int32)
    y = jax.random.randint(ky, (B, St), 1, cfg["out_vocab"], dtype=jnp.int32)
    # right-padding at the tail (pad id 0)
    x = x.at[0, 6:].set(cfg["src_pad_id"])
    y = y.at[1, 5:].set(cfg["tgt_pad_id"])

    fwd = jax.jit(functools.partial(transformer_forward, cfg=cfg))
    logits = fwd(params, x, y)
    jax.block_until_ready(logits)

    assert logits.shape == (B, St, cfg["out_vocab"]), logits.shape
    assert bool(jnp.isfinite(logits).all())
    print("KERNEL_OK")
</pallas_src>

<mosaic_0001>
module attributes {stable_mosaic.version = 11 : i64} {
  func.func @_head_kernel(%arg0: i32, %arg1: memref<1x8x128xbf16, #tpu.memory_space<vmem>>, %arg2: memref<128x128xbf16, #tpu.memory_space<vmem>>, %arg3: memref<1x128xf32, #tpu.memory_space<vmem>>, %arg4: memref<1x8x128xf32, #tpu.memory_space<vmem>>) attributes {dimension_semantics = [#tpu.dimension_semantics<parallel>], iteration_bounds = array<i64: 2>, scalar_prefetch = 0 : i64, scratch_operands = 0 : i64, tpu.core_type = #tpu.core_type<tc>, window_params = [{transform_indices = @transform_0, window_bounds = array<i64: 1, 8, 128>}, {pipeline_mode = #tpu.pipeline_mode<synchronous>, transform_indices = @transform_1, window_bounds = array<i64: 128, 128>}, {pipeline_mode = #tpu.pipeline_mode<synchronous>, transform_indices = @transform_2, window_bounds = array<i64: 1, 128>}, {transform_indices = @transform_3, window_bounds = array<i64: 1, 8, 128>}]} {
    %c0 = arith.constant 0 : index
    %c0_0 = arith.constant 0 : index
    %c0_1 = arith.constant 0 : index
    %0 = vector.load %arg1[%c0, %c0_0, %c0_1] : memref<1x8x128xbf16, #tpu.memory_space<vmem>>, vector<1x8x128xbf16>
    %1 = vector.shape_cast %0 : vector<1x8x128xbf16> to vector<8x128xbf16>
    %c0_2 = arith.constant 0 : index
    %c0_3 = arith.constant 0 : index
    %2 = vector.load %arg2[%c0_2, %c0_3] : memref<128x128xbf16, #tpu.memory_space<vmem>>, vector<128x128xbf16>
    %cst = arith.constant dense<0.000000e+00> : vector<8x128xf32>
    %3 = tpu.matmul %1, %2, %cst {dimension_numbers = #tpu.dot_dimension_numbers<[1], [0], [0], [1], [0, 0, 1, 1], [], []>} : vector<8x128xbf16>, vector<128x128xbf16>, vector<8x128xf32> -> vector<8x128xf32>
    %c0_4 = arith.constant 0 : index
    %c0_5 = arith.constant 0 : index
    %4 = vector.load %arg3[%c0_4, %c0_5] : memref<1x128xf32, #tpu.memory_space<vmem>>, vector<1x128xf32>
    %5 = vector.broadcast %4 : vector<1x128xf32> to vector<8x128xf32>
    %6 = arith.addf %3, %5 : vector<8x128xf32>
    %7 = vector.shape_cast %6 : vector<8x128xf32> to vector<1x8x128xf32>
    %c0_6 = arith.constant 0 : index
    %c0_7 = arith.constant 0 : index
    %c0_8 = arith.constant 0 : index
    %8 = vector.load %arg4[%c0_6, %c0_7, %c0_8] : memref<1x8x128xf32, #tpu.memory_space<vmem>>, vector<1x8x128xf32>
    tpu.vector_store %arg4[%c0_6, %c0_7, %c0_8], %7 {strides = array<i32>} : memref<1x8x128xf32, #tpu.memory_space<vmem>>, vector<1x8x128xf32>,
    return
  }
  func.func @transform_0(%arg0: i32) -> (i32, i32, i32) {
    %c0_i32 = arith.constant 0 : i32
    %c0_i32_0 = arith.constant 0 : i32
    %c0_i32_1 = arith.constant 0 : i32
    return %arg0, %c0_i32, %c0_i32_0 : i32, i32, i32
  }
  func.func @transform_1(%arg0: i32) -> (i32, i32) {
    %c0_i32 = arith.constant 0 : i32
    %c0_i32_0 = arith.constant 0 : i32
    %c0_i32_1 = arith.constant 0 : i32
    return %c0_i32, %c0_i32_0 : i32, i32
  }
  func.func @transform_2(%arg0: i32) -> (i32, i32) {
    %c0_i32 = arith.constant 0 : i32
    %c0_i32_0 = arith.constant 0 : i32
    %c0_i32_1 = arith.constant 0 : i32
    return %c0_i32, %c0_i32_0 : i32, i32
  }
  func.func @transform_3(%arg0: i32) -> (i32, i32, i32) {
    %c0_i32 = arith.constant 0 : i32
    %c0_i32_0 = arith.constant 0 : i32
    %c0_i32_1 = arith.constant 0 : i32
    return %arg0, %c0_i32, %c0_i32_0 : i32, i32, i32
  }
}

module attributes {stable_mosaic.version = 11 : i64} {
  func.func @_encoder_layer_kernel(%arg0: i32, %arg1: memref<2xi32, #tpu.memory_space<smem>>, %arg2: memref<1x8x128xbf16, #tpu.memory_space<vmem>>, %arg3: memref<128x128xbf16, #tpu.memory_space<vmem>>, %arg4: memref<1x128xf32, #tpu.memory_space<vmem>>, %arg5: memref<128x256xbf16, #tpu.memory_space<vmem>>, %arg6: memref<1x256xf32, #tpu.memory_space<vmem>>, %arg7: memref<128x128xbf16, #tpu.memory_space<vmem>>, %arg8: memref<1x128xf32, #tpu.memory_space<vmem>>, %arg9: memref<1x128xf32, #tpu.memory_space<vmem>>, %arg10: memref<1x128xf32, #tpu.memory_space<vmem>>, %arg11: memref<128x512xbf16, #tpu.memory_space<vmem>>, %arg12: memref<1x512xf32, #tpu.memory_space<vmem>>, %arg13: memref<512x128xbf16, #tpu.memory_space<vmem>>, %arg14: memref<1x128xf32, #tpu.memory_space<vmem>>, %arg15: memref<1x128xf32, #tpu.memory_space<vmem>>, %arg16: memref<1x128xf32, #tpu.memory_space<vmem>>, %arg17: memref<1x8x128xbf16, #tpu.memory_space<vmem>>) attributes {dimension_semantics = [#tpu.dimension_semantics<parallel>], iteration_bounds = array<i64: 2>, scalar_prefetch = 1 : i64, scratch_operands = 0 : i64, tpu.core_type = #tpu.core_type<tc>, window_params = [{transform_indices = @transform_0, window_bounds = array<i64: 1, 8, 128>}, {pipeline_mode = #tpu.pipeline_mode<synchronous>, transform_indices = @transform_1, window_bounds = array<i64: 128, 128>}, {pipeline_mode = #tpu.pipeline_mode<synchronous>, transform_indices = @transform_2, window_bounds = array<i64: 1, 128>}, {pipeline_mode = #tpu.pipeline_mode<synchronous>, transform_indices = @transform_3, window_bounds = array<i64: 128, 256>}, {pipeline_mode = #tpu.pipeline_mode<synchronous>, transform_indices = @transform_4, window_bounds = array<i64: 1, 256>}, {pipeline_mode = #tpu.pipeline_mode<synchronous>, transform_indices = @transform_5, window_bounds = array<i64: 128, 128>}, {pipeline_mode = #tpu.pipeline_mode<synchronous>, transform_indices = @transform_6, window_bounds = array<i64: 1, 128>}, {pipeline_mode = #tpu.pipeline_mode<synchronous>, transform_indices = @transform_7, window_bounds = array<i64: 1, 128>}, {pipeline_mode = #tpu.pipeline_mode<synchronous>, transform_indices = @transform_8, window_bounds = array<i64: 1, 128>}, {pipeline_mode = #tpu.pipeline_mode<synchronous>, transform_indices = @transform_9, window_bounds = array<i64: 128, 512>}, {pipeline_mode = #tpu.pipeline_mode<synchronous>, transform_indices = @transform_10, window_bounds = array<i64: 1, 512>}, {pipeline_mode = #tpu.pipeline_mode<synchronous>, transform_indices = @transform_11, window_bounds = array<i64: 512, 128>}, {pipeline_mode = #tpu.pipeline_mode<synchronous>, transform_indices = @transform_12, window_bounds = array<i64: 1, 128>}, {pipeline_mode = #tpu.pipeline_mode<synchronous>, transform_indices = @transform_13, window_bounds = array<i64: 1, 128>}, {pipeline_mode = #tpu.pipeline_mode<synchronous>, transform_indices = @transform_14, window_bounds = array<i64: 1, 128>}, {transform_indices = @transform_15, window_bounds = array<i64: 1, 8, 128>}]} {
    %c0 = arith.constant 0 : index
    %c0_0 = arith.constant 0 : index
    %c0_1 = arith.constant 0 : index
    %0 = vector.load %arg2[%c0, %c0_0, %c0_1] : memref<1x8x128xbf16, #tpu.memory_space<vmem>>, vector<1x8x128xbf16>
    %1 = vector.shape_cast %0 : vector<1x8x128xbf16> to vector<8x128xbf16>
    %2 = arith.extf %1 : vector<8x128xbf16> to vector<8x128xf32>
    %3 = arith.index_cast %arg0 : i32 to index
    %4 = memref.load %arg1[%3] : memref<2xi32, #tpu.memory_space<smem>>
    %c0_2 = arith.constant 0 : index
    %c0_3 = arith.constant 0 : index
    %5 = vector.load %arg3[%c0_2, %c0_3] : memref<128x128xbf16, #tpu.memory_space<vmem>>, vector<128x128xbf16>
    %c0_4 = arith.constant 0 : index
    %c0_5 = arith.constant 0 : index
    %6 = vector.load %arg4[%c0_4, %c0_5] : memref<1x128xf32, #tpu.memory_space<vmem>>, vector<1x128xf32>
    %c0_6 = arith.constant 0 : index
    %c0_7 = arith.constant 0 : index
    %7 = vector.load %arg5[%c0_6, %c0_7] : memref<128x256xbf16, #tpu.memory_space<vmem>>, vector<128x256xbf16>
    %c0_8 = arith.constant 0 : index
    %c0_9 = arith.constant 0 : index
    %8 = vector.load %arg6[%c0_8, %c0_9] : memref<1x256xf32, #tpu.memory_space<vmem>>, vector<1x256xf32>
    %c0_10 = arith.constant 0 : index
    %c0_11 = arith.constant 0 : index
    %9 = vector.load %arg7[%c0_10, %c0_11] : memref<128x128xbf16, #tpu.memory_space<vmem>>, vector<128x128xbf16>
    %c0_12 = arith.constant 0 : index
    %c0_13 = arith.constant 0 : index
    %10 = vector.load %arg8[%c0_12, %c0_13] : memref<1x128xf32, #tpu.memory_space<vmem>>, vector<1x128xf32>
    %11 = arith.truncf %2 : vector<8x128xf32> to vector<8x128xbf16>
    %cst = arith.constant dense<0.000000e+00> : vector<8x128xf32>
    %12 = tpu.matmul %11, %5, %cst {dimension_numbers = #tpu.dot_dimension_numbers<[1], [0], [0], [1], [0, 0, 1, 1], [], []>} : vector<8x128xbf16>, vector<128x128xbf16>, vector<8x128xf32> -> vector<8x128xf32>
    %13 = vector.broadcast %6 : vector<1x128xf32> to vector<8x128xf32>
    %14 = arith.addf %12, %13 : vector<8x128xf32>
    %cst_14 = arith.constant 0.176776692 : f32
    %15 = vector.broadcast %cst_14 : f32 to vector<8x128xf32>
    %16 = arith.mulf %14, %15 : vector<8x128xf32>
    %17 = arith.truncf %2 : vector<8x128xf32> to vector<8x128xbf16>
    %cst_15 = arith.constant dense<0.000000e+00> : vector<8x256xf32>
    %18 = tpu.matmul %17, %7, %cst_15 {dimension_numbers = #tpu.dot_dimension_numbers<[1], [0], [0], [1], [0, 0, 1, 1], [], []>} : vector<8x128xbf16>, vector<128x256xbf16>, vector<8x256xf32> -> vector<8x256xf32>
    %19 = vector.broadcast %8 : vector<1x256xf32> to vector<8x256xf32>
    %20 = arith.addf %18, %19 : vector<8x256xf32>
    %21 = vector.extract_strided_slice %20 {offsets = [0, 0], sizes = [8, 128], strides = [1, 1]} : vector<8x256xf32> to vector<8x128xf32>
    %22 = vector.extract_strided_slice %20 {offsets = [0, 128], sizes = [8, 128], strides = [1, 1]} : vector<8x256xf32> to vector<8x128xf32>
    %23 = vector.extract_strided_slice %16 {offsets = [0, 0], sizes = [8, 32], strides = [1, 1]} : vector<8x128xf32> to vector<8x32xf32>
    %24 = vector.extract_strided_slice %16 {offsets = [0, 32], sizes = [8, 32], strides = [1, 1]} : vector<8x128xf32> to vector<8x32xf32>
    %25 = vector.extract_strided_slice %16 {offsets = [0, 64], sizes = [8, 32], strides = [1, 1]} : vector<8x128xf32> to vector<8x32xf32>
    %26 = vector.extract_strided_slice %16 {offsets = [0, 96], sizes = [8, 32], strides = [1, 1]} : vector<8x128xf32> to vector<8x32xf32>
    %27 = vector.shape_cast %23 : vector<8x32xf32> to vector<1x8x32xf32>
    %28 = vector.shape_cast %24 : vector<8x32xf32> to vector<1x8x32xf32>
    %29 = vector.shape_cast %25 : vector<8x32xf32> to vector<1x8x32xf32>
    %30 = vector.shape_cast %26 : vector<8x32xf32> to vector<1x8x32xf32>
    %31 = tpu.concatenate %27, %28, %29, %30 in 0 : vector<1x8x32xf32>, vector<1x8x32xf32>, vector<1x8x32xf32>, vector<1x8x32xf32> -> vector<4x8x32xf32>
    %32 = arith.truncf %31 : vector<4x8x32xf32> to vector<4x8x32xbf16>
    %33 = vector.extract_strided_slice %21 {offsets = [0, 0], sizes = [8, 32], strides = [1, 1]} : vector<8x128xf32> to vector<8x32xf32>
    %34 = vector.extract_strided_slice %21 {offsets = [0, 32], sizes = [8, 32], strides = [1, 1]} : vector<8x128xf32> to vector<8x32xf32>
    %35 = vector.extract_strided_slice %21 {offsets = [0, 64], sizes = [8, 32], strides = [1, 1]} : vector<8x128xf32> to vector<8x32xf32>
    %36 = vector.extract_strided_slice %21 {offsets = [0, 96], sizes = [8, 32], strides = [1, 1]} : vector<8x128xf32> to vector<8x32xf32>
    %37 = vector.shape_cast %33 : vector<8x32xf32> to vector<1x8x32xf32>
    %38 = vector.shape_cast %34 : vector<8x32xf32> to vector<1x8x32xf32>
    %39 = vector.shape_cast %35 : vector<8x32xf32> to vector<1x8x32xf32>
    %40 = vector.shape_cast %36 : vector<8x32xf32> to vector<1x8x32xf32>
    %41 = tpu.concatenate %37, %38, %39, %40 in 0 : vector<1x8x32xf32>, vector<1x8x32xf32>, vector<1x8x32xf32>, vector<1x8x32xf32> -> vector<4x8x32xf32>
    %42 = arith.truncf %41 : vector<4x8x32xf32> to vector<4x8x32xbf16>
    %43 = vector.extract_strided_slice %22 {offsets = [0, 0], sizes = [8, 32], strides = [1, 1]} : vector<8x128xf32> to vector<8x32xf32>
    %44 = vector.extract_strided_slice %22 {offsets = [0, 32], sizes = [8, 32], strides = [1, 1]} : vector<8x128xf32> to vector<8x32xf32>
    %45 = vector.extract_strided_slice %22 {offsets = [0, 64], sizes = [8, 32], strides = [1, 1]} : vector<8x128xf32> to vector<8x32xf32>
    %46 = vector.extract_strided_slice %22 {offsets = [0, 96], sizes = [8, 32], strides = [1, 1]} : vector<8x128xf32> to vector<8x32xf32>
    %47 = vector.shape_cast %43 : vector<8x32xf32> to vector<1x8x32xf32>
    %48 = vector.shape_cast %44 : vector<8x32xf32> to vector<1x8x32xf32>
    %49 = vector.shape_cast %45 : vector<8x32xf32> to vector<1x8x32xf32>
    %50 = vector.shape_cast %46 : vector<8x32xf32> to vector<1x8x32xf32>
    %51 = tpu.concatenate %47, %48, %49, %50 in 0 : vector<1x8x32xf32>, vector<1x8x32xf32>, vector<1x8x32xf32>, vector<1x8x32xf32> -> vector<4x8x32xf32>
    %52 = arith.truncf %51 : vector<4x8x32xf32> to vector<4x8x32xbf16>
    "tpu.trace_start"() <{level = 10 : i32, message = "hqd,hkd->hqk"}> : () -> ()
    %cst_16 = arith.constant dense<0.000000e+00> : vector<4x8x8xf32>
    %53 = tpu.matmul %32, %42, %cst_16 {dimension_numbers = #tpu.dot_dimension_numbers<[2], [2], [1], [1], [0, 0, 0, 1, 1, 1], [0], [0]>} : vector<4x8x32xbf16>, vector<4x8x32xbf16>, vector<4x8x8xf32> -> vector<4x8x8xf32>
    "tpu.trace_stop"() : () -> ()
    %54 = tpu.iota {dimensions = array<i32: 1>} : vector<8x8xi32>
    %55 = vector.broadcast %4 : i32 to vector<8x8xi32>
    %56 = arith.cmpi slt, %54, %55 : vector<8x8xi32>
    %57 = vector.shape_cast %56 : vector<8x8xi1> to vector<1x8x8xi1>
    %cst_17 = arith.constant -1.000000e+09 : f32
    %58 = vector.shape_cast %57 : vector<1x8x8xi1> to vector<1x8x8xi1>
    %59 = vector.broadcast %58 : vector<1x8x8xi1> to vector<4x8x8xi1>
    %60 = vector.broadcast %cst_17 : f32 to vector<4x8x8xf32>
    %61 = arith.select %59, %53, %60 : vector<4x8x8xi1>, vector<4x8x8xf32>
    %cst_18 = arith.constant dense<0xFF800000> : vector<4x8xf32>
    %62 = vector.multi_reduction <maximumf>, %61, %cst_18 [2] : vector<4x8x8xf32> to vector<4x8xf32>
    %63 = vector.shape_cast %62 : vector<4x8xf32> to vector<4x8x1xf32>
    %64 = vector.broadcast %63 : vector<4x8x1xf32> to vector<4x8x8xf32>
    %65 = arith.subf %61, %64 : vector<4x8x8xf32>
    %66 = math.exp %65 : vector<4x8x8xf32>
    %cst_19 = arith.constant dense<0.000000e+00> : vector<4x8xf32>
    %67 = vector.multi_reduction <add>, %66, %cst_19 [2] : vector<4x8x8xf32> to vector<4x8xf32>
    %68 = vector.shape_cast %67 : vector<4x8xf32> to vector<4x8x1xf32>
    %69 = tpu.reciprocal %68 {approx = true} : vector<4x8x1xf32> -> vector<4x8x1xf32>
    %70 = vector.broadcast %69 : vector<4x8x1xf32> to vector<4x8x8xf32>
    %71 = arith.mulf %66, %70 : vector<4x8x8xf32>
    %72 = arith.truncf %71 : vector<4x8x8xf32> to vector<4x8x8xbf16>
    "tpu.trace_start"() <{level = 10 : i32, message = "hqk,hkd->hqd"}> : () -> ()
    %cst_20 = arith.constant dense<0.000000e+00> : vector<4x8x32xf32>
    %73 = tpu.matmul %72, %52, %cst_20 {dimension_numbers = #tpu.dot_dimension_numbers<[2], [1], [1], [2], [0, 0, 0, 1, 1, 2], [0], [0]>} : vector<4x8x8xbf16>, vector<4x8x32xbf16>, vector<4x8x32xf32> -> vector<4x8x32xf32>
    "tpu.trace_stop"() : () -> ()
    %74 = vector.extract_strided_slice %73 {offsets = [0, 0, 0], sizes = [1, 8, 32], strides = [1, 1, 1]} : vector<4x8x32xf32> to vector<1x8x32xf32>
    %75 = vector.shape_cast %74 : vector<1x8x32xf32> to vector<8x32xf32>
    %76 = vector.extract_strided_slice %73 {offsets = [1, 0, 0], sizes = [1, 8, 32], strides = [1, 1, 1]} : vector<4x8x32xf32> to vector<1x8x32xf32>
    %77 = vector.shape_cast %76 : vector<1x8x32xf32> to vector<8x32xf32>
    %78 = vector.extract_strided_slice %73 {offsets = [2, 0, 0], sizes = [1, 8, 32], strides = [1, 1, 1]} : vector<4x8x32xf32> to vector<1x8x32xf32>
    %79 = vector.shape_cast %78 : vector<1x8x32xf32> to vector<8x32xf32>
    %80 = vector.extract_strided_slice %73 {offsets = [3, 0, 0], sizes = [1, 8, 32], strides = [1, 1, 1]} : vector<4x8x32xf32> to vector<1x8x32xf32>
    %81 = vector.shape_cast %80 : vector<1x8x32xf32> to vector<8x32xf32>
    %82 = tpu.concatenate %75, %77, %79, %81 in 1 : vector<8x32xf32>, vector<8x32xf32>, vector<8x32xf32>, vector<8x32xf32> -> vector<8x128xf32>
    %83 = arith.truncf %82 : vector<8x128xf32> to vector<8x128xbf16>
    %cst_21 = arith.constant dense<0.000000e+00> : vector<8x128xf32>
    %84 = tpu.matmul %83, %9, %cst_21 {dimension_numbers = #tpu.dot_dimension_numbers<[1], [0], [0], [1], [0, 0, 1, 1], [], []>} : vector<8x128xbf16>, vector<128x128xbf16>, vector<8x128xf32> -> vector<8x128xf32>
    %85 = vector.broadcast %10 : vector<1x128xf32> to vector<8x128xf32>
    %86 = arith.addf %84, %85 : vector<8x128xf32>
    %87 = arith.addf %2, %86 : vector<8x128xf32>
    %c0_22 = arith.constant 0 : index
    %c0_23 = arith.constant 0 : index
    %88 = vector.load %arg9[%c0_22, %c0_23] : memref<1x128xf32, #tpu.memory_space<vmem>>, vector<1x128xf32>
    %c0_24 = arith.constant 0 : index
    %c0_25 = arith.constant 0 : index
    %89 = vector.load %arg10[%c0_24, %c0_25] : memref<1x128xf32, #tpu.memory_space<vmem>>, vector<1x128xf32>
    %cst_26 = arith.constant dense<0.000000e+00> : vector<8xf32>
    %90 = vector.multi_reduction <add>, %87, %cst_26 [1] : vector<8x128xf32> to vector<8xf32>
    %91 = vector.shape_cast %90 : vector<8xf32> to vector<8x1xf32>
    %cst_27 = arith.constant 1.280000e+02 : f32
    %92 = vector.broadcast %cst_27 : f32 to vector<8x1xf32>
    %93 = arith.divf %91, %92 : vector<8x1xf32>
    %94 = vector.broadcast %93 : vector<8x1xf32> to vector<8x128xf32>
    %95 = arith.subf %87, %94 : vector<8x128xf32>
    %96 = arith.mulf %95, %95 : vector<8x128xf32>
    %cst_28 = arith.constant dense<0.000000e+00> : vector<8xf32>
    %97 = vector.multi_reduction <add>, %96, %cst_28 [1] : vector<8x128xf32> to vector<8xf32>
    %98 = vector.shape_cast %97 : vector<8xf32> to vector<8x1xf32>
    %cst_29 = arith.constant 1.280000e+02 : f32
    %99 = vector.broadcast %cst_29 : f32 to vector<8x1xf32>
    %100 = arith.divf %98, %99 : vector<8x1xf32>
    %101 = vector.broadcast %93 : vector<8x1xf32> to vector<8x128xf32>
    %102 = arith.subf %87, %101 : vector<8x128xf32>
    %cst_30 = arith.constant 9.99999974E-6 : f32
    %103 = vector.broadcast %cst_30 : f32 to vector<8x1xf32>
    %104 = arith.addf %100, %103 : vector<8x1xf32>
    %105 = math.rsqrt %104 : vector<8x1xf32>
    %106 = vector.broadcast %105 : vector<8x1xf32> to vector<8x128xf32>
    %107 = arith.mulf %102, %106 : vector<8x128xf32>
    %108 = vector.broadcast %88 : vector<1x128xf32> to vector<8x128xf32>
    %109 = arith.mulf %107, %108 : vector<8x128xf32>
    %110 = vector.broadcast %89 : vector<1x128xf32> to vector<8x128xf32>
    %111 = arith.addf %109, %110 : vector<8x128xf32>
    %c0_31 = arith.constant 0 : index
    %c0_32 = arith.constant 0 : index
    %112 = vector.load %arg11[%c0_31, %c0_32] : memref<128x512xbf16, #tpu.memory_space<vmem>>, vector<128x512xbf16>
    %c0_33 = arith.constant 0 : index
    %c0_34 = arith.constant 0 : index
    %113 = vector.load %arg12[%c0_33, %c0_34] : memref<1x512xf32, #tpu.memory_space<vmem>>, vector<1x512xf32>
    %c0_35 = arith.constant 0 : index
    %c0_36 = arith.constant 0 : index
    %114 = vector.load %arg13[%c0_35, %c0_36] : memref<512x128xbf16, #tpu.memory_space<vmem>>, vector<512x128xbf16>
    %c0_37 = arith.constant 0 : index
    %c0_38 = arith.constant 0 : index
    %115 = vector.load %arg14[%c0_37, %c0_38] : memref<1x128xf32, #tpu.memory_space<vmem>>, vector<1x128xf32>
    %116 = arith.truncf %111 : vector<8x128xf32> to vector<8x128xbf16>
    %cst_39 = arith.constant dense<0.000000e+00> : vector<8x512xf32>
    %117 = tpu.matmul %116, %112, %cst_39 {dimension_numbers = #tpu.dot_dimension_numbers<[1], [0], [0], [1], [0, 0, 1, 1], [], []>} : vector<8x128xbf16>, vector<128x512xbf16>, vector<8x512xf32> -> vector<8x512xf32>
    %118 = vector.broadcast %113 : vector<1x512xf32> to vector<8x512xf32>
    %119 = arith.addf %117, %118 : vector<8x512xf32>
    %cst_40 = arith.constant 0.000000e+00 : f32
    %120 = vector.broadcast %cst_40 : f32 to vector<8x512xf32>
    %121 = arith.maximumf %119, %120 : vector<8x512xf32>
    %122 = arith.truncf %121 : vector<8x512xf32> to vector<8x512xbf16>
    %cst_41 = arith.constant dense<0.000000e+00> : vector<8x128xf32>
    %123 = tpu.matmul %122, %114, %cst_41 {dimension_numbers = #tpu.dot_dimension_numbers<[1], [0], [0], [1], [0, 0, 1, 1], [], []>} : vector<8x512xbf16>, vector<512x128xbf16>, vector<8x128xf32> -> vector<8x128xf32>
    %124 = vector.broadcast %115 : vector<1x128xf32> to vector<8x128xf32>
    %125 = arith.addf %123, %124 : vector<8x128xf32>
    %126 = arith.addf %111, %125 : vector<8x128xf32>
    %c0_42 = arith.constant 0 : index
    %c0_43 = arith.constant 0 : index
    %127 = vector.load %arg15[%c0_42, %c0_43] : memref<1x128xf32, #tpu.memory_space<vmem>>, vector<1x128xf32>
    %c0_44 = arith.constant 0 : index
    %c0_45 = arith.constant 0 : index
    %128 = vector.load %arg16[%c0_44, %c0_45] : memref<1x128xf32, #tpu.memory_space<vmem>>, vector<1x128xf32>
    %cst_46 = arith.constant dense<0.000000e+00> : vector<8xf32>
    %129 = vector.multi_reduction <add>, %126, %cst_46 [1] : vector<8x128xf32> to vector<8xf32>
    %130 = vector.shape_cast %129 : vector<8xf32> to vector<8x1xf32>
    %cst_47 = arith.constant 1.280000e+02 : f32
    %131 = vector.broadcast %cst_47 : f32 to vector<8x1xf32>
    %132 = arith.divf %130, %131 : vector<8x1xf32>
    %133 = vector.broadcast %132 : vector<8x1xf32> to vector<8x128xf32>
    %134 = arith.subf %126, %133 : vector<8x128xf32>
    %135 = arith.mulf %134, %134 : vector<8x128xf32>
    %cst_48 = arith.constant dense<0.000000e+00> : vector<8xf32>
    %136 = vector.multi_reduction <add>, %135, %cst_48 [1] : vector<8x128xf32> to vector<8xf32>
    %137 = vector.shape_cast %136 : vector<8xf32> to vector<8x1xf32>
    %cst_49 = arith.constant 1.280000e+02 : f32
    %138 = vector.broadcast %cst_49 : f32 to vector<8x1xf32>
    %139 = arith.divf %137, %138 : vector<8x1xf32>
    %140 = vector.broadcast %132 : vector<8x1xf32> to vector<8x128xf32>
    %141 = arith.subf %126, %140 : vector<8x128xf32>
    %cst_50 = arith.constant 9.99999974E-6 : f32
    %142 = vector.broadcast %cst_50 : f32 to vector<8x1xf32>
    %143 = arith.addf %139, %142 : vector<8x1xf32>
    %144 = math.rsqrt %143 : vector<8x1xf32>
    %145 = vector.broadcast %144 : vector<8x1xf32> to vector<8x128xf32>
    %146 = arith.mulf %141, %145 : vector<8x128xf32>
    %147 = vector.broadcast %127 : vector<1x128xf32> to vector<8x128xf32>
    %148 = arith.mulf %146, %147 : vector<8x128xf32>
    %149 = vector.broadcast %128 : vector<1x128xf32> to vector<8x128xf32>
    %150 = arith.addf %148, %149 : vector<8x128xf32>
    %151 = vector.shape_cast %150 : vector<8x128xf32> to vector<1x8x128xf32>
    %152 = arith.truncf %151 : vector<1x8x128xf32> to vector<1x8x128xbf16>
    %c0_51 = arith.constant 0 : index
    %c0_52 = arith.constant 0 : index
    %c0_53 = arith.constant 0 : index
    %153 = vector.load %arg17[%c0_51, %c0_52, %c0_53] : memref<1x8x128xbf16, #tpu.memory_space<vmem>>, vector<1x8x128xbf16>
    tpu.vector_store %arg17[%c0_51, %c0_52, %c0_53], %152 {strides = array<i32>} : memref<1x8x128xbf16, #tpu.memory_space<vmem>>, vector<1x8x128xbf16>,
    return
  }
  func.func @transform_0(%arg0: i32, %arg1: memref<2xi32, #tpu.memory_space<smem>>) -> (i32, i32, i32) {
    %c0_i32 = arith.constant 0 : i32
    %c0_i32_0 = arith.constant 0 : i32
    %c0_i32_1 = arith.constant 0 : i32
    return %arg0, %c0_i32, %c0_i32_0 : i32, i32, i32
  }
  func.func @transform_1(%arg0: i32, %arg1: memref<2xi32, #tpu.memory_space<smem>>) -> (i32, i32) {
    %c0_i32 = arith.constant 0 : i32
    %c0_i32_0 = arith.constant 0 : i32
    %c0_i32_1 = arith.constant 0 : i32
    return %c0_i32, %c0_i32_0 : i32, i32
  }
  func.func @transform_2(%arg0: i32, %arg1: memref<2xi32, #tpu.memory_space<smem>>) -> (i32, i32) {
    %c0_i32 = arith.constant 0 : i32
    %c0_i32_0 = arith.constant 0 : i32
    %c0_i32_1 = arith.constant 0 : i32
    return %c0_i32, %c0_i32_0 : i32, i32
  }
  func.func @transform_3(%arg0: i32, %arg1: memref<2xi32, #tpu.memory_space<smem>>) -> (i32, i32) {
    %c0_i32 = arith.constant 0 : i32
    %c0_i32_0 = arith.constant 0 : i32
    %c0_i32_1 = arith.constant 0 : i32
    return %c0_i32, %c0_i32_0 : i32, i32
  }
  func.func @transform_4(%arg0: i32, %arg1: memref<2xi32, #tpu.memory_space<smem>>) -> (i32, i32) {
    %c0_i32 = arith.constant 0 : i32
    %c0_i32_0 = arith.constant 0 : i32
    %c0_i32_1 = arith.constant 0 : i32
    return %c0_i32, %c0_i32_0 : i32, i32
  }
  func.func @transform_5(%arg0: i32, %arg1: memref<2xi32, #tpu.memory_space<smem>>) -> (i32, i32) {
    %c0_i32 = arith.constant 0 : i32
    %c0_i32_0 = arith.constant 0 : i32
    %c0_i32_1 = arith.constant 0 : i32
    return %c0_i32, %c0_i32_0 : i32, i32
  }
  func.func @transform_6(%arg0: i32, %arg1: memref<2xi32, #tpu.memory_space<smem>>) -> (i32, i32) {
    %c0_i32 = arith.constant 0 : i32
    %c0_i32_0 = arith.constant 0 : i32
    %c0_i32_1 = arith.constant 0 : i32
    return %c0_i32, %c0_i32_0 : i32, i32
  }
  func.func @transform_7(%arg0: i32, %arg1: memref<2xi32, #tpu.memory_space<smem>>) -> (i32, i32) {
    %c0_i32 = arith.constant 0 : i32
    %c0_i32_0 = arith.constant 0 : i32
    %c0_i32_1 = arith.constant 0 : i32
    return %c0_i32, %c0_i32_0 : i32, i32
  }
  func.func @transform_8(%arg0: i32, %arg1: memref<2xi32, #tpu.memory_space<smem>>) -> (i32, i32) {
    %c0_i32 = arith.constant 0 : i32
    %c0_i32_0 = arith.constant 0 : i32
    %c0_i32_1 = arith.constant 0 : i32
    return %c0_i32, %c0_i32_0 : i32, i32
  }
  func.func @transform_9(%arg0: i32, %arg1: memref<2xi32, #tpu.memory_space<smem>>) -> (i32, i32) {
    %c0_i32 = arith.constant 0 : i32
    %c0_i32_0 = arith.constant 0 : i32
    %c0_i32_1 = arith.constant 0 : i32
    return %c0_i32, %c0_i32_0 : i32, i32
  }
  func.func @transform_10(%arg0: i32, %arg1: memref<2xi32, #tpu.memory_space<smem>>) -> (i32, i32) {
    %c0_i32 = arith.constant 0 : i32
    %c0_i32_0 = arith.constant 0 : i32
    %c0_i32_1 = arith.constant 0 : i32
    return %c0_i32, %c0_i32_0 : i32, i32
  }
  func.func @transform_11(%arg0: i32, %arg1: memref<2xi32, #tpu.memory_space<smem>>) -> (i32, i32) {
    %c0_i32 = arith.constant 0 : i32
    %c0_i32_0 = arith.constant 0 : i32
    %c0_i32_1 = arith.constant 0 : i32
    return %c0_i32, %c0_i32_0 : i32, i32
  }
  func.func @transform_12(%arg0: i32, %arg1: memref<2xi32, #tpu.memory_space<smem>>) -> (i32, i32) {
    %c0_i32 = arith.constant 0 : i32
    %c0_i32_0 = arith.constant 0 : i32
    %c0_i32_1 = arith.constant 0 : i32
    return %c0_i32, %c0_i32_0 : i32, i32
  }
  func.func @transform_13(%arg0: i32, %arg1: memref<2xi32, #tpu.memory_space<smem>>) -> (i32, i32) {
    %c0_i32 = arith.constant 0 : i32
    %c0_i32_0 = arith.constant 0 : i32
    %c0_i32_1 = arith.constant 0 : i32
    return %c0_i32, %c0_i32_0 : i32, i32
  }
  func.func @transform_14(%arg0: i32, %arg1: memref<2xi32, #tpu.memory_space<smem>>) -> (i32, i32) {
    %c0_i32 = arith.constant 0 : i32
    %c0_i32_0 = arith.constant 0 : i32
    %c0_i32_1 = arith.constant 0 : i32
    return %c0_i32, %c0_i32_0 : i32, i32
  }
  func.func @transform_15(%arg0: i32, %arg1: memref<2xi32, #tpu.memory_space<smem>>) -> (i32, i32, i32) {
    %c0_i32 = arith.constant 0 : i32
    %c0_i32_0 = arith.constant 0 : i32
    %c0_i32_1 = arith.constant 0 : i32
    return %arg0, %c0_i32, %c0_i32_0 : i32, i32, i32
  }
}

module attributes {stable_mosaic.version = 11 : i64} {
  func.func @_decoder_layer_kernel(%arg0: i32, %arg1: memref<2xi32, #tpu.memory_space<smem>>, %arg2: memref<2xi32, #tpu.memory_space<smem>>, %arg3: memref<1x8x128xbf16, #tpu.memory_space<vmem>>, %arg4: memref<1x8x128xbf16, #tpu.memory_space<vmem>>, %arg5: memref<128x128xbf16, #tpu.memory_space<vmem>>, %arg6: memref<1x128xf32, #tpu.memory_space<vmem>>, %arg7: memref<128x256xbf16, #tpu.memory_space<vmem>>, %arg8: memref<1x256xf32, #tpu.memory_space<vmem>>, %arg9: memref<128x128xbf16, #tpu.memory_space<vmem>>, %arg10: memref<1x128xf32, #tpu.memory_space<vmem>>, %arg11: memref<1x128xf32, #tpu.memory_space<vmem>>, %arg12: memref<1x128xf32, #tpu.memory_space<vmem>>, %arg13: memref<128x128xbf16, #tpu.memory_space<vmem>>, %arg14: memref<1x128xf32, #tpu.memory_space<vmem>>, %arg15: memref<128x256xbf16, #tpu.memory_space<vmem>>, %arg16: memref<1x256xf32, #tpu.memory_space<vmem>>, %arg17: memref<128x128xbf16, #tpu.memory_space<vmem>>, %arg18: memref<1x128xf32, #tpu.memory_space<vmem>>, %arg19: memref<1x128xf32, #tpu.memory_space<vmem>>, %arg20: memref<1x128xf32, #tpu.memory_space<vmem>>, %arg21: memref<128x512xbf16, #tpu.memory_space<vmem>>, %arg22: memref<1x512xf32, #tpu.memory_space<vmem>>, %arg23: memref<512x128xbf16, #tpu.memory_space<vmem>>, %arg24: memref<1x128xf32, #tpu.memory_space<vmem>>, %arg25: memref<1x128xf32, #tpu.memory_space<vmem>>, %arg26: memref<1x128xf32, #tpu.memory_space<vmem>>, %arg27: memref<1x8x128xbf16, #tpu.memory_space<vmem>>) attributes {dimension_semantics = [#tpu.dimension_semantics<parallel>], iteration_bounds = array<i64: 2>, scalar_prefetch = 2 : i64, scratch_operands = 0 : i64, tpu.core_type = #tpu.core_type<tc>, window_params = [{transform_indices = @transform_0, window_bounds = array<i64: 1, 8, 128>}, {transform_indices = @transform_1, window_bounds = array<i64: 1, 8, 128>}, {pipeline_mode = #tpu.pipeline_mode<synchronous>, transform_indices = @transform_2, window_bounds = array<i64: 128, 128>}, {pipeline_mode = #tpu.pipeline_mode<synchronous>, transform_indices = @transform_3, window_bounds = array<i64: 1, 128>}, {pipeline_mode = #tpu.pipeline_mode<synchronous>, transform_indices = @transform_4, window_bounds = array<i64: 128, 256>}, {pipeline_mode = #tpu.pipeline_mode<synchronous>, transform_indices = @transform_5, window_bounds = array<i64: 1, 256>}, {pipeline_mode = #tpu.pipeline_mode<synchronous>, transform_indices = @transform_6, window_bounds = array<i64: 128, 128>}, {pipeline_mode = #tpu.pipeline_mode<synchronous>, transform_indices = @transform_7, window_bounds = array<i64: 1, 128>}, {pipeline_mode = #tpu.pipeline_mode<synchronous>, transform_indices = @transform_8, window_bounds = array<i64: 1, 128>}, {pipeline_mode = #tpu.pipeline_mode<synchronous>, transform_indices = @transform_9, window_bounds = array<i64: 1, 128>}, {pipeline_mode = #tpu.pipeline_mode<synchronous>, transform_indices = @transform_10, window_bounds = array<i64: 128, 128>}, {pipeline_mode = #tpu.pipeline_mode<synchronous>, transform_indices = @transform_11, window_bounds = array<i64: 1, 128>}, {pipeline_mode = #tpu.pipeline_mode<synchronous>, transform_indices = @transform_12, window_bounds = array<i64: 128, 256>}, {pipeline_mode = #tpu.pipeline_mode<synchronous>, transform_indices = @transform_13, window_bounds = array<i64: 1, 256>}, {pipeline_mode = #tpu.pipeline_mode<synchronous>, transform_indices = @transform_14, window_bounds = array<i64: 128, 128>}, {pipeline_mode = #tpu.pipeline_mode<synchronous>, transform_indices = @transform_15, window_bounds = array<i64: 1, 128>}, {pipeline_mode = #tpu.pipeline_mode<synchronous>, transform_indices = @transform_16, window_bounds = array<i64: 1, 128>}, {pipeline_mode = #tpu.pipeline_mode<synchronous>, transform_indices = @transform_17, window_bounds = array<i64: 1, 128>}, {pipeline_mode = #tpu.pipeline_mode<synchronous>, transform_indices = @transform_18, window_bounds = array<i64: 128, 512>}, {pipeline_mode = #tpu.pipeline_mode<synchronous>, transform_indices = @transform_19, window_bounds = array<i64: 1, 512>}, {pipeline_mode = #tpu.pipeline_mode<synchronous>, transform_indices = @transform_20, window_bounds = array<i64: 512, 128>}, {pipeline_mode = #tpu.pipeline_mode<synchronous>, transform_indices = @transform_21, window_bounds = array<i64: 1, 128>}, {pipeline_mode = #tpu.pipeline_mode<synchronous>, transform_indices = @transform_22, window_bounds = array<i64: 1, 128>}, {pipeline_mode = #tpu.pipeline_mode<synchronous>, transform_indices = @transform_23, window_bounds = array<i64: 1, 128>}, {transform_indices = @transform_24, window_bounds = array<i64: 1, 8, 128>}]} {
    %c0 = arith.constant 0 : index
    %c0_0 = arith.constant 0 : index
    %c0_1 = arith.constant 0 : index
    %0 = vector.load %arg3[%c0, %c0_0, %c0_1] : memref<1x8x128xbf16, #tpu.memory_space<vmem>>, vector<1x8x128xbf16>
    %1 = vector.shape_cast %0 : vector<1x8x128xbf16> to vector<8x128xbf16>
    %2 = arith.extf %1 : vector<8x128xbf16> to vector<8x128xf32>
    %c0_2 = arith.constant 0 : index
    %c0_3 = arith.constant 0 : index
    %c0_4 = arith.constant 0 : index
    %3 = vector.load %arg4[%c0_2, %c0_3, %c0_4] : memref<1x8x128xbf16, #tpu.memory_space<vmem>>, vector<1x8x128xbf16>
    %4 = vector.shape_cast %3 : vector<1x8x128xbf16> to vector<8x128xbf16>
    %5 = arith.extf %4 : vector<8x128xbf16> to vector<8x128xf32>
    %6 = arith.index_cast %arg0 : i32 to index
    %7 = memref.load %arg1[%6] : memref<2xi32, #tpu.memory_space<smem>>
    %c0_5 = arith.constant 0 : index
    %c0_6 = arith.constant 0 : index
    %8 = vector.load %arg5[%c0_5, %c0_6] : memref<128x128xbf16, #tpu.memory_space<vmem>>, vector<128x128xbf16>
    %c0_7 = arith.constant 0 : index
    %c0_8 = arith.constant 0 : index
    %9 = vector.load %arg6[%c0_7, %c0_8] : memref<1x128xf32, #tpu.memory_space<vmem>>, vector<1x128xf32>
    %c0_9 = arith.constant 0 : index
    %c0_10 = arith.constant 0 : index
    %10 = vector.load %arg7[%c0_9, %c0_10] : memref<128x256xbf16, #tpu.memory_space<vmem>>, vector<128x256xbf16>
    %c0_11 = arith.constant 0 : index
    %c0_12 = arith.constant 0 : index
    %11 = vector.load %arg8[%c0_11, %c0_12] : memref<1x256xf32, #tpu.memory_space<vmem>>, vector<1x256xf32>
    %c0_13 = arith.constant 0 : index
    %c0_14 = arith.constant 0 : index
    %12 = vector.load %arg9[%c0_13, %c0_14] : memref<128x128xbf16, #tpu.memory_space<vmem>>, vector<128x128xbf16>
    %c0_15 = arith.constant 0 : index
    %c0_16 = arith.constant 0 : index
    %13 = vector.load %arg10[%c0_15, %c0_16] : memref<1x128xf32, #tpu.memory_space<vmem>>, vector<1x128xf32>
    %14 = arith.truncf %2 : vector<8x128xf32> to vector<8x128xbf16>
    %cst = arith.constant dense<0.000000e+00> : vector<8x128xf32>
    %15 = tpu.matmul %14, %8, %cst {dimension_numbers = #tpu.dot_dimension_numbers<[1], [0], [0], [1], [0, 0, 1, 1], [], []>} : vector<8x128xbf16>, vector<128x128xbf16>, vector<8x128xf32> -> vector<8x128xf32>
    %16 = vector.broadcast %9 : vector<1x128xf32> to vector<8x128xf32>
    %17 = arith.addf %15, %16 : vector<8x128xf32>
    %cst_17 = arith.constant 0.176776692 : f32
    %18 = vector.broadcast %cst_17 : f32 to vector<8x128xf32>
    %19 = arith.mulf %17, %18 : vector<8x128xf32>
    %20 = arith.truncf %2 : vector<8x128xf32> to vector<8x128xbf16>
    %cst_18 = arith.constant dense<0.000000e+00> : vector<8x256xf32>
    %21 = tpu.matmul %20, %10, %cst_18 {dimension_numbers = #tpu.dot_dimension_numbers<[1], [0], [0], [1], [0, 0, 1, 1], [], []>} : vector<8x128xbf16>, vector<128x256xbf16>, vector<8x256xf32> -> vector<8x256xf32>
    %22 = vector.broadcast %11 : vector<1x256xf32> to vector<8x256xf32>
    %23 = arith.addf %21, %22 : vector<8x256xf32>
    %24 = vector.extract_strided_slice %23 {offsets = [0, 0], sizes = [8, 128], strides = [1, 1]} : vector<8x256xf32> to vector<8x128xf32>
    %25 = vector.extract_strided_slice %23 {offsets = [0, 128], sizes = [8, 128], strides = [1, 1]} : vector<8x256xf32> to vector<8x128xf32>
    %26 = vector.extract_strided_slice %19 {offsets = [0, 0], sizes = [8, 32], strides = [1, 1]} : vector<8x128xf32> to vector<8x32xf32>
    %27 = vector.extract_strided_slice %19 {offsets = [0, 32], sizes = [8, 32], strides = [1, 1]} : vector<8x128xf32> to vector<8x32xf32>
    %28 = vector.extract_strided_slice %19 {offsets = [0, 64], sizes = [8, 32], strides = [1, 1]} : vector<8x128xf32> to vector<8x32xf32>
    %29 = vector.extract_strided_slice %19 {offsets = [0, 96], sizes = [8, 32], strides = [1, 1]} : vector<8x128xf32> to vector<8x32xf32>
    %30 = vector.shape_cast %26 : vector<8x32xf32> to vector<1x8x32xf32>
    %31 = vector.shape_cast %27 : vector<8x32xf32> to vector<1x8x32xf32>
    %32 = vector.shape_cast %28 : vector<8x32xf32> to vector<1x8x32xf32>
    %33 = vector.shape_cast %29 : vector<8x32xf32> to vector<1x8x32xf32>
    %34 = tpu.concatenate %30, %31, %32, %33 in 0 : vector<1x8x32xf32>, vector<1x8x32xf32>, vector<1x8x32xf32>, vector<1x8x32xf32> -> vector<4x8x32xf32>
    %35 = arith.truncf %34 : vector<4x8x32xf32> to vector<4x8x32xbf16>
    %36 = vector.extract_strided_slice %24 {offsets = [0, 0], sizes = [8, 32], strides = [1, 1]} : vector<8x128xf32> to vector<8x32xf32>
    %37 = vector.extract_strided_slice %24 {offsets = [0, 32], sizes = [8, 32], strides = [1, 1]} : vector<8x128xf32> to vector<8x32xf32>
    %38 = vector.extract_strided_slice %24 {offsets = [0, 64], sizes = [8, 32], strides = [1, 1]} : vector<8x128xf32> to vector<8x32xf32>
    %39 = vector.extract_strided_slice %24 {offsets = [0, 96], sizes = [8, 32], strides = [1, 1]} : vector<8x128xf32> to vector<8x32xf32>
    %40 = vector.shape_cast %36 : vector<8x32xf32> to vector<1x8x32xf32>
    %41 = vector.shape_cast %37 : vector<8x32xf32> to vector<1x8x32xf32>
    %42 = vector.shape_cast %38 : vector<8x32xf32> to vector<1x8x32xf32>
    %43 = vector.shape_cast %39 : vector<8x32xf32> to vector<1x8x32xf32>
    %44 = tpu.concatenate %40, %41, %42, %43 in 0 : vector<1x8x32xf32>, vector<1x8x32xf32>, vector<1x8x32xf32>, vector<1x8x32xf32> -> vector<4x8x32xf32>
    %45 = arith.truncf %44 : vector<4x8x32xf32> to vector<4x8x32xbf16>
    %46 = vector.extract_strided_slice %25 {offsets = [0, 0], sizes = [8, 32], strides = [1, 1]} : vector<8x128xf32> to vector<8x32xf32>
    %47 = vector.extract_strided_slice %25 {offsets = [0, 32], sizes = [8, 32], strides = [1, 1]} : vector<8x128xf32> to vector<8x32xf32>
    %48 = vector.extract_strided_slice %25 {offsets = [0, 64], sizes = [8, 32], strides = [1, 1]} : vector<8x128xf32> to vector<8x32xf32>
    %49 = vector.extract_strided_slice %25 {offsets = [0, 96], sizes = [8, 32], strides = [1, 1]} : vector<8x128xf32> to vector<8x32xf32>
    %50 = vector.shape_cast %46 : vector<8x32xf32> to vector<1x8x32xf32>
    %51 = vector.shape_cast %47 : vector<8x32xf32> to vector<1x8x32xf32>
    %52 = vector.shape_cast %48 : vector<8x32xf32> to vector<1x8x32xf32>
    %53 = vector.shape_cast %49 : vector<8x32xf32> to vector<1x8x32xf32>
    %54 = tpu.concatenate %50, %51, %52, %53 in 0 : vector<1x8x32xf32>, vector<1x8x32xf32>, vector<1x8x32xf32>, vector<1x8x32xf32> -> vector<4x8x32xf32>
    %55 = arith.truncf %54 : vector<4x8x32xf32> to vector<4x8x32xbf16>
    "tpu.trace_start"() <{level = 10 : i32, message = "hqd,hkd->hqk"}> : () -> ()
    %cst_19 = arith.constant dense<0.000000e+00> : vector<4x8x8xf32>
    %56 = tpu.matmul %35, %45, %cst_19 {dimension_numbers = #tpu.dot_dimension_numbers<[2], [2], [1], [1], [0, 0, 0, 1, 1, 1], [0], [0]>} : vector<4x8x32xbf16>, vector<4x8x32xbf16>, vector<4x8x8xf32> -> vector<4x8x8xf32>
    "tpu.trace_stop"() : () -> ()
    %57 = tpu.iota {dimensions = array<i32: 1>} : vector<8x8xi32>
    %58 = vector.broadcast %7 : i32 to vector<8x8xi32>
    %59 = arith.cmpi slt, %57, %58 : vector<8x8xi32>
    %60 = tpu.iota {dimensions = array<i32: 0>} : vector<8x8xi32>
    %61 = arith.cmpi sge, %60, %57 : vector<8x8xi32>
    %62 = arith.andi %59, %61 : vector<8x8xi1>
    %63 = vector.shape_cast %62 : vector<8x8xi1> to vector<1x8x8xi1>
    %cst_20 = arith.constant -1.000000e+09 : f32
    %64 = vector.shape_cast %63 : vector<1x8x8xi1> to vector<1x8x8xi1>
    %65 = vector.broadcast %64 : vector<1x8x8xi1> to vector<4x8x8xi1>
    %66 = vector.broadcast %cst_20 : f32 to vector<4x8x8xf32>
    %67 = arith.select %65, %56, %66 : vector<4x8x8xi1>, vector<4x8x8xf32>
    %cst_21 = arith.constant dense<0xFF800000> : vector<4x8xf32>
    %68 = vector.multi_reduction <maximumf>, %67, %cst_21 [2] : vector<4x8x8xf32> to vector<4x8xf32>
    %69 = vector.shape_cast %68 : vector<4x8xf32> to vector<4x8x1xf32>
    %70 = vector.broadcast %69 : vector<4x8x1xf32> to vector<4x8x8xf32>
    %71 = arith.subf %67, %70 : vector<4x8x8xf32>
    %72 = math.exp %71 : vector<4x8x8xf32>
    %cst_22 = arith.constant dense<0.000000e+00> : vector<4x8xf32>
    %73 = vector.multi_reduction <add>, %72, %cst_22 [2] : vector<4x8x8xf32> to vector<4x8xf32>
    %74 = vector.shape_cast %73 : vector<4x8xf32> to vector<4x8x1xf32>
    %75 = tpu.reciprocal %74 {approx = true} : vector<4x8x1xf32> -> vector<4x8x1xf32>
    %76 = vector.broadcast %75 : vector<4x8x1xf32> to vector<4x8x8xf32>
    %77 = arith.mulf %72, %76 : vector<4x8x8xf32>
    %78 = arith.truncf %77 : vector<4x8x8xf32> to vector<4x8x8xbf16>
    "tpu.trace_start"() <{level = 10 : i32, message = "hqk,hkd->hqd"}> : () -> ()
    %cst_23 = arith.constant dense<0.000000e+00> : vector<4x8x32xf32>
    %79 = tpu.matmul %78, %55, %cst_23 {dimension_numbers = #tpu.dot_dimension_numbers<[2], [1], [1], [2], [0, 0, 0, 1, 1, 2], [0], [0]>} : vector<4x8x8xbf16>, vector<4x8x32xbf16>, vector<4x8x32xf32> -> vector<4x8x32xf32>
    "tpu.trace_stop"() : () -> ()
    %80 = vector.extract_strided_slice %79 {offsets = [0, 0, 0], sizes = [1, 8, 32], strides = [1, 1, 1]} : vector<4x8x32xf32> to vector<1x8x32xf32>
    %81 = vector.shape_cast %80 : vector<1x8x32xf32> to vector<8x32xf32>
    %82 = vector.extract_strided_slice %79 {offsets = [1, 0, 0], sizes = [1, 8, 32], strides = [1, 1, 1]} : vector<4x8x32xf32> to vector<1x8x32xf32>
    %83 = vector.shape_cast %82 : vector<1x8x32xf32> to vector<8x32xf32>
    %84 = vector.extract_strided_slice %79 {offsets = [2, 0, 0], sizes = [1, 8, 32], strides = [1, 1, 1]} : vector<4x8x32xf32> to vector<1x8x32xf32>
    %85 = vector.shape_cast %84 : vector<1x8x32xf32> to vector<8x32xf32>
    %86 = vector.extract_strided_slice %79 {offsets = [3, 0, 0], sizes = [1, 8, 32], strides = [1, 1, 1]} : vector<4x8x32xf32> to vector<1x8x32xf32>
    %87 = vector.shape_cast %86 : vector<1x8x32xf32> to vector<8x32xf32>
    %88 = tpu.concatenate %81, %83, %85, %87 in 1 : vector<8x32xf32>, vector<8x32xf32>, vector<8x32xf32>, vector<8x32xf32> -> vector<8x128xf32>
    %89 = arith.truncf %88 : vector<8x128xf32> to vector<8x128xbf16>
    %cst_24 = arith.constant dense<0.000000e+00> : vector<8x128xf32>
    %90 = tpu.matmul %89, %12, %cst_24 {dimension_numbers = #tpu.dot_dimension_numbers<[1], [0], [0], [1], [0, 0, 1, 1], [], []>} : vector<8x128xbf16>, vector<128x128xbf16>, vector<8x128xf32> -> vector<8x128xf32>
    %91 = vector.broadcast %13 : vector<1x128xf32> to vector<8x128xf32>
    %92 = arith.addf %90, %91 : vector<8x128xf32>
    %93 = arith.addf %2, %92 : vector<8x128xf32>
    %c0_25 = arith.constant 0 : index
    %c0_26 = arith.constant 0 : index
    %94 = vector.load %arg11[%c0_25, %c0_26] : memref<1x128xf32, #tpu.memory_space<vmem>>, vector<1x128xf32>
    %c0_27 = arith.constant 0 : index
    %c0_28 = arith.constant 0 : index
    %95 = vector.load %arg12[%c0_27, %c0_28] : memref<1x128xf32, #tpu.memory_space<vmem>>, vector<1x128xf32>
    %cst_29 = arith.constant dense<0.000000e+00> : vector<8xf32>
    %96 = vector.multi_reduction <add>, %93, %cst_29 [1] : vector<8x128xf32> to vector<8xf32>
    %97 = vector.shape_cast %96 : vector<8xf32> to vector<8x1xf32>
    %cst_30 = arith.constant 1.280000e+02 : f32
    %98 = vector.broadcast %cst_30 : f32 to vector<8x1xf32>
    %99 = arith.divf %97, %98 : vector<8x1xf32>
    %100 = vector.broadcast %99 : vector<8x1xf32> to vector<8x128xf32>
    %101 = arith.subf %93, %100 : vector<8x128xf32>
    %102 = arith.mulf %101, %101 : vector<8x128xf32>
    %cst_31 = arith.constant dense<0.000000e+00> : vector<8xf32>
    %103 = vector.multi_reduction <add>, %102, %cst_31 [1] : vector<8x128xf32> to vector<8xf32>
    %104 = vector.shape_cast %103 : vector<8xf32> to vector<8x1xf32>
    %cst_32 = arith.constant 1.280000e+02 : f32
    %105 = vector.broadcast %cst_32 : f32 to vector<8x1xf32>
    %106 = arith.divf %104, %105 : vector<8x1xf32>
    %107 = vector.broadcast %99 : vector<8x1xf32> to vector<8x128xf32>
    %108 = arith.subf %93, %107 : vector<8x128xf32>
    %cst_33 = arith.constant 9.99999974E-6 : f32
    %109 = vector.broadcast %cst_33 : f32 to vector<8x1xf32>
    %110 = arith.addf %106, %109 : vector<8x1xf32>
    %111 = math.rsqrt %110 : vector<8x1xf32>
    %112 = vector.broadcast %111 : vector<8x1xf32> to vector<8x128xf32>
    %113 = arith.mulf %108, %112 : vector<8x128xf32>
    %114 = vector.broadcast %94 : vector<1x128xf32> to vector<8x128xf32>
    %115 = arith.mulf %113, %114 : vector<8x128xf32>
    %116 = vector.broadcast %95 : vector<1x128xf32> to vector<8x128xf32>
    %117 = arith.addf %115, %116 : vector<8x128xf32>
    %118 = arith.index_cast %arg0 : i32 to index
    %119 = memref.load %arg2[%118] : memref<2xi32, #tpu.memory_space<smem>>
    %c0_34 = arith.constant 0 : index
    %c0_35 = arith.constant 0 : index
    %120 = vector.load %arg13[%c0_34, %c0_35] : memref<128x128xbf16, #tpu.memory_space<vmem>>, vector<128x128xbf16>
    %c0_36 = arith.constant 0 : index
    %c0_37 = arith.constant 0 : index
    %121 = vector.load %arg14[%c0_36, %c0_37] : memref<1x128xf32, #tpu.memory_space<vmem>>, vector<1x128xf32>
    %c0_38 = arith.constant 0 : index
    %c0_39 = arith.constant 0 : index
    %122 = vector.load %arg15[%c0_38, %c0_39] : memref<128x256xbf16, #tpu.memory_space<vmem>>, vector<128x256xbf16>
    %c0_40 = arith.constant 0 : index
    %c0_41 = arith.constant 0 : index
    %123 = vector.load %arg16[%c0_40, %c0_41] : memref<1x256xf32, #tpu.memory_space<vmem>>, vector<1x256xf32>
    %c0_42 = arith.constant 0 : index
    %c0_43 = arith.constant 0 : index
    %124 = vector.load %arg17[%c0_42, %c0_43] : memref<128x128xbf16, #tpu.memory_space<vmem>>, vector<128x128xbf16>
    %c0_44 = arith.constant 0 : index
    %c0_45 = arith.constant 0 : index
    %125 = vector.load %arg18[%c0_44, %c0_45] : memref<1x128xf32, #tpu.memory_space<vmem>>, vector<1x128xf32>
    %126 = arith.truncf %117 : vector<8x128xf32> to vector<8x128xbf16>
    %cst_46 = arith.constant dense<0.000000e+00> : vector<8x128xf32>
    %127 = tpu.matmul %126, %120, %cst_46 {dimension_numbers = #tpu.dot_dimension_numbers<[1], [0], [0], [1], [0, 0, 1, 1], [], []>} : vector<8x128xbf16>, vector<128x128xbf16>, vector<8x128xf32> -> vector<8x128xf32>
    %128 = vector.broadcast %121 : vector<1x128xf32> to vector<8x128xf32>
    %129 = arith.addf %127, %128 : vector<8x128xf32>
    %cst_47 = arith.constant 0.176776692 : f32
    %130 = vector.broadcast %cst_47 : f32 to vector<8x128xf32>
    %131 = arith.mulf %129, %130 : vector<8x128xf32>
    %132 = arith.truncf %5 : vector<8x128xf32> to vector<8x128xbf16>
    %cst_48 = arith.constant dense<0.000000e+00> : vector<8x256xf32>
    %133 = tpu.matmul %132, %122, %cst_48 {dimension_numbers = #tpu.dot_dimension_numbers<[1], [0], [0], [1], [0, 0, 1, 1], [], []>} : vector<8x128xbf16>, vector<128x256xbf16>, vector<8x256xf32> -> vector<8x256xf32>
    %134 = vector.broadcast %123 : vector<1x256xf32> to vector<8x256xf32>
    %135 = arith.addf %133, %134 : vector<8x256xf32>
    %136 = vector.extract_strided_slice %135 {offsets = [0, 0], sizes = [8, 128], strides = [1, 1]} : vector<8x256xf32> to vector<8x128xf32>
    %137 = vector.extract_strided_slice %135 {offsets = [0, 128], sizes = [8, 128], strides = [1, 1]} : vector<8x256xf32> to vector<8x128xf32>
    %138 = vector.extract_strided_slice %131 {offsets = [0, 0], sizes = [8, 32], strides = [1, 1]} : vector<8x128xf32> to vector<8x32xf32>
    %139 = vector.extract_strided_slice %131 {offsets = [0, 32], sizes = [8, 32], strides = [1, 1]} : vector<8x128xf32> to vector<8x32xf32>
    %140 = vector.extract_strided_slice %131 {offsets = [0, 64], sizes = [8, 32], strides = [1, 1]} : vector<8x128xf32> to vector<8x32xf32>
    %141 = vector.extract_strided_slice %131 {offsets = [0, 96], sizes = [8, 32], strides = [1, 1]} : vector<8x128xf32> to vector<8x32xf32>
    %142 = vector.shape_cast %138 : vector<8x32xf32> to vector<1x8x32xf32>
    %143 = vector.shape_cast %139 : vector<8x32xf32> to vector<1x8x32xf32>
    %144 = vector.shape_cast %140 : vector<8x32xf32> to vector<1x8x32xf32>
    %145 = vector.shape_cast %141 : vector<8x32xf32> to vector<1x8x32xf32>
    %146 = tpu.concatenate %142, %143, %144, %145 in 0 : vector<1x8x32xf32>, vector<1x8x32xf32>, vector<1x8x32xf32>, vector<1x8x32xf32> -> vector<4x8x32xf32>
    %147 = arith.truncf %146 : vector<4x8x32xf32> to vector<4x8x32xbf16>
    %148 = vector.extract_strided_slice %136 {offsets = [0, 0], sizes = [8, 32], strides = [1, 1]} : vector<8x128xf32> to vector<8x32xf32>
    %149 = vector.extract_strided_slice %136 {offsets = [0, 32], sizes = [8, 32], strides = [1, 1]} : vector<8x128xf32> to vector<8x32xf32>
    %150 = vector.extract_strided_slice %136 {offsets = [0, 64], sizes = [8, 32], strides = [1, 1]} : vector<8x128xf32> to vector<8x32xf32>
    %151 = vector.extract_strided_slice %136 {offsets = [0, 96], sizes = [8, 32], strides = [1, 1]} : vector<8x128xf32> to vector<8x32xf32>
    %152 = vector.shape_cast %148 : vector<8x32xf32> to vector<1x8x32xf32>
    %153 = vector.shape_cast %149 : vector<8x32xf32> to vector<1x8x32xf32>
    %154 = vector.shape_cast %150 : vector<8x32xf32> to vector<1x8x32xf32>
    %155 = vector.shape_cast %151 : vector<8x32xf32> to vector<1x8x32xf32>
    %156 = tpu.concatenate %152, %153, %154, %155 in 0 : vector<1x8x32xf32>, vector<1x8x32xf32>, vector<1x8x32xf32>, vector<1x8x32xf32> -> vector<4x8x32xf32>
    %157 = arith.truncf %156 : vector<4x8x32xf32> to vector<4x8x32xbf16>
    %158 = vector.extract_strided_slice %137 {offsets = [0, 0], sizes = [8, 32], strides = [1, 1]} : vector<8x128xf32> to vector<8x32xf32>
    %159 = vector.extract_strided_slice %137 {offsets = [0, 32], sizes = [8, 32], strides = [1, 1]} : vector<8x128xf32> to vector<8x32xf32>
    %160 = vector.extract_strided_slice %137 {offsets = [0, 64], sizes = [8, 32], strides = [1, 1]} : vector<8x128xf32> to vector<8x32xf32>
    %161 = vector.extract_strided_slice %137 {offsets = [0, 96], sizes = [8, 32], strides = [1, 1]} : vector<8x128xf32> to vector<8x32xf32>
    %162 = vector.shape_cast %158 : vector<8x32xf32> to vector<1x8x32xf32>
    %163 = vector.shape_cast %159 : vector<8x32xf32> to vector<1x8x32xf32>
    %164 = vector.shape_cast %160 : vector<8x32xf32> to vector<1x8x32xf32>
    %165 = vector.shape_cast %161 : vector<8x32xf32> to vector<1x8x32xf32>
    %166 = tpu.concatenate %162, %163, %164, %165 in 0 : vector<1x8x32xf32>, vector<1x8x32xf32>, vector<1x8x32xf32>, vector<1x8x32xf32> -> vector<4x8x32xf32>
    %167 = arith.truncf %166 : vector<4x8x32xf32> to vector<4x8x32xbf16>
    "tpu.trace_start"() <{level = 10 : i32, message = "hqd,hkd->hqk"}> : () -> ()
    %cst_49 = arith.constant dense<0.000000e+00> : vector<4x8x8xf32>
    %168 = tpu.matmul %147, %157, %cst_49 {dimension_numbers = #tpu.dot_dimension_numbers<[2], [2], [1], [1], [0, 0, 0, 1, 1, 1], [0], [0]>} : vector<4x8x32xbf16>, vector<4x8x32xbf16>, vector<4x8x8xf32> -> vector<4x8x8xf32>
    "tpu.trace_stop"() : () -> ()
    %169 = tpu.iota {dimensions = array<i32: 1>} : vector<8x8xi32>
    %170 = vector.broadcast %119 : i32 to vector<8x8xi32>
    %171 = arith.cmpi slt, %169, %170 : vector<8x8xi32>
    %172 = vector.shape_cast %171 : vector<8x8xi1> to vector<1x8x8xi1>
    %cst_50 = arith.constant -1.000000e+09 : f32
    %173 = vector.shape_cast %172 : vector<1x8x8xi1> to vector<1x8x8xi1>
    %174 = vector.broadcast %173 : vector<1x8x8xi1> to vector<4x8x8xi1>
    %175 = vector.broadcast %cst_50 : f32 to vector<4x8x8xf32>
    %176 = arith.select %174, %168, %175 : vector<4x8x8xi1>, vector<4x8x8xf32>
    %cst_51 = arith.constant dense<0xFF800000> : vector<4x8xf32>
    %177 = vector.multi_reduction <maximumf>, %176, %cst_51 [2] : vector<4x8x8xf32> to vector<4x8xf32>
    %178 = vector.shape_cast %177 : vector<4x8xf32> to vector<4x8x1xf32>
    %179 = vector.broadcast %178 : vector<4x8x1xf32> to vector<4x8x8xf32>
    %180 = arith.subf %176, %179 : vector<4x8x8xf32>
    %181 = math.exp %180 : vector<4x8x8xf32>
    %cst_52 = arith.constant dense<0.000000e+00> : vector<4x8xf32>
    %182 = vector.multi_reduction <add>, %181, %cst_52 [2] : vector<4x8x8xf32> to vector<4x8xf32>
    %183 = vector.shape_cast %182 : vector<4x8xf32> to vector<4x8x1xf32>
    %184 = tpu.reciprocal %183 {approx = true} : vector<4x8x1xf32> -> vector<4x8x1xf32>
    %185 = vector.broadcast %184 : vector<4x8x1xf32> to vector<4x8x8xf32>
    %186 = arith.mulf %181, %185 : vector<4x8x8xf32>
    %187 = arith.truncf %186 : vector<4x8x8xf32> to vector<4x8x8xbf16>
    "tpu.trace_start"() <{level = 10 : i32, message = "hqk,hkd->hqd"}> : () -> ()
    %cst_53 = arith.constant dense<0.000000e+00> : vector<4x8x32xf32>
    %188 = tpu.matmul %187, %167, %cst_53 {dimension_numbers = #tpu.dot_dimension_numbers<[2], [1], [1], [2], [0, 0, 0, 1, 1, 2], [0], [0]>} : vector<4x8x8xbf16>, vector<4x8x32xbf16>, vector<4x8x32xf32> -> vector<4x8x32xf32>
    "tpu.trace_stop"() : () -> ()
    %189 = vector.extract_strided_slice %188 {offsets = [0, 0, 0], sizes = [1, 8, 32], strides = [1, 1, 1]} : vector<4x8x32xf32> to vector<1x8x32xf32>
    %190 = vector.shape_cast %189 : vector<1x8x32xf32> to vector<8x32xf32>
    %191 = vector.extract_strided_slice %188 {offsets = [1, 0, 0], sizes = [1, 8, 32], strides = [1, 1, 1]} : vector<4x8x32xf32> to vector<1x8x32xf32>
    %192 = vector.shape_cast %191 : vector<1x8x32xf32> to vector<8x32xf32>
    %193 = vector.extract_strided_slice %188 {offsets = [2, 0, 0], sizes = [1, 8, 32], strides = [1, 1, 1]} : vector<4x8x32xf32> to vector<1x8x32xf32>
    %194 = vector.shape_cast %193 : vector<1x8x32xf32> to vector<8x32xf32>
    %195 = vector.extract_strided_slice %188 {offsets = [3, 0, 0], sizes = [1, 8, 32], strides = [1, 1, 1]} : vector<4x8x32xf32> to vector<1x8x32xf32>
    %196 = vector.shape_cast %195 : vector<1x8x32xf32> to vector<8x32xf32>
    %197 = tpu.concatenate %190, %192, %194, %196 in 1 : vector<8x32xf32>, vector<8x32xf32>, vector<8x32xf32>, vector<8x32xf32> -> vector<8x128xf32>
    %198 = arith.truncf %197 : vector<8x128xf32> to vector<8x128xbf16>
    %cst_54 = arith.constant dense<0.000000e+00> : vector<8x128xf32>
    %199 = tpu.matmul %198, %124, %cst_54 {dimension_numbers = #tpu.dot_dimension_numbers<[1], [0], [0], [1], [0, 0, 1, 1], [], []>} : vector<8x128xbf16>, vector<128x128xbf16>, vector<8x128xf32> -> vector<8x128xf32>
    %200 = vector.broadcast %125 : vector<1x128xf32> to vector<8x128xf32>
    %201 = arith.addf %199, %200 : vector<8x128xf32>
    %202 = arith.addf %117, %201 : vector<8x128xf32>
    %c0_55 = arith.constant 0 : index
    %c0_56 = arith.constant 0 : index
    %203 = vector.load %arg19[%c0_55, %c0_56] : memref<1x128xf32, #tpu.memory_space<vmem>>, vector<1x128xf32>
    %c0_57 = arith.constant 0 : index
    %c0_58 = arith.constant 0 : index
    %204 = vector.load %arg20[%c0_57, %c0_58] : memref<1x128xf32, #tpu.memory_space<vmem>>, vector<1x128xf32>
    %cst_59 = arith.constant dense<0.000000e+00> : vector<8xf32>
    %205 = vector.multi_reduction <add>, %202, %cst_59 [1] : vector<8x128xf32> to vector<8xf32>
    %206 = vector.shape_cast %205 : vector<8xf32> to vector<8x1xf32>
    %cst_60 = arith.constant 1.280000e+02 : f32
    %207 = vector.broadcast %cst_60 : f32 to vector<8x1xf32>
    %208 = arith.divf %206, %207 : vector<8x1xf32>
    %209 = vector.broadcast %208 : vector<8x1xf32> to vector<8x128xf32>
    %210 = arith.subf %202, %209 : vector<8x128xf32>
    %211 = arith.mulf %210, %210 : vector<8x128xf32>
    %cst_61 = arith.constant dense<0.000000e+00> : vector<8xf32>
    %212 = vector.multi_reduction <add>, %211, %cst_61 [1] : vector<8x128xf32> to vector<8xf32>
    %213 = vector.shape_cast %212 : vector<8xf32> to vector<8x1xf32>
    %cst_62 = arith.constant 1.280000e+02 : f32
    %214 = vector.broadcast %cst_62 : f32 to vector<8x1xf32>
    %215 = arith.divf %213, %214 : vector<8x1xf32>
    %216 = vector.broadcast %208 : vector<8x1xf32> to vector<8x128xf32>
    %217 = arith.subf %202, %216 : vector<8x128xf32>
    %cst_63 = arith.constant 9.99999974E-6 : f32
    %218 = vector.broadcast %cst_63 : f32 to vector<8x1xf32>
    %219 = arith.addf %215, %218 : vector<8x1xf32>
    %220 = math.rsqrt %219 : vector<8x1xf32>
    %221 = vector.broadcast %220 : vector<8x1xf32> to vector<8x128xf32>
    %222 = arith.mulf %217, %221 : vector<8x128xf32>
    %223 = vector.broadcast %203 : vector<1x128xf32> to vector<8x128xf32>
    %224 = arith.mulf %222, %223 : vector<8x128xf32>
    %225 = vector.broadcast %204 : vector<1x128xf32> to vector<8x128xf32>
    %226 = arith.addf %224, %225 : vector<8x128xf32>
    %c0_64 = arith.constant 0 : index
    %c0_65 = arith.constant 0 : index
    %227 = vector.load %arg21[%c0_64, %c0_65] : memref<128x512xbf16, #tpu.memory_space<vmem>>, vector<128x512xbf16>
    %c0_66 = arith.constant 0 : index
    %c0_67 = arith.constant 0 : index
    %228 = vector.load %arg22[%c0_66, %c0_67] : memref<1x512xf32, #tpu.memory_space<vmem>>, vector<1x512xf32>
    %c0_68 = arith.constant 0 : index
    %c0_69 = arith.constant 0 : index
    %229 = vector.load %arg23[%c0_68, %c0_69] : memref<512x128xbf16, #tpu.memory_space<vmem>>, vector<512x128xbf16>
    %c0_70 = arith.constant 0 : index
    %c0_71 = arith.constant 0 : index
    %230 = vector.load %arg24[%c0_70, %c0_71] : memref<1x128xf32, #tpu.memory_space<vmem>>, vector<1x128xf32>
    %231 = arith.truncf %226 : vector<8x128xf32> to vector<8x128xbf16>
    %cst_72 = arith.constant dense<0.000000e+00> : vector<8x512xf32>
    %232 = tpu.matmul %231, %227, %cst_72 {dimension_numbers = #tpu.dot_dimension_numbers<[1], [0], [0], [1], [0, 0, 1, 1], [], []>} : vector<8x128xbf16>, vector<128x512xbf16>, vector<8x512xf32> -> vector<8x512xf32>
    %233 = vector.broadcast %228 : vector<1x512xf32> to vector<8x512xf32>
    %234 = arith.addf %232, %233 : vector<8x512xf32>
    %cst_73 = arith.constant 0.000000e+00 : f32
    %235 = vector.broadcast %cst_73 : f32 to vector<8x512xf32>
    %236 = arith.maximumf %234, %235 : vector<8x512xf32>
    %237 = arith.truncf %236 : vector<8x512xf32> to vector<8x512xbf16>
    %cst_74 = arith.constant dense<0.000000e+00> : vector<8x128xf32>
    %238 = tpu.matmul %237, %229, %cst_74 {dimension_numbers = #tpu.dot_dimension_numbers<[1], [0], [0], [1], [0, 0, 1, 1], [], []>} : vector<8x512xbf16>, vector<512x128xbf16>, vector<8x128xf32> -> vector<8x128xf32>
    %239 = vector.broadcast %230 : vector<1x128xf32> to vector<8x128xf32>
    %240 = arith.addf %238, %239 : vector<8x128xf32>
    %241 = arith.addf %226, %240 : vector<8x128xf32>
    %c0_75 = arith.constant 0 : index
    %c0_76 = arith.constant 0 : index
    %242 = vector.load %arg25[%c0_75, %c0_76] : memref<1x128xf32, #tpu.memory_space<vmem>>, vector<1x128xf32>
    %c0_77 = arith.constant 0 : index
    %c0_78 = arith.constant 0 : index
    %243 = vector.load %arg26[%c0_77, %c0_78] : memref<1x128xf32, #tpu.memory_space<vmem>>, vector<1x128xf32>
    %cst_79 = arith.constant dense<0.000000e+00> : vector<8xf32>
    %244 = vector.multi_reduction <add>, %241, %cst_79 [1] : vector<8x128xf32> to vector<8xf32>
    %245 = vector.shape_cast %244 : vector<8xf32> to vector<8x1xf32>
    %cst_80 = arith.constant 1.280000e+02 : f32
    %246 = vector.broadcast %cst_80 : f32 to vector<8x1xf32>
    %247 = arith.divf %245, %246 : vector<8x1xf32>
    %248 = vector.broadcast %247 : vector<8x1xf32> to vector<8x128xf32>
    %249 = arith.subf %241, %248 : vector<8x128xf32>
    %250 = arith.mulf %249, %249 : vector<8x128xf32>
    %cst_81 = arith.constant dense<0.000000e+00> : vector<8xf32>
    %251 = vector.multi_reduction <add>, %250, %cst_81 [1] : vector<8x128xf32> to vector<8xf32>
    %252 = vector.shape_cast %251 : vector<8xf32> to vector<8x1xf32>
    %cst_82 = arith.constant 1.280000e+02 : f32
    %253 = vector.broadcast %cst_82 : f32 to vector<8x1xf32>
    %254 = arith.divf %252, %253 : vector<8x1xf32>
    %255 = vector.broadcast %247 : vector<8x1xf32> to vector<8x128xf32>
    %256 = arith.subf %241, %255 : vector<8x128xf32>
    %cst_83 = arith.constant 9.99999974E-6 : f32
    %257 = vector.broadcast %cst_83 : f32 to vector<8x1xf32>
    %258 = arith.addf %254, %257 : vector<8x1xf32>
    %259 = math.rsqrt %258 : vector<8x1xf32>
    %260 = vector.broadcast %259 : vector<8x1xf32> to vector<8x128xf32>
    %261 = arith.mulf %256, %260 : vector<8x128xf32>
    %262 = vector.broadcast %242 : vector<1x128xf32> to vector<8x128xf32>
    %263 = arith.mulf %261, %262 : vector<8x128xf32>
    %264 = vector.broadcast %243 : vector<1x128xf32> to vector<8x128xf32>
    %265 = arith.addf %263, %264 : vector<8x128xf32>
    %266 = vector.shape_cast %265 : vector<8x128xf32> to vector<1x8x128xf32>
    %267 = arith.truncf %266 : vector<1x8x128xf32> to vector<1x8x128xbf16>
    %c0_84 = arith.constant 0 : index
    %c0_85 = arith.constant 0 : index
    %c0_86 = arith.constant 0 : index
    %268 = vector.load %arg27[%c0_84, %c0_85, %c0_86] : memref<1x8x128xbf16, #tpu.memory_space<vmem>>, vector<1x8x128xbf16>
    tpu.vector_store %arg27[%c0_84, %c0_85, %c0_86], %267 {strides = array<i32>} : memref<1x8x128xbf16, #tpu.memory_space<vmem>>, vector<1x8x128xbf16>,
    return
  }
  func.func @transform_0(%arg0: i32, %arg1: memref<2xi32, #tpu.memory_space<smem>>, %arg2: memref<2xi32, #tpu.memory_space<smem>>) -> (i32, i32, i32) {
    %c0_i32 = arith.constant 0 : i32
    %c0_i32_0 = arith.constant 0 : i32
    %c0_i32_1 = arith.constant 0 : i32
    return %arg0, %c0_i32, %c0_i32_0 : i32, i32, i32
  }
  func.func @transform_1(%arg0: i32, %arg1: memref<2xi32, #tpu.memory_space<smem>>, %arg2: memref<2xi32, #tpu.memory_space<smem>>) -> (i32, i32, i32) {
    %c0_i32 = arith.constant 0 : i32
    %c0_i32_0 = arith.constant 0 : i32
    %c0_i32_1 = arith.constant 0 : i32
    return %arg0, %c0_i32, %c0_i32_0 : i32, i32, i32
  }
  func.func @transform_2(%arg0: i32, %arg1: memref<2xi32, #tpu.memory_space<smem>>, %arg2: memref<2xi32, #tpu.memory_space<smem>>) -> (i32, i32) {
    %c0_i32 = arith.constant 0 : i32
    %c0_i32_0 = arith.constant 0 : i32
    %c0_i32_1 = arith.constant 0 : i32
    return %c0_i32, %c0_i32_0 : i32, i32
  }
  func.func @transform_3(%arg0: i32, %arg1: memref<2xi32, #tpu.memory_space<smem>>, %arg2: memref<2xi32, #tpu.memory_space<smem>>) -> (i32, i32) {
    %c0_i32 = arith.constant 0 : i32
    %c0_i32_0 = arith.constant 0 : i32
    %c0_i32_1 = arith.constant 0 : i32
    return %c0_i32, %c0_i32_0 : i32, i32
  }
  func.func @transform_4(%arg0: i32, %arg1: memref<2xi32, #tpu.memory_space<smem>>, %arg2: memref<2xi32, #tpu.memory_space<smem>>) -> (i32, i32) {
    %c0_i32 = arith.constant 0 : i32
    %c0_i32_0 = arith.constant 0 : i32
    %c0_i32_1 = arith.constant 0 : i32
    return %c0_i32, %c0_i32_0 : i32, i32
  }
  func.func @transform_5(%arg0: i32, %arg1: memref<2xi32, #tpu.memory_space<smem>>, %arg2: memref<2xi32, #tpu.memory_space<smem>>) -> (i32, i32) {
    %c0_i32 = arith.constant 0 : i32
    %c0_i32_0 = arith.constant 0 : i32
    %c0_i32_1 = arith.constant 0 : i32
    return %c0_i32, %c0_i32_0 : i32, i32
  }
  func.func @transform_6(%arg0: i32, %arg1: memref<2xi32, #tpu.memory_space<smem>>, %arg2: memref<2xi32, #tpu.memory_space<smem>>) -> (i32, i32) {
    %c0_i32 = arith.constant 0 : i32
    %c0_i32_0 = arith.constant 0 : i32
    %c0_i32_1 = arith.constant 0 : i32
    return %c0_i32, %c0_i32_0 : i32, i32
  }
  func.func @transform_7(%arg0: i32, %arg1: memref<2xi32, #tpu.memory_space<smem>>, %arg2: memref<2xi32, #tpu.memory_space<smem>>) -> (i32, i32) {
    %c0_i32 = arith.constant 0 : i32
    %c0_i32_0 = arith.constant 0 : i32
    %c0_i32_1 = arith.constant 0 : i32
    return %c0_i32, %c0_i32_0 : i32, i32
  }
  func.func @transform_8(%arg0: i32, %arg1: memref<2xi32, #tpu.memory_space<smem>>, %arg2: memref<2xi32, #tpu.memory_space<smem>>) -> (i32, i32) {
    %c0_i32 = arith.constant 0 : i32
    %c0_i32_0 = arith.constant 0 : i32
    %c0_i32_1 = arith.constant 0 : i32
    return %c0_i32, %c0_i32_0 : i32, i32
  }
  func.func @transform_9(%arg0: i32, %arg1: memref<2xi32, #tpu.memory_space<smem>>, %arg2: memref<2xi32, #tpu.memory_space<smem>>) -> (i32, i32) {
    %c0_i32 = arith.constant 0 : i32
    %c0_i32_0 = arith.constant 0 : i32
    %c0_i32_1 = arith.constant 0 : i32
    return %c0_i32, %c0_i32_0 : i32, i32
  }
  func.func @transform_10(%arg0: i32, %arg1: memref<2xi32, #tpu.memory_space<smem>>, %arg2: memref<2xi32, #tpu.memory_space<smem>>) -> (i32, i32) {
    %c0_i32 = arith.constant 0 : i32
    %c0_i32_0 = arith.constant 0 : i32
    %c0_i32_1 = arith.constant 0 : i32
    return %c0_i32, %c0_i32_0 : i32, i32
  }
  func.func @transform_11(%arg0: i32, %arg1: memref<2xi32, #tpu.memory_space<smem>>, %arg2: memref<2xi32, #tpu.memory_space<smem>>) -> (i32, i32) {
    %c0_i32 = arith.constant 0 : i32
    %c0_i32_0 = arith.constant 0 : i32
    %c0_i32_1 = arith.constant 0 : i32
    return %c0_i32, %c0_i32_0 : i32, i32
  }
  func.func @transform_12(%arg0: i32, %arg1: memref<2xi32, #tpu.memory_space<smem>>, %arg2: memref<2xi32, #tpu.memory_space<smem>>) -> (i32, i32) {
    %c0_i32 = arith.constant 0 : i32
    %c0_i32_0 = arith.constant 0 : i32
    %c0_i32_1 = arith.constant 0 : i32
    return %c0_i32, %c0_i32_0 : i32, i32
  }
  func.func @transform_13(%arg0: i32, %arg1: memref<2xi32, #tpu.memory_space<smem>>, %arg2: memref<2xi32, #tpu.memory_space<smem>>) -> (i32, i32) {
    %c0_i32 = arith.constant 0 : i32
    %c0_i32_0 = arith.constant 0 : i32
    %c0_i32_1 = arith.constant 0 : i32
    return %c0_i32, %c0_i32_0 : i32, i32
  }
  func.func @transform_14(%arg0: i32, %arg1: memref<2xi32, #tpu.memory_space<smem>>, %arg2: memref<2xi32, #tpu.memory_space<smem>>) -> (i32, i32) {
    %c0_i32 = arith.constant 0 : i32
    %c0_i32_0 = arith.constant 0 : i32
    %c0_i32_1 = arith.constant 0 : i32
    return %c0_i32, %c0_i32_0 : i32, i32
  }
  func.func @transform_15(%arg0: i32, %arg1: memref<2xi32, #tpu.memory_space<smem>>, %arg2: memref<2xi32, #tpu.memory_space<smem>>) -> (i32, i32) {
    %c0_i32 = arith.constant 0 : i32
    %c0_i32_0 = arith.constant 0 : i32
    %c0_i32_1 = arith.constant 0 : i32
    return %c0_i32, %c0_i32_0 : i32, i32
  }
  func.func @transform_16(%arg0: i32, %arg1: memref<2xi32, #tpu.memory_space<smem>>, %arg2: memref<2xi32, #tpu.memory_space<smem>>) -> (i32, i32) {
    %c0_i32 = arith.constant 0 : i32
    %c0_i32_0 = arith.constant 0 : i32
    %c0_i32_1 = arith.constant 0 : i32
    return %c0_i32, %c0_i32_0 : i32, i32
  }
  func.func @transform_17(%arg0: i32, %arg1: memref<2xi32, #tpu.memory_space<smem>>, %arg2: memref<2xi32, #tpu.memory_space<smem>>) -> (i32, i32) {
    %c0_i32 = arith.constant 0 : i32
    %c0_i32_0 = arith.constant 0 : i32
    %c0_i32_1 = arith.constant 0 : i32
    return %c0_i32, %c0_i32_0 : i32, i32
  }
  func.func @transform_18(%arg0: i32, %arg1: memref<2xi32, #tpu.memory_space<smem>>, %arg2: memref<2xi32, #tpu.memory_space<smem>>) -> (i32, i32) {
    %c0_i32 = arith.constant 0 : i32
    %c0_i32_0 = arith.constant 0 : i32
    %c0_i32_1 = arith.constant 0 : i32
    return %c0_i32, %c0_i32_0 : i32, i32
  }
  func.func @transform_19(%arg0: i32, %arg1: memref<2xi32, #tpu.memory_space<smem>>, %arg2: memref<2xi32, #tpu.memory_space<smem>>) -> (i32, i32) {
    %c0_i32 = arith.constant 0 : i32
    %c0_i32_0 = arith.constant 0 : i32
    %c0_i32_1 = arith.constant 0 : i32
    return %c0_i32, %c0_i32_0 : i32, i32
  }
  func.func @transform_20(%arg0: i32, %arg1: memref<2xi32, #tpu.memory_space<smem>>, %arg2: memref<2xi32, #tpu.memory_space<smem>>) -> (i32, i32) {
    %c0_i32 = arith.constant 0 : i32
    %c0_i32_0 = arith.constant 0 : i32
    %c0_i32_1 = arith.constant 0 : i32
    return %c0_i32, %c0_i32_0 : i32, i32
  }
  func.func @transform_21(%arg0: i32, %arg1: memref<2xi32, #tpu.memory_space<smem>>, %arg2: memref<2xi32, #tpu.memory_space<smem>>) -> (i32, i32) {
    %c0_i32 = arith.constant 0 : i32
    %c0_i32_0 = arith.constant 0 : i32
    %c0_i32_1 = arith.constant 0 : i32
    return %c0_i32, %c0_i32_0 : i32, i32
  }
  func.func @transform_22(%arg0: i32, %arg1: memref<2xi32, #tpu.memory_space<smem>>, %arg2: memref<2xi32, #tpu.memory_space<smem>>) -> (i32, i32) {
    %c0_i32 = arith.constant 0 : i32
    %c0_i32_0 = arith.constant 0 : i32
    %c0_i32_1 = arith.constant 0 : i32
    return %c0_i32, %c0_i32_0 : i32, i32
  }
  func.func @transform_23(%arg0: i32, %arg1: memref<2xi32, #tpu.memory_space<smem>>, %arg2: memref<2xi32, #tpu.memory_space<smem>>) -> (i32, i32) {
    %c0_i32 = arith.constant 0 : i32
    %c0_i32_0 = arith.constant 0 : i32
    %c0_i32_1 = arith.constant 0 : i32
    return %c0_i32, %c0_i32_0 : i32, i32
  }
  func.func @transform_24(%arg0: i32, %arg1: memref<2xi32, #tpu.memory_space<smem>>, %arg2: memref<2xi32, #tpu.memory_space<smem>>) -> (i32, i32, i32) {
    %c0_i32 = arith.constant 0 : i32
    %c0_i32_0 = arith.constant 0 : i32
    %c0_i32_1 = arith.constant 0 : i32
    return %arg0, %c0_i32, %c0_i32_0 : i32, i32, i32
  }
}

</mosaic_0001>

<bundles_post_ra>
// kernel: transformer_forward.9
= control target key start
LH: loop header
LB: loop body
LE: loop exit
PB: predicated region body
PF: predicated region fallthrough
CT: control target
= control target key end

     0   :  { %8 = vsyncpa [#allocation3], 0  ;;  %s983_s0 = inlined_call_operand.hbm [shape: bf16[2,8,128], index: 0, kind: input, shape index: {}]   ;;  %s984_s1 = inlined_call_operand.hbm [shape: bf16[128,128], index: 1, kind: input, shape index: {}]   ;;  %s985_s2 = inlined_call_operand.hbm [shape: f32[1,128], index: 2, kind: input, shape index: {}]   ;;  %s986_s3 = inlined_call_operand.hbm [shape: f32[2,8,128], index: 3, kind: output, shape index: {}]  }
   0x1   :  { %10 = vsyncpa [#allocation3 + $0x1], 0 }
   0x2   :  { %11 = vsyncpa [#allocation6], 0 }
   0x3   :  { %12 = vsyncpa [#allocation4], 0 }
   0x4   :  { %14 = vsyncpa [#allocation4 + $0x1], 0  ;;  %s749_s12 = smov 0   ;;  %s751_s13 = smov 0  }
   0x5   :  { %s753_s14 = smov 0   ;;  %s755_s15 = smov 0  }
   0x6 LB: > { %s770_s16 = sadd.s32 4294967295, %s719_s15   ;;  %s430_s17 = sadd.s32 4294967294, %s719_s15   ;;  %s719_s15 = sphi %s755_s15, %s1006_s15   ;;  %s715_s14 = sphi %s753_s14, %s1005_s14   ;;  %s711_s13 = sphi %s751_s13, %s1004_s13   ;;  %s707_s12 = sphi %s749_s12, %s1003_s12  }
   0x7   : > { %p40_p0 = scmp.ne.s32.totalorder %s711_s13, %s707_s12  ;;  %p987_p1 = scmp.eq.s32.totalorder %s770_s16, 0 }
   0x8   : > { %p112_p3 = scmp.eq.s32.totalorder %s430_s17, 1  ;;  %p431_p5 = scmp.ge.s32.totalorder %s719_s15, 1 }
   0x9   : > { %p779_p4 = por %p987_p1, %p40_p0  ;;  %p119_p7 = scmp.lt.s32.totalorder %s719_s15, 3 }
   0xa   : > { %p784_p6 = por %p112_p3, %p40_p0  ;;  %s721_s21 = smov [#allocation5]  }
   0xb   : > { %s990_s18 = scalar_select %p779_p4, 1, 0 }
   0xc   : > { %s991_s19 = scalar_select %p784_p6, 1, 0 }
   0xd   : > { %p789_p8 = pnand %p431_p5, %p119_p7  ;;  %s131_s22 = sshll.u32 %s721_s21, 4  ;;  %s793_s22 = int_to_ptr.vmem [resolvable:$true] %s131_s22 }
   0xe   : > { %s722_s24 = smov [#allocation7]   ;;  %s563_s28 = scalar_lea.hbm %s984_s1, 1024 }
   0xf   : > { %p496_p9 = pneg %p789_p8  ;;  %s145_s25 = sshll.u32 %s722_s24, 4  ;;  %s804_s25 = int_to_ptr.vmem [resolvable:$true] %s145_s25 }
  0x10   : > { %p564_p12 = scmp.ne.s32.totalorder %s984_s1, %s563_s28  ;;  %p570_p5 = scmp.lt.u32.totalorder %s563_s28, %s984_s1 }
  0x11   : > { %p800_p11 = pnand %p496_p9, %p987_p1 }
  0x13   : > { %p565_p13 = pneg %p800_p11 }
  0x15   : > { %p566_p0 = pnand %p565_p13, %p564_p12 }
  0x17   : > { %p567_p3 = pneg %p566_p0 }
  0x19   : > { %p572_p7 = pnand %p570_p5, %p567_p3 }
  0x1b   : > { %575 = shalt.err (!%p572_p7)
}
  0x1c   : > { %s576_s6 = scalar_lea.vmem %s793_s22, 1024  ;;  %p584_p2 = scmp.lt.s32.totalorder %s793_s22, %s793_s22 }
  0x1d   : > { %p577_p9 = scmp.ne.s32.totalorder %s793_s22, %s576_s6  ;;  %p585_p12 = scmp.lt.s32.totalorder %s576_s6, %s576_s6 }
  0x1f   : > { %p579_p10 = pnand %p577_p9, %p565_p13  ;;  %p586_p0 = por %p585_p12, %p584_p2 }
  0x21   : > { %p580_p1 = pneg %p579_p10 }
  0x23   : > { %p587_p6 = pnand %p586_p0, %p580_p1 }
  0x25   : > { %590 = shalt.err (!%p587_p6)
}
  0x26   : > { %s723_s7 = smov 64   ;;  %s724_s8 = smov 4  }
  0x27   : > { %499 = dma.hbm_to_vmem [thread:$0]  (!%p800_p11), %s984_s1, 1024, %s793_s22, [#allocation6], %s723_s7, %s723_s7, %s724_s8  }
  0x28   : > { %s591_s21 = scalar_lea.hbm %s985_s2, 16 }
  0x29   : > { %p592_p2 = scmp.ne.s32.totalorder %s985_s2, %s591_s21  ;;  %p598_p10 = scmp.lt.u32.totalorder %s591_s21, %s985_s2 }
  0x2b   : > { %p594_p1 = pnand %p592_p2, %p565_p13 }
  0x2d   : > { %p595_p6 = pneg %p594_p1 }
  0x2f   : > { %p600_p3 = pnand %p598_p10, %p595_p6 }
  0x31   : > { %603 = shalt.err (!%p600_p3)
}
  0x32   : > { %s604_s22 = scalar_lea.vmem %s804_s25, 16  ;;  %s611_s29 = scalar_lea.vmem %s804_s25, 32 }
  0x33   : > { %p605_p5 = scmp.ne.s32.totalorder %s804_s25, %s604_s22  ;;  %p612_p12 = scmp.lt.s32.totalorder %s804_s25, %s804_s25 }
  0x34   : > { %p613_p0 = scmp.lt.s32.totalorder %s611_s29, %s604_s22 }
  0x35   : > { %p607_p7 = pnand %p605_p5, %p565_p13 }
  0x36   : > { %p614_p2 = por %p613_p0, %p612_p12 }
  0x37   : > { %p608_p9 = pneg %p607_p7 }
  0x39   : > { %p615_p1 = pnand %p614_p2, %p608_p9 }
  0x3b   : > { %618 = shalt.err (!%p615_p1)
}
  0x3c   : > { %502 = dma.hbm_to_vmem [thread:$0]  (!%p800_p11), %s985_s2, 16, %s804_s25, [#allocation6]  }
  0x3d   : > { %s860_s5 = sadd.s32 1, %s719_s15   ;;  %s27_s23 = sadd.s32 1, %s715_s14 }
  0x3e   : > { %s24_s6 = ssub.s32 %s719_s15, %s860_s5  ;;  %p34_p13 = scmp.ne.s32.totalorder %s715_s14, %s711_s13 }
  0x3f   : > { %p25_p6 = scmp.eq.s32.totalorder %s24_s6, 0  ;;  %p35_p10 = scmp.eq.s32.totalorder %s719_s15, 0 }
  0x40   : > { %p994_p3 = scmp.eq.s32.totalorder %s770_s16, 1  ;;  %p513_p7 = scmp.lt.s32.totalorder %s719_s15, 2 }
  0x41   : > { %s876_s8 = scalar_select %p25_p6, %s715_s14, %s27_s23  }
  0x42   : > { %p870_p5 = por %p994_p3, %p34_p13  ;;  %p36_p9 = por %p35_p10, %p34_p13 }
  0x43   : > { %s156_s9 = sand.u32 1, %s715_s14   ;;  %s436_s25 = sshll.u32 %s719_s15, 6 }
  0x44   : > { %s995_s7 = scalar_select %p870_p5, 1, 0 }
  0x45   : > { %s435_s10 = sshll.u32 %s156_s9, 2  ;;  %s883_s21 = scalar_lea.hbm %s983_s0, %s436_s25 }
  0x46   : > { %s160_s24 = scalar_lea.vmem [#allocation2], %s435_s10  ;;  %p887_p11 = pnand %p513_p7, %p36_p9 }
  0x47   : > { %s167_s26 = sshll.u32 %s160_s24, 4  ;;  %s157_s28 = scalar_lea.sflag [#allocation3], %s156_s9  ;;  %s885_s26 = int_to_ptr.vmem [resolvable:$true] %s167_s26 }
  0x48   : > { %s619_s22 = scalar_lea.hbm %s883_s21, 64  ;;  %p621_p0 = pneg %p887_p11 }
  0x49   : > { %p620_p12 = scmp.ne.s32.totalorder %s883_s21, %s619_s22  ;;  %s624_s4 = scalar_lea.hbm %s983_s0, 128 }
  0x4a   : > { %p625_p13 = scmp.lt.u32.totalorder %s883_s21, %s983_s0  ;;  %p626_p6 = scmp.lt.u32.totalorder %s624_s4, %s619_s22 }
  0x4b   : > { %p622_p2 = pnand %p621_p0, %p620_p12  ;;  %p628_p3 = scmp.lt.u32.totalorder %s619_s22, %s883_s21 }
  0x4c   : > { %p627_p10 = por %p626_p6, %p625_p13 }
  0x4d   : > { %p623_p1 = pneg %p622_p2 }
  0x4e   : > { %p629_p7 = por %p628_p3, %p627_p10 }
  0x50   : > { %p630_p9 = pnand %p629_p7, %p623_p1 }
  0x52   : > { %633 = shalt.err (!%p630_p9)
}
  0x53   : > { %s634_s9 = scalar_lea.vmem %s885_s26, 64  ;;  %s725_s10 = smov [#allocation2]  }
  0x54   : > { %p635_p12 = scmp.ne.s32.totalorder %s885_s26, %s634_s9  ;;  %s639_s25 = sshll.u32 %s725_s10, 4  ;;  %s640_s25 = int_to_ptr.vmem [resolvable:$false] %s639_s25 }
  0x55   : > { %s641_s11 = scalar_lea.vmem %s640_s25, 128  ;;  %p642_p4 = scmp.lt.s32.totalorder %s885_s26, %s640_s25 }
  0x56   : > { %p637_p2 = pnand %p635_p12, %p621_p0  ;;  %p643_p13 = scmp.lt.s32.totalorder %s641_s11, %s634_s9 }
  0x58   : > { %p638_p5 = pneg %p637_p2  ;;  %p644_p6 = por %p643_p13, %p642_p4 }
  0x5a   : > { %p645_p10 = pnand %p644_p6, %p638_p5 }
  0x5c   : > { %648 = shalt.err (!%p645_p10)
}
  0x5d   : > { %506 = dma.hbm_to_vmem [thread:$0]  (!%p887_p11), %s883_s21, 64, %s885_s26, %s157_s28  }
  0x5e   : > { %176 = sbr.rel (%p789_p8) target bundleno = 366 (0x16e), region = 32  ;;  %s919_s17 = sand.u32 (!%p789_p8), 1, %s711_s13  }
  0x5f   : > { %s438_s24 = sshll.u32 (!%p789_p8), %s919_s17, 2  ;;  %s179_s22 = scalar_lea.sflag (!%p789_p8), [#allocation3], %s919_s17 }
  0x60   : > { %s923_s29 = scalar_lea.vmem (!%p789_p8), [#allocation2], %s438_s24  ;;  %p997_p4 = scmp.ne.s32.totalorder (!%p789_p8), %s990_s18, 0 }
  0x65   : > { %694 = dma.done.wait (%p997_p4), %s179_s22, 64  }
  0x66   : > { %696 = vsyncadd (%p997_p4), %s179_s22, 4294967232  ;;  %p998_p5 = scmp.eq.s32.totalorder %s770_s16, 0 }
  0x68   : > { %698 = dma.done.wait (%p998_p5), [#allocation6], 1040   ;;  %p999_p8 = pmov %p998_p5 }
  0x69   : > { %v726_v0 = vmov 0.0   ;;  %vm727_vm0 = vmmov 0   ;;  %v555_v1 = vld [vmem:[#allocation5] sm:$0xff]   ;;  %v556_v2 = vld [vmem:[#allocation5 + $0x8] sm:$0xff]   ;;  %v557_v3 = vld [vmem:[#allocation5 + $0x10] sm:$0xff]   ;;  %s441_s18 = sshll.u32 %s919_s17, 3 }
  0x6a   : > { %700 = vsyncadd (%p999_p8), [#allocation6], 4294966256  ;;  %464 = vmatprep.subr.bf16.mxu0 %v726_v0  ;;  %480 = vmatprep.mubr.msk.bf16.mxu0 %vm727_vm0, %v726_v0  ;;  %v558_v4 = vld [vmem:[#allocation5 + $0x18] sm:$0xff]   ;;  %v559_v5 = vld [vmem:[#allocation5 + $0x20] sm:$0xff]   ;;  %s452_s20 = sshll.u32 %s770_s16, 7  ;;  %s212_s21 = scalar_lea.vmem [#allocation8], %s441_s18 }
  0x6b   : > { %465 = vmatpush3.bf16.msra.mxu0 %v555_v1  ;;  %v560_v6 = vld [vmem:[#allocation5 + $0x28] sm:$0xff]   ;;  %v561_v7 = vld [vmem:[#allocation5 + $0x30] sm:$0xff]   ;;  %v562_v8 = vld [vmem:[#allocation5 + $0x38] sm:$0xff]   ;;  %s341_s26 = sshll.u32 %s212_s21, 4  ;;  %s939_s30 = scalar_lea.hbm %s986_s3, %s452_s20  ;;  %s941_s26 = int_to_ptr.vmem [resolvable:$true] %s341_s26 }
  0x6c   : > { %466 = vmatprep.subr.bf16.mxu0 %v726_v0  ;;  %v214_v9 = vld [vmem:[%s923_s29] sm:$0xf]  ;;  %v442_v10 = vld [vmem:[#allocation7] ss:$0 sm:$0xff]  ;;  %s328_s4 = scalar_lea.sflag [#allocation4], %s919_s17  ;;  %s649_s16 = scalar_lea.vmem %s941_s26, 128 }
  0x6d   : > { %p650_p11 = scmp.ne.s32.totalorder %s941_s26, %s649_s16  ;;  %p1000_p0 = scmp.ne.s32.totalorder %s995_s7, 0 }
  0x6e   : > { %s728_s23 = smov [#allocation8]  }
  0x6f   : > { %467 = vmatpush3.bf16.msra.mxu0 %v556_v2  ;;  %p651_p1 = pnand %p650_p11, %p1000_p0  ;;  %s653_s6 = sshll.u32 %s728_s23, 4  ;;  %s654_s6 = int_to_ptr.vmem [resolvable:$false] %s653_s6 }
  0x70   : > { %468 = vmatprep.subr.bf16.mxu0 %v726_v0  ;;  %s655_s9 = scalar_lea.vmem %s654_s6, 256  ;;  %p656_p7 = scmp.lt.s32.totalorder %s941_s26, %s654_s6 }
  0x71   : > { %p652_p3 = pneg %p651_p1  ;;  %p657_p9 = scmp.lt.s32.totalorder %s655_s9, %s649_s16 }
  0x73   : > { %469 = vmatpush3.bf16.msra.mxu0 %v557_v3  ;;  %p658_p12 = por %p657_p9, %p656_p7 }
  0x74   : > { %470 = vmatprep.subr.bf16.mxu0 %v726_v0 }
  0x75   : > { %p659_p2 = pnand %p658_p12, %p652_p3 }
  0x77   : > { %471 = vmatpush3.bf16.msra.mxu0 %v558_v4 }
  0x78   : > { %472 = vmatprep.subr.bf16.mxu0 %v726_v0 }
  0x7b   : > { %473 = vmatpush3.bf16.msra.mxu0 %v559_v5 }
  0x7c   : > { %474 = vmatprep.subr.bf16.mxu0 %v726_v0 }
  0x7f   : > { %475 = vmatpush3.bf16.msra.mxu0 %v560_v6 }
  0x80   : > { %476 = vmatprep.subr.bf16.mxu0 %v726_v0 }
  0x83   : > { %477 = vmatpush3.bf16.msra.mxu0 %v561_v7 }
  0x84   : > { %478 = vmatprep.subr.bf16.mxu0 %v726_v0 }
  0x87   : > { %479 = vmatpush3.bf16.msra.mxu0 %v562_v8 }
  0x8a   : > { %481 = vmatmul.mubr.bf16.vlgmr.msra.gmra.mrb[0].mxu0 %v214_v9 }
 0x15d   : > { %v320_v11 = vpop.f32.mrb[0].mxu0 }
 0x15e   : > { %v321_v12 = vadd.f32 %v442_v10, %v320_v11  ;;  %v482_v13 = vpop.f32.mrb[1].mxu0 }
 0x15f   : > { %v323_v14 = vpop.f32.mrb[2].mxu0 }
 0x160   : > { %326 = vst [vmem:[%s212_s21] sm:$0xff] %v321_v12  ;;  %v483_v15 = vpop.f32.mrb[3].mxu0 }
 0x161   : > { %662 = shalt.err (!%p659_p2)
}
 0x162   : > { %s663_s10 = scalar_lea.hbm %s939_s30, 128  ;;  %s667_s17 = scalar_lea.hbm %s986_s3, 256 }
 0x163   : > { %p664_p13 = scmp.ne.s32.totalorder %s939_s30, %s663_s10  ;;  %p668_p4 = scmp.lt.u32.totalorder %s939_s30, %s986_s3 }
 0x164   : > { %p669_p5 = scmp.lt.u32.totalorder %s667_s17, %s663_s10  ;;  %p671_p11 = scmp.lt.u32.totalorder %s663_s10, %s939_s30 }
 0x165   : > { %p665_p6 = pnand %p664_p13, %p1000_p0 }
 0x166   : > { %p670_p8 = por %p669_p5, %p668_p4 }
 0x167   : > { %p666_p10 = pneg %p665_p6 }
 0x168   : > { %p672_p1 = por %p671_p11, %p670_p8 }
 0x16a   : > { %p673_p3 = pnand %p672_p1, %p666_p10 }
 0x16c   : > { %676 = shalt.err (!%p673_p3)
}
 0x16d   : > { %494 = dma.vmem_to_hbm [thread:$0]  (%p1000_p0), %s941_s26, 128, %s939_s30, %s328_s4  }
 0x16e PF: > { %s353_s29 = sand.u32 1, %s707_s12   ;;  %p1001_p7 = scmp.ne.s32.totalorder %s991_s19, 0 }
 0x16f   : > { %p1002_p9 = scmp.ge.s32.totalorder %s719_s15, 2  ;;  %s354_s18 = scalar_lea.sflag [#allocation4], %s353_s29 }
 0x171   : > { %p508_p12 = pnand %p1002_p9, %p1001_p7 }
 0x173   : > { %702 = dma.done.wait (!%p508_p12), %s354_s18, 128  }
 0x174   : > { %704 = vsyncadd (!%p508_p12), %s354_s18, 4294967168  ;;  %p17_p2 = scmp.ge.s32.totalorder %s860_s5, 4   ;;  %s1003_s12 = smov %s711_s13 }
 0x175   : > { %s1004_s13 = smov %s715_s14  ;;  %s1005_s14 = smov %s876_s8 }
 0x176   : > { %s1006_s15 = smov %s860_s5  ;;  %19 = sbr.rel (!%p17_p2) target bundleno = 6 (0x6), region = 85 }
 0x17d   :  { %359 = vsyncpa [#allocation3], 1 }
 0x17e   :  { %361 = vsyncpa [#allocation3 + $0x1], 1 }
 0x17f   :  { %362 = vsyncpa [#allocation6], 1 }
 0x180   :  { %363 = vsyncpa [#allocation4], 1 }
 0x181   :  { %365 = vsyncpa [#allocation4 + $0x1], 1 }

// kernel: transformer_forward.5
= control target key start
LH: loop header
LB: loop body
LE: loop exit
PB: predicated region body
PF: predicated region fallthrough
CT: control target
= control target key end

     0   :  { %s4424_s0 = inlined_call_operand.hbm [shape: s32[2], index: 0, kind: input, shape index: {}]   ;;  %s4425_s1 = inlined_call_operand.hbm [shape: bf16[2,8,128], index: 1, kind: input, shape index: {}]   ;;  %s4426_s2 = inlined_call_operand.hbm [shape: bf16[128,128], index: 2, kind: input, shape index: {}]   ;;  %s4427_s3 = inlined_call_operand.hbm [shape: f32[1,128], index: 3, kind: input, shape index: {}]   ;;  %s4428_s4 = inlined_call_operand.hbm [shape: bf16[128,256], index: 4, kind: input, shape index: {}]   ;;  %s4429_s5 = inlined_call_operand.hbm [shape: f32[1,256], index: 5, kind: input, shape index: {}]   ;;  %s4430_s6 = inlined_call_operand.hbm [shape: bf16[128,128], index: 6, kind: input, shape index: {}]   ;;  %s4431_s7 = inlined_call_operand.hbm [shape: f32[1,128], index: 7, kind: input, shape index: {}]   ;;  %s4432_s8 = inlined_call_operand.hbm [shape: f32[1,128], index: 8, kind: input, shape index: {}]   ;;  %s4433_s9 = inlined_call_operand.hbm [shape: f32[1,128], index: 9, kind: input, shape index: {}]   ;;  %s4434_s10 = inlined_call_operand.hbm [shape: bf16[128,512], index: 10, kind: input, shape index: {}]   ;;  %s4435_s11 = inlined_call_operand.hbm [shape: f32[1,512], index: 11, kind: input, shape index: {}]   ;;  %s4436_s12 = inlined_call_operand.hbm [shape: bf16[512,128], index: 12, kind: input, shape index: {}]   ;;  %s4437_s13 = inlined_call_operand.hbm [shape: f32[1,128], index: 13, kind: input, shape index: {}]   ;;  %s4438_s14 = inlined_call_operand.hbm [shape: f32[1,128], index: 14, kind: input, shape index: {}]   ;;  %s4439_s15 = inlined_call_operand.hbm [shape: f32[1,128], index: 15, kind: input, shape index: {}]   ;;  %s4440_s16 = inlined_call_operand.hbm [shape: bf16[2,8,128], index: 16, kind: output, shape index: {}]  }
   0x1   :  { %4456 = sst [smem:[#allocation44_spill]] %s4424_s0 }
   0x2   :  { %4457 = sst [smem:[#allocation45_spill]] %s4425_s1  ;;  %s4462_s23 = sld [smem:[#allocation44_spill]] }
   0x3   :  { %4458 = sst [smem:[#allocation46_spill]] %s4426_s2 }
   0x4   :  { %4459 = sst [smem:[#allocation47_spill]] %s4428_s4 }
   0x5   :  { %4460 = sst [smem:[#allocation48_spill]] %s4430_s6 }
   0x6   :  { %4461 = sst [smem:[#allocation49_spill]] %s4440_s16 }
   0x8   :  { %s3146_s1 = scalar_lea.hbm %s4462_s23, 16 }
   0x9   :  { %p3147_p0 = scmp.ne.s32.totalorder %s4462_s23, %s3146_s1  ;;  %p3150_p1 = scmp.lt.u32.totalorder %s3146_s1, %s4462_s23 }
   0xb   :  { %p3152_p2 = pnand %p3150_p1, %p3147_p0 }
   0xd   :  { %3155 = shalt.err (!%p3152_p2)  }
   0xe   :  { %s3676_s28 = smov [#allocation3]  }
   0xf   :  { %22 = dma.hbm_to_smem %s4462_s23, 16, %s3676_s28, [#allocation2] }
  0x10   :  { %3622 = dma.done.wait [#allocation2], 16 }
  0x11   :  { %3623 = vsyncadd [#allocation2], 4294967280 }
  0x12   :  { %24 = sfence }
  0x13   :  { %25 = vsyncpa [#allocation5], 0 }
  0x14   :  { %27 = vsyncpa [#allocation5 + $0x1], 0 }
  0x15   :  { %28 = vsyncpa [#allocation8], 0 }
  0x16   :  { %29 = vsyncpa [#allocation11], 0 }
  0x17   :  { %30 = vsyncpa [#allocation14], 0 }
  0x18   :  { %31 = vsyncpa [#allocation17], 0 }
  0x19   :  { %32 = vsyncpa [#allocation20], 0 }
  0x1a   :  { %33 = vsyncpa [#allocation23], 0 }
  0x1b   :  { %34 = vsyncpa [#allocation26], 0 }
  0x1c   :  { %35 = vsyncpa [#allocation6], 0 }
  0x1d   :  { %37 = vsyncpa [#allocation6 + $0x1], 0  ;;  %s3802_s1 = smov 0   ;;  %s3804_s0 = smov 0  }
  0x1e   :  { %s3806_s17 = smov 0   ;;  %s3808_s18 = smov 0  }
  0x1f LB: > { %4463 = sst [smem:[#allocation39_spill]] %s3662_s1  ;;  %s3677_s19 = smov [#allocation7]   ;;  %s3674_s18 = sphi %s3808_s18, %s4515_s18   ;;  %s3670_s17 = sphi %s3806_s17, %s4514_s17   ;;  %s3666_s0 = sphi %s3804_s0, %s4513_s0   ;;  %s3662_s1 = sphi %s3802_s1, %s4512_s1  }
  0x20   : > { %4464 = sst [smem:[#allocation40_spill]] %s3666_s0  ;;  %s406_s20 = sshll.u32 %s3677_s19, 4  ;;  %s3828_s20 = int_to_ptr.vmem [resolvable:$true] %s406_s20 }
  0x21   : > { %4465 = sst [smem:[#allocation41_spill]] %s3670_s17  ;;  %s3823_s21 = sadd.s32 4294967295, %s3674_s18  }
  0x22   : > { %4466 = sst [smem:[#allocation42_spill]] %s3823_s21  ;;  %p2490_p3 = scmp.ge.s32.totalorder %s3674_s18, 1 }
  0x23   : > { %p4452_p4 = scmp.eq.s32.totalorder %s3823_s21, 0  ;;  %p394_p5 = scmp.lt.s32.totalorder %s3674_s18, 3 }
  0x24   : > { %s3678_s23 = smov [#allocation10]   ;;  %s3679_s26 = smov [#allocation13]  }
  0x25   : > { %p3830_p6 = pnand %p2490_p3, %p394_p5  ;;  %s430_s24 = sshll.u32 %s3678_s23, 4  ;;  %s3843_s24 = int_to_ptr.vmem [resolvable:$true] %s430_s24 }
  0x26   : > { %s3845_s27 = sshll.u32 %s3679_s26, 4  ;;  %s4470_s2 = sld [smem:[#allocation46_spill]]  ;;  %s455_s27 = int_to_ptr.vmem [resolvable:$true] %s3845_s27 }
  0x27   : > { %s4467_s22 = scalar_select %p3830_p6, 1, 0 }
  0x28   : > { %p2866_p8 = pneg %p3830_p6 }
  0x29   : > { %4468 = sst [smem:[#allocation43_spill]] %s4467_s22 }
  0x2a   : > { %p3839_p9 = pnand %p2866_p8, %p4452_p4 }
  0x2c   : > { %s3156_s30 = scalar_lea.hbm %s4470_s2, 1024  ;;  %p3855_p11 = pneg %p3839_p9 }
  0x2d   : > { %p3157_p10 = scmp.ne.s32.totalorder %s4470_s2, %s3156_s30  ;;  %p3163_p0 = scmp.lt.u32.totalorder %s3156_s30, %s4470_s2 }
  0x2f   : > { %p3159_p12 = pnand %p3855_p11, %p3157_p10 }
  0x31   : > { %p3160_p13 = pneg %p3159_p12 }
  0x33   : > { %p3165_p1 = pnand %p3163_p0, %p3160_p13 }
  0x35   : > { %3168 = shalt.err (!%p3165_p1)
}
  0x36   : > { %s3169_s16 = scalar_lea.vmem %s3828_s20, 1024  ;;  %p3177_p8 = scmp.lt.s32.totalorder %s3828_s20, %s3828_s20 }
  0x37   : > { %p3170_p2 = scmp.ne.s32.totalorder %s3828_s20, %s3169_s16  ;;  %p3178_p7 = scmp.lt.s32.totalorder %s3169_s16, %s3169_s16 }
  0x39   : > { %p3172_p3 = pnand %p3170_p2, %p3855_p11  ;;  %p3179_p10 = por %p3178_p7, %p3177_p8 }
  0x3b   : > { %p3173_p5 = pneg %p3172_p3 }
  0x3d   : > { %p3180_p12 = pnand %p3179_p10, %p3173_p5 }
  0x3f   : > { %3183 = shalt.err (!%p3180_p12)
}
  0x40   : > { %s4450_s28 = smov 64   ;;  %s4454_s22 = smov 4  }
  0x41   : > { %2869 = dma.hbm_to_vmem [thread:$0]  (!%p3839_p9), %s4470_s2, 1024, %s3828_s20, [#allocation8], %s4450_s28, %s4450_s28, %s4454_s22  }
  0x42   : > { %s4472_s4 = sld [smem:[#allocation47_spill]] }
  0x48   : > { %s3184_s16 = scalar_lea.hbm %s4472_s4, 2048 }
  0x49   : > { %p3185_p7 = scmp.ne.s32.totalorder %s4472_s4, %s3184_s16  ;;  %p3191_p1 = scmp.lt.u32.totalorder %s3184_s16, %s4472_s4 }
  0x4b   : > { %p3187_p13 = pnand %p3185_p7, %p3855_p11 }
  0x4d   : > { %p3188_p0 = pneg %p3187_p13 }
  0x4f   : > { %p3193_p2 = pnand %p3191_p1, %p3188_p0 }
  0x51   : > { %3196 = shalt.err (!%p3193_p2)
}
  0x52   : > { %s3197_s20 = scalar_lea.vmem %s3843_s24, 2048  ;;  %p3205_p10 = scmp.lt.s32.totalorder %s3843_s24, %s3843_s24 }
  0x53   : > { %p3198_p3 = scmp.ne.s32.totalorder %s3843_s24, %s3197_s20  ;;  %p3206_p12 = scmp.lt.s32.totalorder %s3197_s20, %s3197_s20 }
  0x55   : > { %p3200_p5 = pnand %p3198_p3, %p3855_p11  ;;  %p3207_p7 = por %p3206_p12, %p3205_p10 }
  0x57   : > { %p3201_p8 = pneg %p3200_p5 }
  0x59   : > { %p3208_p13 = pnand %p3207_p7, %p3201_p8 }
  0x5b   : > { %3211 = shalt.err (!%p3208_p13)
}
  0x5c   : > { %s3682_s1 = smov 128   ;;  %s3683_s0 = smov 8  }
  0x5d   : > { %2875 = dma.hbm_to_vmem [thread:$0]  (!%p3839_p9), %s4472_s4, 2048, %s3843_s24, [#allocation11], %s3682_s1, %s3682_s1, %s3683_s0  }
  0x5e   : > { %s4473_s6 = sld [smem:[#allocation48_spill]] }
  0x64   : > { %s3212_s19 = scalar_lea.hbm %s4473_s6, 1024 }
  0x65   : > { %p3213_p0 = scmp.ne.s32.totalorder %s4473_s6, %s3212_s19  ;;  %p3219_p3 = scmp.lt.u32.totalorder %s3212_s19, %s4473_s6 }
  0x67   : > { %p3215_p1 = pnand %p3213_p0, %p3855_p11 }
  0x69   : > { %p3216_p2 = pneg %p3215_p1 }
  0x6b   : > { %p3221_p5 = pnand %p3219_p3, %p3216_p2 }
  0x6d   : > { %3224 = shalt.err (!%p3221_p5)
}
  0x6e   : > { %s3225_s17 = scalar_lea.vmem %s455_s27, 1024  ;;  %p3233_p7 = scmp.lt.s32.totalorder %s455_s27, %s455_s27 }
  0x6f   : > { %p3226_p8 = scmp.ne.s32.totalorder %s455_s27, %s3225_s17  ;;  %p3234_p13 = scmp.lt.s32.totalorder %s3225_s17, %s3225_s17 }
  0x71   : > { %p3228_p10 = pnand %p3226_p8, %p3855_p11  ;;  %p3235_p4 = por %p3234_p13, %p3233_p7 }
  0x73   : > { %p3229_p12 = pneg %p3228_p10 }
  0x75   : > { %p3236_p6 = pnand %p3235_p4, %p3229_p12 }
  0x77   : > { %3239 = shalt.err (!%p3236_p6)
}
  0x78   : > { %s4474_s24 = smov 64   ;;  %s3684_s0 = smov [#allocation16]  }
  0x79   : > { %2881 = dma.hbm_to_vmem [thread:$0]  (!%p3839_p9), %s4473_s6, 1024, %s455_s27, [#allocation14], %s4474_s24, %s4474_s24, %s4454_s22  }
  0x7a   : > { %s479_s21 = sshll.u32 %s3684_s0, 4  ;;  %s3685_s29 = smov [#allocation19]   ;;  %s480_s21 = int_to_ptr.vmem [resolvable:$true] %s479_s21 }
  0x7b   : > { %s500_s30 = sshll.u32 %s3685_s29, 4  ;;  %s3240_s16 = scalar_lea.hbm %s4432_s8, 16  ;;  %s501_s30 = int_to_ptr.vmem [resolvable:$true] %s500_s30 }
  0x7c   : > { %p3241_p4 = scmp.ne.s32.totalorder %s4432_s8, %s3240_s16  ;;  %p3247_p1 = scmp.lt.u32.totalorder %s3240_s16, %s4432_s8 }
  0x7e   : > { %p3243_p6 = pnand %p3241_p4, %p3855_p11 }
  0x80   : > { %p3244_p0 = pneg %p3243_p6 }
  0x82   : > { %p3249_p2 = pnand %p3247_p1, %p3244_p0 }
  0x84   : > { %3252 = shalt.err (!%p3249_p2)
}
  0x85   : > { %s3253_s27 = scalar_lea.vmem %s480_s21, 16  ;;  %s3260_s1 = scalar_lea.vmem %s480_s21, 32 }
  0x86   : > { %p3254_p3 = scmp.ne.s32.totalorder %s480_s21, %s3253_s27  ;;  %p3261_p10 = scmp.lt.s32.totalorder %s480_s21, %s480_s21 }
  0x87   : > { %p3262_p12 = scmp.lt.s32.totalorder %s3260_s1, %s3253_s27 }
  0x88   : > { %p3256_p5 = pnand %p3254_p3, %p3855_p11 }
  0x89   : > { %p3263_p7 = por %p3262_p12, %p3261_p10 }
  0x8a   : > { %p3257_p8 = pneg %p3256_p5 }
  0x8c   : > { %p3264_p13 = pnand %p3263_p7, %p3257_p8 }
  0x8e   : > { %3267 = shalt.err (!%p3264_p13)
}
  0x8f   : > { %2887 = dma.hbm_to_vmem [thread:$0]  (!%p3839_p9), %s4432_s8, 16, %s480_s21, [#allocation17]  }
  0x90   : > { %s3268_s26 = scalar_lea.hbm %s4434_s10, 4096 }
  0x91   : > { %p3269_p4 = scmp.ne.s32.totalorder %s4434_s10, %s3268_s26  ;;  %p3275_p1 = scmp.lt.u32.totalorder %s3268_s26, %s4434_s10 }
  0x93   : > { %p3271_p6 = pnand %p3269_p4, %p3855_p11 }
  0x95   : > { %p3272_p0 = pneg %p3271_p6 }
  0x97   : > { %p3277_p2 = pnand %p3275_p1, %p3272_p0 }
  0x99   : > { %3280 = shalt.err (!%p3277_p2)
}
  0x9a   : > { %s3281_s27 = scalar_lea.vmem %s501_s30, 4096  ;;  %p3289_p10 = scmp.lt.s32.totalorder %s501_s30, %s501_s30 }
  0x9b   : > { %p3282_p3 = scmp.ne.s32.totalorder %s501_s30, %s3281_s27  ;;  %p3290_p12 = scmp.lt.s32.totalorder %s3281_s27, %s3281_s27 }
  0x9d   : > { %p3284_p5 = pnand %p3282_p3, %p3855_p11  ;;  %p3291_p7 = por %p3290_p12, %p3289_p10 }
  0x9f   : > { %p3285_p8 = pneg %p3284_p5 }
  0xa1   : > { %p3292_p13 = pnand %p3291_p7, %p3285_p8 }
  0xa3   : > { %3295 = shalt.err (!%p3292_p13)
}
  0xa4   : > { %s3686_s21 = smov 256   ;;  %s3687_s1 = smov 16  }
  0xa5   : > { %2893 = dma.hbm_to_vmem [thread:$0]  (!%p3839_p9), %s4434_s10, 4096, %s501_s30, [#allocation20], %s3686_s21, %s3686_s21, %s3687_s1  }
  0xa6   : > { %s3688_s2 = smov [#allocation22]   ;;  %s3689_s26 = smov [#allocation25]  }
  0xa7   : > { %s524_s19 = sshll.u32 %s3688_s2, 4  ;;  %s549_s16 = sshll.u32 %s3689_s26, 4  ;;  %s525_s19 = int_to_ptr.vmem [resolvable:$true] %s524_s19  ;;  %s550_s16 = int_to_ptr.vmem [resolvable:$true] %s549_s16 }
  0xa8   : > { %s3296_s28 = scalar_lea.hbm %s4436_s12, 4096 }
  0xa9   : > { %p3297_p4 = scmp.ne.s32.totalorder %s4436_s12, %s3296_s28  ;;  %p3303_p1 = scmp.lt.u32.totalorder %s3296_s28, %s4436_s12 }
  0xab   : > { %p3299_p6 = pnand %p3297_p4, %p3855_p11 }
  0xad   : > { %p3300_p0 = pneg %p3299_p6 }
  0xaf   : > { %p3305_p2 = pnand %p3303_p1, %p3300_p0 }
  0xb1   : > { %3308 = shalt.err (!%p3305_p2)
}
  0xb2   : > { %s3309_s30 = scalar_lea.vmem %s525_s19, 4096  ;;  %p3317_p10 = scmp.lt.s32.totalorder %s525_s19, %s525_s19 }
  0xb3   : > { %p3310_p3 = scmp.ne.s32.totalorder %s525_s19, %s3309_s30  ;;  %p3318_p12 = scmp.lt.s32.totalorder %s3309_s30, %s3309_s30 }
  0xb5   : > { %p3312_p5 = pnand %p3310_p3, %p3855_p11  ;;  %p3319_p7 = por %p3318_p12, %p3317_p10 }
  0xb7   : > { %p3313_p8 = pneg %p3312_p5 }
  0xb9   : > { %p3320_p13 = pnand %p3319_p7, %p3313_p8 }
  0xbb   : > { %3323 = shalt.err (!%p3320_p13)
}
  0xbc   : > { %s4475_s22 = smov 4   ;;  %s3324_s0 = scalar_lea.hbm %s4438_s14, 16 }
  0xbd   : > { %2899 = dma.hbm_to_vmem [thread:$0]  (!%p3839_p9), %s4436_s12, 4096, %s525_s19, [#allocation23], %s4474_s24, %s4474_s24, %s4475_s22  }
  0xbe   : > { %p3325_p4 = scmp.ne.s32.totalorder %s4438_s14, %s3324_s0  ;;  %p3331_p1 = scmp.lt.u32.totalorder %s3324_s0, %s4438_s14 }
  0xc0   : > { %p3327_p6 = pnand %p3325_p4, %p3855_p11 }
  0xc2   : > { %p3328_p0 = pneg %p3327_p6 }
  0xc4   : > { %p3333_p2 = pnand %p3331_p1, %p3328_p0 }
  0xc6   : > { %3336 = shalt.err (!%p3333_p2)
}
  0xc7   : > { %s3337_s17 = scalar_lea.vmem %s550_s16, 16  ;;  %s3344_s24 = scalar_lea.vmem %s550_s16, 32 }
  0xc8   : > { %p3338_p3 = scmp.ne.s32.totalorder %s550_s16, %s3337_s17  ;;  %p3345_p10 = scmp.lt.s32.totalorder %s550_s16, %s550_s16 }
  0xc9   : > { %p3346_p12 = scmp.lt.s32.totalorder %s3344_s24, %s3337_s17 }
  0xca   : > { %p3340_p5 = pnand %p3338_p3, %p3855_p11 }
  0xcb   : > { %p3347_p7 = por %p3346_p12, %p3345_p10 }
  0xcc   : > { %p3341_p8 = pneg %p3340_p5 }
  0xce   : > { %p3348_p13 = pnand %p3347_p7, %p3341_p8 }
  0xd0   : > { %3351 = shalt.err (!%p3348_p13)
}
  0xd1   : > { %2905 = dma.hbm_to_vmem [thread:$0]  (!%p3839_p9), %s4438_s14, 16, %s550_s16, [#allocation26]  }
  0xd2   : > { %s3690_s27 = smov [#allocation9]   ;;  %s3691_s22 = smov [#allocation12]  }
  0xd3   : > { %s420_s30 = sshll.u32 %s3690_s27, 4  ;;  %s444_s4 = sshll.u32 %s3691_s22, 4  ;;  %s421_s30 = int_to_ptr.vmem [resolvable:$true] %s420_s30  ;;  %s445_s4 = int_to_ptr.vmem [resolvable:$true] %s444_s4 }
  0xd4   : > { %s3352_s1 = scalar_lea.hbm %s4427_s3, 16 }
  0xd5   : > { %p3353_p4 = scmp.ne.s32.totalorder %s4427_s3, %s3352_s1  ;;  %p3359_p1 = scmp.lt.u32.totalorder %s3352_s1, %s4427_s3 }
  0xd7   : > { %p3355_p6 = pnand %p3353_p4, %p3855_p11 }
  0xd9   : > { %p3356_p0 = pneg %p3355_p6 }
  0xdb   : > { %p3361_p2 = pnand %p3359_p1, %p3356_p0 }
  0xdd   : > { %3364 = shalt.err (!%p3361_p2)
}
  0xde   : > { %s3365_s16 = scalar_lea.vmem %s421_s30, 16  ;;  %s3372_s20 = scalar_lea.vmem %s421_s30, 32 }
  0xdf   : > { %p3366_p3 = scmp.ne.s32.totalorder %s421_s30, %s3365_s16  ;;  %p3373_p10 = scmp.lt.s32.totalorder %s421_s30, %s421_s30 }
  0xe0   : > { %p3374_p12 = scmp.lt.s32.totalorder %s3372_s20, %s3365_s16 }
  0xe1   : > { %p3368_p5 = pnand %p3366_p3, %p3855_p11 }
  0xe2   : > { %p3375_p7 = por %p3374_p12, %p3373_p10 }
  0xe3   : > { %p3369_p8 = pneg %p3368_p5 }
  0xe5   : > { %p3376_p13 = pnand %p3375_p7, %p3369_p8 }
  0xe7   : > { %3379 = shalt.err (!%p3376_p13)
}
  0xe8   : > { %2872 = dma.hbm_to_vmem [thread:$0]  (!%p3839_p9), %s4427_s3, 16, %s421_s30, [#allocation8]  }
  0xe9   : > { %s3380_s27 = scalar_lea.hbm %s4429_s5, 32 }
  0xea   : > { %p3381_p4 = scmp.ne.s32.totalorder %s4429_s5, %s3380_s27  ;;  %p3387_p1 = scmp.lt.u32.totalorder %s3380_s27, %s4429_s5 }
  0xec   : > { %p3383_p6 = pnand %p3381_p4, %p3855_p11 }
  0xee   : > { %p3384_p0 = pneg %p3383_p6 }
  0xf0   : > { %p3389_p2 = pnand %p3387_p1, %p3384_p0 }
  0xf2   : > { %3392 = shalt.err (!%p3389_p2)
}
  0xf3   : > { %s3393_s0 = scalar_lea.vmem %s445_s4, 32  ;;  %p3401_p10 = scmp.lt.s32.totalorder %s445_s4, %s445_s4 }
  0xf4   : > { %p3394_p3 = scmp.ne.s32.totalorder %s445_s4, %s3393_s0  ;;  %p3402_p12 = scmp.lt.s32.totalorder %s3393_s0, %s3393_s0 }
  0xf6   : > { %p3396_p5 = pnand %p3394_p3, %p3855_p11  ;;  %p3403_p7 = por %p3402_p12, %p3401_p10 }
  0xf8   : > { %p3397_p8 = pneg %p3396_p5 }
  0xfa   : > { %p3404_p13 = pnand %p3403_p7, %p3397_p8 }
  0xfc   : > { %3407 = shalt.err (!%p3404_p13)
}
  0xfd   : > { %2878 = dma.hbm_to_vmem [thread:$0]  (!%p3839_p9), %s4429_s5, 32, %s445_s4, [#allocation11]  }
  0xfe   : > { %s3692_s2 = smov [#allocation15]   ;;  %s3693_s16 = smov [#allocation18]  }
  0xff   : > { %s468_s26 = sshll.u32 %s3692_s2, 4  ;;  %s490_s20 = sshll.u32 %s3693_s16, 4  ;;  %s469_s26 = int_to_ptr.vmem [resolvable:$true] %s468_s26  ;;  %s491_s20 = int_to_ptr.vmem [resolvable:$true] %s490_s20 }
 0x100   : > { %s3408_s19 = scalar_lea.hbm %s4431_s7, 16 }
 0x101   : > { %p3409_p4 = scmp.ne.s32.totalorder %s4431_s7, %s3408_s19  ;;  %p3415_p1 = scmp.lt.u32.totalorder %s3408_s19, %s4431_s7 }
 0x103   : > { %p3411_p6 = pnand %p3409_p4, %p3855_p11 }
 0x105   : > { %p3412_p0 = pneg %p3411_p6 }
 0x107   : > { %p3417_p2 = pnand %p3415_p1, %p3412_p0 }
 0x109   : > { %3420 = shalt.err (!%p3417_p2)
}
 0x10a   : > { %s3421_s4 = scalar_lea.vmem %s469_s26, 16  ;;  %s3428_s21 = scalar_lea.vmem %s469_s26, 32 }
 0x10b   : > { %p3422_p3 = scmp.ne.s32.totalorder %s469_s26, %s3421_s4  ;;  %p3429_p10 = scmp.lt.s32.totalorder %s469_s26, %s469_s26 }
 0x10c   : > { %p3430_p12 = scmp.lt.s32.totalorder %s3428_s21, %s3421_s4 }
 0x10d   : > { %p3424_p5 = pnand %p3422_p3, %p3855_p11 }
 0x10e   : > { %p3431_p7 = por %p3430_p12, %p3429_p10 }
 0x10f   : > { %p3425_p8 = pneg %p3424_p5 }
 0x111   : > { %p3432_p13 = pnand %p3431_p7, %p3425_p8 }
 0x113   : > { %3435 = shalt.err (!%p3432_p13)
}
 0x114   : > { %2884 = dma.hbm_to_vmem [thread:$0]  (!%p3839_p9), %s4431_s7, 16, %s469_s26, [#allocation14]  }
 0x115   : > { %s3436_s2 = scalar_lea.hbm %s4433_s9, 16 }
 0x116   : > { %p3437_p4 = scmp.ne.s32.totalorder %s4433_s9, %s3436_s2  ;;  %p3443_p1 = scmp.lt.u32.totalorder %s3436_s2, %s4433_s9 }
 0x118   : > { %p3439_p6 = pnand %p3437_p4, %p3855_p11 }
 0x11a   : > { %p3440_p0 = pneg %p3439_p6 }
 0x11c   : > { %p3445_p2 = pnand %p3443_p1, %p3440_p0 }
 0x11e   : > { %3448 = shalt.err (!%p3445_p2)
}
 0x11f   : > { %s3449_s28 = scalar_lea.vmem %s491_s20, 16  ;;  %s3456_s26 = scalar_lea.vmem %s491_s20, 32 }
 0x120   : > { %p3450_p3 = scmp.ne.s32.totalorder %s491_s20, %s3449_s28  ;;  %p3457_p10 = scmp.lt.s32.totalorder %s491_s20, %s491_s20 }
 0x121   : > { %p3458_p12 = scmp.lt.s32.totalorder %s3456_s26, %s3449_s28 }
 0x122   : > { %p3452_p5 = pnand %p3450_p3, %p3855_p11 }
 0x123   : > { %p3459_p7 = por %p3458_p12, %p3457_p10 }
 0x124   : > { %p3453_p8 = pneg %p3452_p5 }
 0x126   : > { %p3460_p13 = pnand %p3459_p7, %p3453_p8 }
 0x128   : > { %3463 = shalt.err (!%p3460_p13)
}
 0x129   : > { %2890 = dma.hbm_to_vmem [thread:$0]  (!%p3839_p9), %s4433_s9, 16, %s491_s20, [#allocation17]  }
 0x12a   : > { %s3694_s6 = smov [#allocation21]   ;;  %s3695_s21 = smov [#allocation24]  }
 0x12b   : > { %s514_s4 = sshll.u32 %s3694_s6, 4  ;;  %s538_s1 = sshll.u32 %s3695_s21, 4  ;;  %s515_s4 = int_to_ptr.vmem [resolvable:$true] %s514_s4  ;;  %s539_s1 = int_to_ptr.vmem [resolvable:$true] %s538_s1 }
 0x12c   : > { %s3464_s29 = scalar_lea.hbm %s4435_s11, 64 }
 0x12d   : > { %p3465_p4 = scmp.ne.s32.totalorder %s4435_s11, %s3464_s29  ;;  %p3471_p1 = scmp.lt.u32.totalorder %s3464_s29, %s4435_s11 }
 0x12f   : > { %p3467_p6 = pnand %p3465_p4, %p3855_p11 }
 0x131   : > { %p3468_p0 = pneg %p3467_p6 }
 0x133   : > { %p3473_p2 = pnand %p3471_p1, %p3468_p0 }
 0x135   : > { %3476 = shalt.err (!%p3473_p2)
}
 0x136   : > { %s3477_s20 = scalar_lea.vmem %s515_s4, 64  ;;  %p3485_p10 = scmp.lt.s32.totalorder %s515_s4, %s515_s4 }
 0x137   : > { %p3478_p3 = scmp.ne.s32.totalorder %s515_s4, %s3477_s20  ;;  %p3486_p12 = scmp.lt.s32.totalorder %s3477_s20, %s3477_s20 }
 0x139   : > { %p3480_p5 = pnand %p3478_p3, %p3855_p11  ;;  %p3487_p7 = por %p3486_p12, %p3485_p10 }
 0x13b   : > { %p3481_p8 = pneg %p3480_p5 }
 0x13d   : > { %p3488_p13 = pnand %p3487_p7, %p3481_p8 }
 0x13f   : > { %3491 = shalt.err (!%p3488_p13)
}
 0x140   : > { %2896 = dma.hbm_to_vmem [thread:$0]  (!%p3839_p9), %s4435_s11, 64, %s515_s4, [#allocation20]  }
 0x141   : > { %s3492_s22 = scalar_lea.hbm %s4437_s13, 16 }
 0x142   : > { %p3493_p4 = scmp.ne.s32.totalorder %s4437_s13, %s3492_s22  ;;  %p3499_p1 = scmp.lt.u32.totalorder %s3492_s22, %s4437_s13 }
 0x144   : > { %p3495_p6 = pnand %p3493_p4, %p3855_p11 }
 0x146   : > { %p3496_p0 = pneg %p3495_p6 }
 0x148   : > { %p3501_p2 = pnand %p3499_p1, %p3496_p0 }
 0x14a   : > { %3504 = shalt.err (!%p3501_p2)
}
 0x14b   : > { %s3505_s29 = scalar_lea.vmem %s539_s1, 16  ;;  %s3512_s4 = scalar_lea.vmem %s539_s1, 32 }
 0x14c   : > { %p3506_p3 = scmp.ne.s32.totalorder %s539_s1, %s3505_s29  ;;  %p3513_p10 = scmp.lt.s32.totalorder %s539_s1, %s539_s1 }
 0x14d   : > { %p3514_p12 = scmp.lt.s32.totalorder %s3512_s4, %s3505_s29 }
 0x14e   : > { %p3508_p5 = pnand %p3506_p3, %p3855_p11 }
 0x14f   : > { %p3515_p7 = por %p3514_p12, %p3513_p10 }
 0x150   : > { %p3509_p8 = pneg %p3508_p5 }
 0x152   : > { %p3516_p13 = pnand %p3515_p7, %p3509_p8 }
 0x154   : > { %3519 = shalt.err (!%p3516_p13)
}
 0x155   : > { %2902 = dma.hbm_to_vmem [thread:$0]  (!%p3839_p9), %s4437_s13, 16, %s539_s1, [#allocation23]  }
 0x156   : > { %s3696_s17 = smov [#allocation27]   ;;  %s3520_s28 = scalar_lea.hbm %s4439_s15, 16 }
 0x157   : > { %s560_s24 = sshll.u32 %s3696_s17, 4  ;;  %p3521_p4 = scmp.ne.s32.totalorder %s4439_s15, %s3520_s28  ;;  %s561_s24 = int_to_ptr.vmem [resolvable:$true] %s560_s24 }
 0x158   : > { %p3527_p1 = scmp.lt.u32.totalorder %s3520_s28, %s4439_s15 }
 0x159   : > { %p3523_p6 = pnand %p3521_p4, %p3855_p11 }
 0x15b   : > { %p3524_p0 = pneg %p3523_p6 }
 0x15d   : > { %p3529_p2 = pnand %p3527_p1, %p3524_p0 }
 0x15f   : > { %3532 = shalt.err (!%p3529_p2)
}
 0x160   : > { %s3533_s1 = scalar_lea.vmem %s561_s24, 16  ;;  %s3540_s21 = scalar_lea.vmem %s561_s24, 32 }
 0x161   : > { %p3534_p3 = scmp.ne.s32.totalorder %s561_s24, %s3533_s1  ;;  %p3541_p10 = scmp.lt.s32.totalorder %s561_s24, %s561_s24 }
 0x162   : > { %p3542_p12 = scmp.lt.s32.totalorder %s3540_s21, %s3533_s1 }
 0x163   : > { %p3536_p5 = pnand %p3534_p3, %p3855_p11 }
 0x164   : > { %p3543_p7 = por %p3542_p12, %p3541_p10 }
 0x165   : > { %p3537_p8 = pneg %p3536_p5 }
 0x167   : > { %p3544_p13 = pnand %p3543_p7, %p3537_p8 }
 0x169   : > { %3547 = shalt.err (!%p3544_p13)
}
 0x16a   : > { %s4476_s29 = sld [smem:[#allocation41_spill]]  ;;  %s4477_s4 = sld [smem:[#allocation40_spill]] }
 0x16b   : > { %s4478_s23 = sld [smem:[#allocation39_spill]]  ;;  %s4479_s2 = sld [smem:[#allocation42_spill]] }
 0x16c   : > { %2908 = dma.hbm_to_vmem [thread:$0]  (!%p3839_p9), %s4439_s15, 16, %s561_s24, [#allocation26]  }
 0x16d   : > { %s2489_s16 = sadd.s32 4294967294, %s3674_s18   ;;  %s4127_s25 = sadd.s32 1, %s3674_s18  }
 0x16e   : > { %s47_s17 = ssub.s32 %s3674_s18, %s4127_s25  ;;  %p58_p6 = scmp.eq.s32.totalorder %s3674_s18, 0 }
 0x16f   : > { %p48_p11 = scmp.eq.s32.totalorder %s47_s17, 0  ;;  %p387_p5 = scmp.eq.s32.totalorder %s2489_s16, 1 }
 0x170   : > { %s50_s20 = sadd.s32 1, %s4476_s29  ;;  %p57_p4 = scmp.ne.s32.totalorder %s4476_s29, %s4477_s4 }
 0x171   : > { %p63_p0 = scmp.ne.s32.totalorder %s4477_s4, %s4478_s23  ;;  %p4481_p2 = scmp.eq.s32.totalorder %s4479_s2, 0 }
 0x172   : > { %s4138_s19 = scalar_select %p48_p11, %s4476_s29, %s50_s20  }
 0x173   : > { %p4140_p1 = por %p58_p6, %p57_p4  ;;  %p4146_p9 = por %p4481_p2, %p63_p0 }
 0x174   : > { %p381_p3 = scmp.eq.s32.totalorder %s4479_s2, 1  ;;  %p2931_p8 = scmp.lt.s32.totalorder %s3674_s18, 2 }
 0x175   : > { %s571_s26 = sand.u32 1, %s4476_s29   ;;  %p4157_p12 = por %p387_p5, %p63_p0 }
 0x176   : > { %p4153_p10 = por %p381_p3, %p57_p4  ;;  %s2506_s6 = sshll.u32 %s571_s26, 2 }
 0x177   : > { %s4484_s22 = scalar_select %p4157_p12, 1, 0 }
 0x178   : > { %s4483_s27 = scalar_select %p4153_p10, 1, 0 }
 0x179   : > { %s2507_s1 = sshll.u32 %s3674_s18, 6  ;;  %s4485_s30 = sld [smem:[#allocation45_spill]] }
 0x17a   : > { %s575_s29 = scalar_lea.vmem [#allocation4], %s2506_s6  ;;  %p4171_p7 = pnand %p2931_p8, %p4140_p1 }
 0x17b   : > { %s582_s23 = sshll.u32 %s575_s29, 4  ;;  %s572_s16 = scalar_lea.sflag [#allocation5], %s571_s26  ;;  %s4167_s23 = int_to_ptr.vmem [resolvable:$true] %s582_s23 }
 0x17c   : > { %p3550_p11 = pneg %p4171_p7 }
 0x17f   : > { %s4165_s4 = scalar_lea.hbm %s4485_s30, %s2507_s1  ;;  %s3553_s1 = scalar_lea.hbm %s4485_s30, 128 }
 0x180   : > { %s3548_s17 = scalar_lea.hbm %s4165_s4, 64  ;;  %p3554_p0 = scmp.lt.u32.totalorder %s4165_s4, %s4485_s30 }
 0x181   : > { %p3549_p13 = scmp.ne.s32.totalorder %s4165_s4, %s3548_s17  ;;  %p3555_p1 = scmp.lt.u32.totalorder %s3553_s1, %s3548_s17 }
 0x182   : > { %p3557_p3 = scmp.lt.u32.totalorder %s3548_s17, %s4165_s4 }
 0x183   : > { %p3551_p4 = pnand %p3550_p11, %p3549_p13  ;;  %p3556_p2 = por %p3555_p1, %p3554_p0 }
 0x185   : > { %p3552_p6 = pneg %p3551_p4  ;;  %p3558_p5 = por %p3557_p3, %p3556_p2 }
 0x187   : > { %p3559_p8 = pnand %p3558_p5, %p3552_p6 }
 0x189   : > { %3562 = shalt.err (!%p3559_p8)
}
 0x18a   : > { %s3563_s26 = scalar_lea.vmem %s4167_s23, 64  ;;  %s3697_s0 = smov [#allocation4]  }
 0x18b   : > { %p3564_p13 = scmp.ne.s32.totalorder %s4167_s23, %s3563_s26  ;;  %s3568_s29 = sshll.u32 %s3697_s0, 4  ;;  %s3569_s29 = int_to_ptr.vmem [resolvable:$false] %s3568_s29 }
 0x18c   : > { %s3570_s20 = scalar_lea.vmem %s3569_s29, 128  ;;  %p3571_p10 = scmp.lt.s32.totalorder %s4167_s23, %s3569_s29 }
 0x18d   : > { %p3566_p4 = pnand %p3564_p13, %p3550_p11  ;;  %p3572_p0 = scmp.lt.s32.totalorder %s3570_s20, %s3563_s26 }
 0x18f   : > { %p3567_p12 = pneg %p3566_p4  ;;  %p3573_p1 = por %p3572_p0, %p3571_p10 }
 0x191   : > { %p3574_p2 = pnand %p3573_p1, %p3567_p12 }
 0x193   : > { %3577 = shalt.err (!%p3574_p2)
}
 0x194   : > { %2912 = dma.hbm_to_vmem [thread:$0]  (!%p4171_p7), %s4165_s4, 64, %s4167_s23, %s572_s16  }
 0x195   : > { %s4487_s17 = sld [smem:[#allocation43_spill]] }
 0x19b   : > { %p4488_p6 = scmp.ne.s32.totalorder %s4487_s17, 0 }
 0x19c   : > { %s4489_s6 = sld [smem:[#allocation40_spill]] (!%p4488_p6) }
 0x19d   : > { %591 = sbr.rel (%p4488_p6) target bundleno = 2994 (0xbb2), region = 80 }
 0x1a2   : > { %s4203_s1 = sand.u32 (!%p4488_p6), 1, %s4489_s6  }
 0x1a3   : > { %s2509_s28 = sshll.u32 (!%p4488_p6), %s4203_s1, 2  ;;  %s594_s21 = scalar_lea.sflag (!%p4488_p6), [#allocation5], %s4203_s1 }
 0x1a4   : > { %s4209_s26 = scalar_lea.vmem [#allocation4], %s2509_s28 }
 0x1a5   : > { %3625 = dma.done.wait (%p4146_p9), %s594_s21, 64  }
 0x1a6   : > { %3627 = vsyncadd (%p4146_p9), %s594_s21, 4294967232  ;;  %s4490_s4 = sld [smem:[#allocation42_spill]] }
 0x1ac   : > { %p4491_p10 = scmp.eq.s32.totalorder %s4490_s4, 0 }
 0x1ae   : > { %3629 = dma.done.wait (%p4491_p10), [#allocation8], 1040   ;;  %p4492_p12 = pmov %p4491_p10 }
 0x1af   : > { %p4493_p7 = pmov %p4491_p10 }
 0x1b0   : > { %3631 = vsyncadd (%p4492_p12), [#allocation8], 4294966256 }
 0x1b1   : > { %3633 = dma.done.wait (%p4493_p7), [#allocation11], 2080   ;;  %p4494_p11 = pmov %p4493_p7 }
 0x1b2   : > { %p4495_p3 = pmov %p4493_p7 }
 0x1b3   : > { %3635 = vsyncadd (%p4494_p11), [#allocation11], 4294965216 }
 0x1b4   : > { %3637 = dma.done.wait (%p4495_p3), [#allocation14], 1040   ;;  %p4496_p5 = pmov %p4495_p3 }
 0x1b5   : > { %p4497_p9 = pmov %p4495_p3 }
 0x1b6   : > { %3639 = vsyncadd (%p4496_p5), [#allocation14], 4294966256 }
 0x1b7   : > { %3641 = dma.done.wait (%p4497_p9), [#allocation17], 32   ;;  %p4498_p8 = pmov %p4495_p3 }
 0x1b8   : > { %p4499_p13 = pmov %p4495_p3 }
 0x1b9   : > { %3643 = vsyncadd (%p4498_p8), [#allocation17], 4294967264 }
 0x1ba   : > { %3645 = dma.done.wait (%p4499_p13), [#allocation20], 4160   ;;  %p4500_p4 = pmov %p4495_p3 }
 0x1bb   : > { %p4501_p0 = pmov %p4495_p3 }
 0x1bc   : > { %3647 = vsyncadd (%p4500_p4), [#allocation20], 4294963136 }
 0x1bd   : > { %3649 = dma.done.wait (%p4501_p0), [#allocation23], 4112   ;;  %p4502_p1 = pmov %p4501_p0 }
 0x1be   : > { %p4503_p2 = pmov %p4501_p0 }
 0x1bf   : > { %3651 = vsyncadd (%p4502_p1), [#allocation23], 4294963184 }
 0x1c0   : > { %3653 = dma.done.wait (%p4503_p2), [#allocation26], 32   ;;  %p4504_p6 = pmov %p4501_p0 }
 0x1c1   : > { %v3698_v0 = vmov 0.0   ;;  %v3699_v1 = vmov 0   ;;  %vm3700_vm0 = vmmov 0   ;;  %v3006_v2 = vld [vmem:[#allocation10 + $0x4] ss:$8 sps:$4 sm:$0xff]   ;;  %v3021_v13 = vld [vmem:[#allocation7 + $0x18] sm:$0xff]   ;;  %v851_v27 = vlaneseq }
 0x1c2   : > { %3655 = vsyncadd (%p4504_p6), [#allocation26], 4294967264  ;;  %2718 = vmatprep.subr.bf16.mxu0 %v3698_v0  ;;  %973 = vmatprep.mubr.bf16.mxu1 %v3699_v1  ;;  %v3008_v3 = vld [vmem:[#allocation10] ss:$8 sps:$4 sm:$0xff]   ;;  %v3010_v5 = vld [vmem:[#allocation10 + $0x14] ss:$8 sps:$4 sm:$0xff]  }
 0x1c3   : > { %2734 = vmatprep.mubr.msk.bf16.mxu0 %vm3700_vm0, %v3698_v0  ;;  %941 = vmatprep.subr.bf16.mxu1 %v3006_v2  ;;  %v3009_v4 = vld [vmem:[#allocation7] sm:$0xff]   ;;  %v3012_v6 = vld [vmem:[#allocation10 + $0x10] ss:$8 sps:$4 sm:$0xff]   ;;  %v3013_v7 = vld [vmem:[#allocation7 + $0x8] sm:$0xff]   ;;  %v4266_v28 = vshrl.u32 %v851_v27, 7  ;;  %vm1024_vm1 = vcmask 261120  }
 0x1c4   : > { %942 = vmatpush1.bf16.msra.mxu1 %v3008_v3  ;;  %2719 = vmatpush3.bf16.msra.mxu0 %v3009_v4  ;;  %v3014_v8 = vld [vmem:[#allocation10 + $0x24] ss:$8 sps:$4 sm:$0xff]   ;;  %v3016_v9 = vld [vmem:[#allocation10 + $0x20] ss:$8 sps:$4 sm:$0xff]   ;;  %v3018_v11 = vld [vmem:[#allocation10 + $0x34] ss:$8 sps:$4 sm:$0xff]  }
 0x1c5   : > { %943 = vmatprep.subr.bf16.mxu1 %v3010_v5  ;;  %2720 = vmatprep.subr.bf16.mxu0 %v3698_v0  ;;  %v3017_v10 = vld [vmem:[#allocation7 + $0x10] sm:$0xff]   ;;  %v3024_v15 = vld [vmem:[#allocation10 + $0x40] ss:$8 sps:$4 sm:$0xff]   ;;  %v3037_v25 = vld [vmem:[#allocation7 + $0x38] sm:$0xff]   ;;  %v853_v29 = vsub.s32 0, %v4266_v28  ;;  %v857_v31 = vsub.s32 1, %v4266_v28 }
 0x1c6   : > { %v3020_v12 = vld [vmem:[#allocation10 + $0x30] ss:$8 sps:$4 sm:$0xff]   ;;  %v3022_v14 = vld [vmem:[#allocation10 + $0x44] ss:$8 sps:$4 sm:$0xff]   ;;  %v3026_v17 = vld [vmem:[#allocation10 + $0x54] ss:$8 sps:$4 sm:$0xff]  }
 0x1c7   : > { %v3025_v16 = vld [vmem:[#allocation7 + $0x20] sm:$0xff]   ;;  %v3028_v18 = vld [vmem:[#allocation10 + $0x50] ss:$8 sps:$4 sm:$0xff]   ;;  %v3029_v19 = vld [vmem:[#allocation7 + $0x28] sm:$0xff]   ;;  %s3701_s24 = smov 64   ;;  %s3702_s23 = smov 96  }
 0x1c8   : > { %944 = vmatpush1.bf16.msra.mxu1 %v3012_v6  ;;  %2721 = vmatpush3.bf16.msra.mxu0 %v3013_v7  ;;  %v3030_v20 = vld [vmem:[#allocation10 + $0x64] ss:$8 sps:$4 sm:$0xff]   ;;  %v3032_v21 = vld [vmem:[#allocation10 + $0x60] ss:$8 sps:$4 sm:$0xff]   ;;  %v3034_v23 = vld [vmem:[#allocation10 + $0x74] ss:$8 sps:$4 sm:$0xff]  }
 0x1c9   : > { %945 = vmatprep.subr.bf16.mxu1 %v3014_v8  ;;  %2722 = vmatprep.subr.bf16.mxu0 %v3698_v0  ;;  %v3033_v22 = vld [vmem:[#allocation7 + $0x30] sm:$0xff]   ;;  %v4255_v26 = vld [vmem:[%s4209_s26] sm:$0xf]  ;;  %v737_v30 = vld [vmem:[#allocation12] sm:$0x3]  ;;  %vm1271_vm2 = vcmask 1043456  }
 0x1ca   : > { %v3036_v24 = vld [vmem:[#allocation10 + $0x70] ss:$8 sps:$4 sm:$0xff]   ;;  %v854_v32 = vrot.slane %v737_v30, %v853_v29  ;;  %v858_v33 = vrot.slane %v737_v30, %v857_v31  ;;  %v2525_v34 = vld [vmem:[#allocation9] ss:$0 sm:$0xff]  ;;  %s3703_s2 = smov 32   ;;  %s703_s16 = sld [smem:[#allocation3 + %s4490_s4]] }
 0x1cb   : > { %v1210_v5 = vand.u32 127, %v851_v27  ;;  %vm1219_vm4 = vcmask 64512   ;;  %vm1466_vm5 = vcmask 523264   ;;  %vm1468_vm6 = vcmask 785408   ;;  %s2637_s0 = sshll.u32 %s4490_s4, 6  ;;  %s699_s29 = scalar_lea.vmem [#allocation28], %s2509_s28 }
 0x1cc   : > { %946 = vmatpush1.bf16.msra.mxu1 %v3016_v9  ;;  %2723 = vmatpush3.bf16.msra.mxu0 %v3017_v10  ;;  %s2286_s20 = sshll.u32 %s699_s29, 4  ;;  %s4507_s21 = sld [smem:[#allocation49_spill]]  ;;  %s4382_s20 = int_to_ptr.vmem [resolvable:$true] %s2286_s20 }
 0x1cd   : > { %947 = vmatprep.subr.bf16.mxu1 %v3018_v11  ;;  %2724 = vmatprep.subr.bf16.mxu0 %v3698_v0  ;;  %p4508_p12 = scmp.ne.s32.totalorder %s4483_s27, 0  ;;  %s3704_s28 = smov [#allocation28]  }
 0x1ce   : > { %s3582_s4 = sshll.u32 %s3704_s28, 4  ;;  %s3583_s4 = int_to_ptr.vmem [resolvable:$false] %s3582_s4 }
 0x1cf   : > { %p3585_p3 = scmp.lt.s32.totalorder %s4382_s20, %s3583_s4 }
 0x1d0   : > { %948 = vmatpush1.bf16.msra.mxu1 %v3020_v12  ;;  %2725 = vmatpush3.bf16.msra.mxu0 %v3021_v13  ;;  %v1211_v6 = vstv %s703_s16 }
 0x1d1   : > { %949 = vmatprep.subr.bf16.mxu1 %v3022_v14  ;;  %2726 = vmatprep.subr.bf16.mxu0 %v3698_v0  ;;  %vm4308_vm3 = vcmp.lt.s32.totalorder %v1210_v5, %v1211_v6 }
 0x1d2   : > { %s4380_s26 = scalar_lea.hbm %s4507_s21, %s2637_s0 }
 0x1d4   : > { %950 = vmatpush1.bf16.msra.mxu1 %v3024_v15  ;;  %2727 = vmatpush3.bf16.msra.mxu0 %v3025_v16 }
 0x1d5   : > { %951 = vmatprep.subr.bf16.mxu1 %v3026_v17  ;;  %2728 = vmatprep.subr.bf16.mxu0 %v3698_v0 }
 0x1d8   : > { %952 = vmatpush1.bf16.msra.mxu1 %v3028_v18  ;;  %2729 = vmatpush3.bf16.msra.mxu0 %v3029_v19 }
 0x1d9   : > { %953 = vmatprep.subr.bf16.mxu1 %v3030_v20  ;;  %2730 = vmatprep.subr.bf16.mxu0 %v3698_v0 }
 0x1dc   : > { %954 = vmatpush1.bf16.msra.mxu1 %v3032_v21  ;;  %2731 = vmatpush3.bf16.msra.mxu0 %v3033_v22 }
 0x1dd   : > { %955 = vmatprep.subr.bf16.mxu1 %v3034_v23  ;;  %2732 = vmatprep.subr.bf16.mxu0 %v3698_v0 }
 0x1e0   : > { %956 = vmatpush1.bf16.msra.mxu1 %v3036_v24  ;;  %2733 = vmatpush3.bf16.msra.mxu0 %v3037_v25 }
 0x1e1   : > { %2738 = vmatprep.subr.bf16.mxu1 %v3698_v0  ;;  %2762 = vmatprep.subr.bf16.mxu0 %v3698_v0 }
 0x1e3   : > { %974 = vmatmul.mubr.bf16.vlgmr.msra.gmra.mrb[0].mxu1 %v4255_v26  ;;  %2735 = vmatmul.mubr.bf16.vlgmr.msra.gmra.mrb[0].mxu0 %v4255_v26 }
 0x1e4   : > { %2740 = vmatprep.mubr.msk.bf16.mxu1 %vm3700_vm0, %v3698_v0  ;;  %2764 = vmatprep.mubr.msk.bf16.mxu0 %vm3700_vm0, %v3698_v0 }
 0x2b6   : > { %v975_v35 = vpop.f32.mrb[0].mxu1  ;;  %v843_v38 = vpop.f32.mrb[0].mxu0 }
 0x2b7   : > { %v976_v36 = vadd.f32 %v975_v35, %v854_v32  ;;  %v977_v37 = vpop.f32.mrb[1].mxu1  ;;  %v844_v40 = vadd.f32 %v2525_v34, %v843_v38  ;;  %v2736_v42 = vpop.f32.mrb[1].mxu0 }
 0x2b8   : > { %v4274_v39 = vadd.f32 %v977_v37, %v858_v33  ;;  %v979_v41 = vpop.f32.mrb[2].mxu1  ;;  %v846_v44 = vpop.f32.mrb[2].mxu0 }
 0x2b9   : > { %v980_v43 = vpop.f32.mrb[3].mxu1  ;;  %1000 = vrot.lane.b32.xlu1 %v976_v36, %s3701_s24  ;;  %997 = vrot.lane.b32.xlu0 %v976_v36, %s3702_s23  ;;  %v1006_v45 = vpack.c.bf16 %v976_v36, %v976_v36  ;;  %v849_v46 = vmul.f32 0.17677669, %v844_v40  ;;  %v2737_v47 = vpop.f32.mrb[3].mxu0 }
 0x2ba   : > { %v1020_v48 = vpack.c.bf16 %v4274_v39, %v4274_v39 }
 0x2bb   : > { %v1029_v49 = vsel %vm1024_vm1, %v1006_v45, 0  ;;  %v992_v51 = vpack.c.bf16 %v849_v46, %v849_v46 }
 0x2bc   : > { %2739 = vmatpush3.bf16.xpose.msra.mxu1 %v1029_v49  ;;  %v1273_v50 = vsel %vm1271_vm2, %v1020_v48, 0 }
 0x2bd   : > { %2763 = vmatpush3.bf16.msra.mxu0 %v1273_v50  ;;  %986 = vrot.lane.b32.xlu1 %v849_v46, %s3701_s24 }
 0x2be   : > { %983 = vrot.lane.b32.xlu0 %v849_v46, %s3702_s23  ;;  %2744 = vmatprep.subr.bf16.mxu1 %v3698_v0 }
 0x2bf   : > { %2774 = vmatprep.subr.bf16.mxu0 %v3698_v0 }
 0x2c1   : > { %989 = vrot.lane.b32.xlu1 %v849_v46, %s3703_s2 }
 0x2c2   : > { %1003 = vrot.lane.b32.xlu0 %v976_v36, %s3703_s2 }
 0x2c3   : > { %2741 = vmatmul.mubr.msk.bf16.vlgmr.msra.gmra.mrb[4].mxu1 %vm1024_vm1, %v992_v51 }
 0x2c4   : > { %2746 = vmatprep.mubr.msk.bf16.mxu1 %vm3700_vm0, %v3698_v0 }
 0x32b   : > { %v998_v52 = vpop.permute.xlu0 %997  ;;  %v1001_v55 = vpop.permute.xlu1 %1000 }
 0x32c   : > { %v1007_v53 = vpack.c.bf16 %v998_v52, %v998_v52  ;;  %v1008_v57 = vpack.c.bf16 %v1001_v55, %v1001_v55 }
 0x32e   : > { %v1075_v54 = vsel %vm1024_vm1, %v1007_v53, 0  ;;  %v1121_v59 = vsel %vm1024_vm1, %v1008_v57, 0 }
 0x32f   : > { %2745 = vmatpush3.bf16.xpose.msra.mxu1 %v1075_v54  ;;  %v987_v62 = vpop.permute.xlu1 %986 }
 0x330   : > { %2750 = vmatprep.subr.bf16.mxu1 %v3698_v0  ;;  %v984_v56 = vpop.permute.xlu0 %983  ;;  %v994_v63 = vpack.c.bf16 %v987_v62, %v987_v62 }
 0x331   : > { %v993_v58 = vpack.c.bf16 %v984_v56, %v984_v56 }
 0x333   : > { %v990_v3 = vpop.permute.xlu1 %989 }
 0x334   : > { %v1004_v60 = vpop.permute.xlu0 %1003  ;;  %v995_v4 = vpack.c.bf16 %v990_v3, %v990_v3 }
 0x335   : > { %v1009_v61 = vpack.c.bf16 %v1004_v60, %v1004_v60 }
 0x336   : > { %2747 = vmatmul.mubr.msk.bf16.vlgmr.msra.gmra.mrb[8].mxu1 %vm1024_vm1, %v993_v58 }
 0x337   : > { %2751 = vmatpush3.bf16.xpose.msra.mxu1 %v1121_v59  ;;  %2752 = vmatprep.mubr.msk.bf16.mxu1 %vm3700_vm0, %v3698_v0  ;;  %v1167_v2 = vsel %vm1024_vm1, %v1009_v61, 0 }
 0x338   : > { %2756 = vmatprep.subr.bf16.mxu1 %v3698_v0 }
 0x33e   : > { %2753 = vmatmul.mubr.msk.bf16.vlgmr.msra.gmra.mrb[12].mxu1 %vm1024_vm1, %v994_v63 }
 0x33f   : > { %2757 = vmatpush3.bf16.xpose.msra.mxu1 %v1167_v2  ;;  %2758 = vmatprep.mubr.msk.bf16.mxu1 %vm3700_vm0, %v3698_v0 }
 0x340   : > { %2768 = vmatprep.subr.bf16.mxu1 %v3698_v0 }
 0x346   : > { %2759 = vmatmul.mubr.msk.bf16.vlgmr.msra.gmra.mrb[16].mxu1 %vm1024_vm1, %v995_v4 }
 0x347   : > { %2770 = vmatprep.mubr.msk.bf16.mxu1 %vm3700_vm0, %v3698_v0 }
 0x396   : > { %v1065_v8 = vpop.f32.mrb[4].mxu1 }
 0x397   : > { %v1215_v9 = vsel %vm4308_vm3, %v1065_v8, -1e+09  ;;  %v2742_v10 = vpop.f32.mrb[5].mxu1 }
 0x398   : > { %v1068_v11 = vpop.f32.mrb[6].mxu1  ;;  %v1220_v12 = vsel %vm1219_vm4, %v1215_v9, -inf }
 0x399   : > { %1221 = vmax.xlane.f32.xlu0 %v1220_v12  ;;  %v2743_v13 = vpop.f32.mrb[7].mxu1 }
 0x409   : > { %v1111_v14 = vpop.f32.mrb[8].mxu1 }
 0x40a   : > { %v1216_v15 = vsel %vm4308_vm3, %v1111_v14, -1e+09  ;;  %v2748_v16 = vpop.f32.mrb[9].mxu1 }
 0x40b   : > { %v1114_v17 = vpop.f32.mrb[10].mxu1  ;;  %v1223_v18 = vsel %vm1219_vm4, %v1216_v15, -inf }
 0x40c   : > { %1224 = vmax.xlane.f32.xlu1 %v1223_v18  ;;  %v2749_v19 = vpop.f32.mrb[11].mxu1 }
 0x40d   : > { %v3038_v19 = vld [vmem:[#allocation13] sm:$0xff]  }
 0x411   : > { %v1157_v20 = vpop.f32.mrb[12].mxu1 }
 0x412   : > { %v1217_v21 = vsel %vm4308_vm3, %v1157_v20, -1e+09  ;;  %v2754_v22 = vpop.f32.mrb[13].mxu1  ;;  %v3039_v20 = vld [vmem:[#allocation13 + $0x8] sm:$0xff]  }
 0x413   : > { %v1160_v23 = vpop.f32.mrb[14].mxu1  ;;  %v1226_v24 = vsel %vm1219_vm4, %v1217_v21, -inf }
 0x414   : > { %1227 = vmax.xlane.f32.xlu0 %v1226_v24  ;;  %v2755_v25 = vpop.f32.mrb[15].mxu1  ;;  %v3040_v24 = vld [vmem:[#allocation13 + $0x10] sm:$0xff]  }
 0x419   : > { %v1203_v27 = vpop.f32.mrb[16].mxu1 }
 0x41a   : > { %v1218_v30 = vsel %vm4308_vm3, %v1203_v27, -1e+09  ;;  %v2760_v32 = vpop.f32.mrb[17].mxu1  ;;  %v3041_v27 = vld [vmem:[#allocation13 + $0x18] sm:$0xff]  }
 0x41b   : > { %v1206_v33 = vpop.f32.mrb[18].mxu1  ;;  %v1229_v34 = vsel %vm1219_vm4, %v1218_v30, -inf  ;;  %v3043_v32 = vld [vmem:[#allocation13 + $0x28] sm:$0xff]  }
 0x41c   : > { %1230 = vmax.xlane.f32.xlu0 %v1229_v34  ;;  %v2761_v35 = vpop.f32.mrb[19].mxu1  ;;  %v3044_v33 = vld [vmem:[#allocation13 + $0x30] sm:$0xff]  }
 0x41d   : > { %1011 = vrot.lane.b32.xlu1 %v4274_v39, %s3702_s23 }
 0x426   : > { %v1222_v36 = vpop.xlane.xlu0 %1221 }
 0x427   : > { %v1232_v37 = vsub.f32 %v1215_v9, %v1222_v36 }
 0x429   : > { %v1236_v38 = vmul.f32 1.442695, %v1232_v37 }
 0x42b   : > { %3126 = vpow2.f32 %v1236_v38  ;;  %v3045_v38 = vld [vmem:[#allocation13 + $0x38] sm:$0xff]  }
 0x435   : > { %v3127_v40 = vpop.eup %3126 }
 0x436   : > { %v1244_v41 = vsel %vm1219_vm4, %v3127_v40, 0.0 }
 0x441   : > { %1245 = vadd.xlane.f32.xlu1 %v1244_v41 }
 0x499   : > { %v1225_v42 = vpop.xlane.xlu1 %1224 }
 0x49a   : > { %v1233_v43 = vsub.f32 %v1216_v15, %v1225_v42 }
 0x49c   : > { %v1238_v44 = vmul.f32 1.442695, %v1233_v43 }
 0x49d   : > { %v1012_v45 = vpop.permute.xlu1 %1011 }
 0x49e   : > { %3128 = vpow2.f32 %v1238_v44  ;;  %v1021_v46 = vpack.c.bf16 %v1012_v45, %v1012_v45 }
 0x4a0   : > { %v1319_v47 = vsel %vm1271_vm2, %v1021_v46, 0 }
 0x4a1   : > { %2769 = vmatpush3.bf16.msra.mxu1 %v1319_v47  ;;  %v1228_v48 = vpop.xlane.xlu0 %1227 }
 0x4a2   : > { %v1234_v49 = vsub.f32 %v1217_v21, %v1228_v48  ;;  %2780 = vmatprep.subr.bf16.mxu1 %v3698_v0 }
 0x4a4   : > { %v1240_v50 = vmul.f32 1.442695, %v1234_v49 }
 0x4a6   : > { %3130 = vpow2.f32 %v1240_v50 }
 0x4a8   : > { %v3129_v51 = vpop.eup %3128 }
 0x4a9   : > { %v1231_v52 = vpop.xlane.xlu0 %1230  ;;  %v1247_v53 = vsel %vm1219_vm4, %v3129_v51, 0.0 }
 0x4aa   : > { %v1235_v54 = vsub.f32 %v1218_v30, %v1231_v52  ;;  %1248 = vadd.xlane.f32.xlu0 %v1247_v53  ;;  %v3042_v30 = vld [vmem:[#allocation13 + $0x20] sm:$0xff]  }
 0x4ac   : > { %v1242_v55 = vmul.f32 1.442695, %v1235_v54  ;;  %v2558_v54 = vld [vmem:[#allocation15] ss:$0 sm:$0xff] }
 0x4ae   : > { %3132 = vpow2.f32 %v1242_v55  ;;  %v702_v55 = vunpack.c.l.bf16 %v4255_v26  ;;  %v3055_v26 = vld [vmem:[#allocation19 + $0x28] ss:$16 sps:$4 sm:$0xff]  }
 0x4b0   : > { %v3131_v56 = vpop.eup %3130 }
 0x4b1   : > { %v1250_v57 = vsel %vm1219_vm4, %v3131_v56, 0.0 }
 0x4b2   : > { %1251 = vadd.xlane.f32.xlu1 %v1250_v57 }
 0x4b8   : > { %v3133_v58 = vpop.eup %3132 }
 0x4b9   : > { %v1253_v59 = vsel %vm1219_vm4, %v3133_v58, 0.0 }
 0x4ba   : > { %1254 = vadd.xlane.f32.xlu0 %v1253_v59 }
 0x4c3   : > { %1017 = vrot.lane.b32.xlu1 %v4274_v39, %s3703_s2 }
 0x4ce   : > { %v1246_v60 = vpop.xlane.xlu1 %1245 }
 0x4cf   : > { %3134 = vrcp.f32 %v1246_v60 }
 0x4d0   : > { %1014 = vrot.lane.b32.xlu0 %v4274_v39, %s3701_s24 }
 0x4d9   : > { %v3135_v61 = vpop.eup %3134 }
 0x4da   : > { %v1260_v62 = vmul.f32 %v3135_v61, %v3127_v40 }
 0x4dc   : > { %v1264_v63 = vpack.c.bf16 %v1260_v62, %v1260_v62  ;;  %v3046_v62 = vld [vmem:[#allocation19] ss:$16 sps:$4 sm:$0xff]  }
 0x4de   : > { %2765 = vmatmul.mubr.msk.bf16.vlgmr.msra.gmra.mrb[4].mxu0 %vm1219_vm4, %v1264_v63  ;;  %v3048_v63 = vld [vmem:[#allocation19 + $0x4] ss:$16 sps:$4 sm:$0xff]  }
 0x4df   : > { %2776 = vmatprep.mubr.msk.bf16.mxu0 %vm3700_vm0, %v3698_v0 }
 0x537   : > { %v1249_v2 = vpop.xlane.xlu0 %1248 }
 0x538   : > { %3136 = vrcp.f32 %v1249_v2  ;;  %v3049_v2 = vld [vmem:[#allocation19 + $0x8] ss:$16 sps:$4 sm:$0xff]  }
 0x53f   : > { %v1252_v3 = vpop.xlane.xlu1 %1251 }
 0x540   : > { %3138 = vrcp.f32 %v1252_v3  ;;  %v3051_v3 = vld [vmem:[#allocation19 + $0xc] ss:$16 sps:$4 sm:$0xff]  }
 0x542   : > { %v3137_v4 = vpop.eup %3136 }
 0x543   : > { %v1261_v5 = vmul.f32 %v3137_v4, %v3129_v51  ;;  %v1018_v6 = vpop.permute.xlu1 %1017  ;;  %v3054_v4 = vld [vmem:[#allocation19 + $0x24] ss:$16 sps:$4 sm:$0xff]  }
 0x544   : > { %v1023_v7 = vpack.c.bf16 %v1018_v6, %v1018_v6  ;;  %v3060_v6 = vld [vmem:[#allocation19 + $0x44] ss:$16 sps:$4 sm:$0xff]  }
 0x545   : > { %v1265_v8 = vpack.c.bf16 %v1261_v5, %v1261_v5  ;;  %v3057_v5 = vld [vmem:[#allocation19 + $0x2c] ss:$16 sps:$4 sm:$0xff]  }
 0x546   : > { %v1411_v9 = vsel %vm1271_vm2, %v1023_v7, 0  ;;  %v3063_v7 = vld [vmem:[#allocation19 + $0x4c] ss:$16 sps:$4 sm:$0xff]  }
 0x547   : > { %2771 = vmatmul.mubr.msk.bf16.vlgmr.msra.gmra.mrb[20].mxu1 %vm1219_vm4, %v1265_v8  ;;  %v1255_v39 = vpop.xlane.xlu0 %1254  ;;  %v3058_v8 = vld [vmem:[#allocation19 + $0x40] ss:$16 sps:$4 sm:$0xff]  }
 0x548   : > { %2781 = vmatpush3.bf16.msra.mxu1 %v1411_v9  ;;  %3140 = vrcp.f32 %v1255_v39  ;;  %2782 = vmatprep.mubr.msk.bf16.mxu1 %vm3700_vm0, %v3698_v0  ;;  %v3061_v9 = vld [vmem:[#allocation19 + $0x48] ss:$16 sps:$4 sm:$0xff]  }
 0x549   : > { %1874 = vmatprep.subr.bf16.mxu1 %v3048_v63  ;;  %v3110_v63 = vld [vmem:[#allocation22 + $0x60] sm:$0xff]  }
 0x54a   : > { %v3139_v10 = vpop.eup %3138 }
 0x54b   : > { %v1015_v11 = vpop.permute.xlu0 %1014  ;;  %v1262_v12 = vmul.f32 %v3139_v10, %v3131_v56 }
 0x54c   : > { %v1022_v13 = vpack.c.bf16 %v1015_v11, %v1015_v11 }
 0x54d   : > { %v1266_v15 = vpack.c.bf16 %v1262_v12, %v1262_v12 }
 0x54e   : > { %v1365_v14 = vsel %vm1271_vm2, %v1022_v13, 0  ;;  %v3066_v13 = vld [vmem:[#allocation19 + $0x64] ss:$16 sps:$4 sm:$0xff]  }
 0x54f   : > { %2775 = vmatpush3.bf16.msra.mxu0 %v1365_v14  ;;  %v3069_v14 = vld [vmem:[#allocation19 + $0x6c] ss:$16 sps:$4 sm:$0xff]  }
 0x550   : > { %2786 = vmatprep.subr.bf16.mxu0 %v3698_v0 }
 0x552   : > { %v3141_v16 = vpop.eup %3140  ;;  %2777 = vmatmul.mubr.msk.bf16.vlgmr.msra.gmra.mrb[8].mxu0 %vm1219_vm4, %v1266_v15  ;;  %v3064_v15 = vld [vmem:[#allocation19 + $0x60] ss:$16 sps:$4 sm:$0xff]  }
 0x553   : > { %v1263_v17 = vmul.f32 %v3141_v16, %v3133_v58  ;;  %2802 = vmatprep.mubr.msk.bf16.mxu0 %vm3700_vm0, %v3698_v0  ;;  %2787 = vmatpush3.bf16.msra.mxu0 %v3038_v19  ;;  %v3067_v16 = vld [vmem:[#allocation19 + $0x68] ss:$16 sps:$4 sm:$0xff]   ;;  %v3070_v19 = vld [vmem:[#allocation19 + $0x80] ss:$16 sps:$4 sm:$0xff]  }
 0x554   : > { %2788 = vmatprep.subr.bf16.mxu0 %v3698_v0 }
 0x555   : > { %v1267_v18 = vpack.c.bf16 %v1263_v17, %v1263_v17  ;;  %v3072_v17 = vld [vmem:[#allocation19 + $0x84] ss:$16 sps:$4 sm:$0xff]  }
 0x557   : > { %2783 = vmatmul.mubr.msk.bf16.vlgmr.msra.gmra.mrb[24].mxu1 %vm1219_vm4, %v1267_v18  ;;  %2789 = vmatpush3.bf16.msra.mxu0 %v3039_v20  ;;  %v3075_v18 = vld [vmem:[#allocation19 + $0x8c] ss:$16 sps:$4 sm:$0xff]   ;;  %v3073_v20 = vld [vmem:[#allocation19 + $0x88] ss:$16 sps:$4 sm:$0xff]  }
 0x558   : > { %1906 = vmatprep.mubr.bf16.mxu1 %v3699_v1  ;;  %2790 = vmatprep.subr.bf16.mxu0 %v3698_v0 }
 0x559   : > { %1875 = vmatpush1.bf16.msra.mxu1 %v3046_v62  ;;  %v3109_v62 = vld [vmem:[#allocation22 + $0x98] sm:$0xff]  }
 0x55a   : > { %1876 = vmatprep.subr.bf16.mxu1 %v3054_v4  ;;  %v3113_v4 = vld [vmem:[#allocation22 + $0xa0] sm:$0xff]  }
 0x55b   : > { %2791 = vmatpush3.bf16.msra.mxu0 %v3040_v24  ;;  %v3079_v24 = vld [vmem:[#allocation19 + $0xa8] ss:$16 sps:$4 sm:$0xff]  }
 0x55c   : > { %2792 = vmatprep.subr.bf16.mxu0 %v3698_v0 }
 0x55f   : > { %2793 = vmatpush3.bf16.msra.mxu0 %v3041_v27  ;;  %v3087_v27 = vld [vmem:[#allocation19 + $0xcc] ss:$16 sps:$4 sm:$0xff]  }
 0x560   : > { %2794 = vmatprep.subr.bf16.mxu0 %v3698_v0 }
 0x563   : > { %2795 = vmatpush3.bf16.msra.mxu0 %v3042_v30  ;;  %v3082_v30 = vld [vmem:[#allocation19 + $0xc0] ss:$16 sps:$4 sm:$0xff]  }
 0x564   : > { %2796 = vmatprep.subr.bf16.mxu0 %v3698_v0 }
 0x567   : > { %2797 = vmatpush3.bf16.msra.mxu0 %v3043_v32  ;;  %v3085_v32 = vld [vmem:[#allocation19 + $0xc8] ss:$16 sps:$4 sm:$0xff]  }
 0x568   : > { %2798 = vmatprep.subr.bf16.mxu0 %v3698_v0 }
 0x56b   : > { %2799 = vmatpush3.bf16.msra.mxu0 %v3044_v33  ;;  %v3090_v33 = vld [vmem:[#allocation19 + $0xe4] ss:$16 sps:$4 sm:$0xff]  }
 0x56c   : > { %2800 = vmatprep.subr.bf16.mxu0 %v3698_v0 }
 0x56f   : > { %2801 = vmatpush3.bf16.msra.mxu0 %v3045_v38  ;;  %v3095_v38 = vld [vmem:[#allocation22 + $0xc0] sm:$0xff]  }
 0x570   : > { %1915 = vmatprep.subr.bf16.mxu0 %v3051_v3  ;;  %v3112_v3 = vld [vmem:[#allocation22 + $0x20] sm:$0xff]  }
 0x5b1   : > { %v1309_v21 = vpop.f32.mrb[4].mxu0 }
 0x5b2   : > { %v2766_v22 = vpop.f32.mrb[5].mxu0 }
 0x5b3   : > { %v1312_v23 = vpop.f32.mrb[6].mxu0  ;;  %v3081_v22 = vld [vmem:[#allocation19 + $0xac] ss:$16 sps:$4 sm:$0xff]  }
 0x5b4   : > { %v2767_v25 = vpop.f32.mrb[7].mxu0  ;;  %v3076_v23 = vld [vmem:[#allocation19 + $0xa0] ss:$16 sps:$4 sm:$0xff]  }
 0x5b5   : > { %v3084_v25 = vld [vmem:[#allocation19 + $0xc4] ss:$16 sps:$4 sm:$0xff]  }
 0x61a   : > { %v1355_v34 = vpop.f32.mrb[20].mxu1 }
 0x61b   : > { %1454 = vrot.lane.b32.xlu1 %v1355_v34, %s3703_s2  ;;  %v2772_v35 = vpop.f32.mrb[21].mxu1  ;;  %v3093_v34 = vld [vmem:[#allocation19 + $0xec] ss:$16 sps:$4 sm:$0xff]   ;;  %s3584_s2 = scalar_lea.vmem %s3583_s4, 128 }
 0x61c   : > { %v1358_v36 = vpop.f32.mrb[22].mxu1  ;;  %v3088_v35 = vld [vmem:[#allocation19 + $0xe0] ss:$16 sps:$4 sm:$0xff]  }
 0x61d   : > { %v2773_v37 = vpop.f32.mrb[23].mxu1  ;;  %v3091_v36 = vld [vmem:[#allocation19 + $0xe8] ss:$16 sps:$4 sm:$0xff]  }
 0x61e   : > { %v3094_v37 = vld [vmem:[#allocation22 + $0x40] sm:$0xff]  }
 0x625   : > { %v1401_v40 = vpop.f32.mrb[8].mxu0 }
 0x626   : > { %1458 = vrot.lane.b32.xlu0 %v1401_v40, %s3701_s24  ;;  %v2778_v41 = vpop.f32.mrb[9].mxu0  ;;  %s2273_s24 = scalar_lea.sflag [#allocation6], %s4203_s1 }
 0x627   : > { %v1404_v42 = vpop.f32.mrb[10].mxu0 }
 0x628   : > { %v2779_v43 = vpop.f32.mrb[11].mxu0 }
 0x62a   : > { %v1447_v44 = vpop.f32.mrb[24].mxu1 }
 0x62b   : > { %1462 = vrot.lane.b32.xlu1 %v1447_v44, %s3702_s23  ;;  %v2784_v45 = vpop.f32.mrb[25].mxu1  ;;  %v2567_v44 = vld [vmem:[#allocation16] ss:$0 sm:$0xff]  ;;  %s3578_s23 = scalar_lea.vmem %s4382_s20, 64 }
 0x62c   : > { %v1450_v46 = vpop.f32.mrb[26].mxu1  ;;  %p3579_p10 = scmp.ne.s32.totalorder %s4382_s20, %s3578_s23  ;;  %p3586_p5 = scmp.lt.s32.totalorder %s3584_s2, %s3578_s23 }
 0x62d   : > { %v2785_v47 = vpop.f32.mrb[27].mxu1  ;;  %v2568_v46 = vld [vmem:[#allocation18] ss:$0 sm:$0xff] }
 0x62e   : > { %p3580_p7 = pnand %p3579_p10, %p4508_p12  ;;  %p3587_p9 = por %p3586_p5, %p3585_p3 }
 0x630   : > { %p3581_p11 = pneg %p3580_p7 }
 0x632   : > { %p3588_p8 = pnand %p3587_p9, %p3581_p11 }
 0x68d   : > { %v1455_v48 = vpop.permute.xlu1 %1454 }
 0x68e   : > { %v1465_v0 = vsel %vm1024_vm1, %v1309_v21, %v1455_v48  ;;  %v3078_v21 = vld [vmem:[#allocation19 + $0xa4] ss:$16 sps:$4 sm:$0xff]  }
 0x698   : > { %v1459_v49 = vpop.permute.xlu0 %1458 }
 0x699   : > { %v1467_v50 = vsel %vm1466_vm5, %v1465_v0, %v1459_v49  ;;  %v3096_v49 = vld [vmem:[#allocation22] sm:$0xff]  }
 0x69a   : > { %v3097_v0 = vld [vmem:[#allocation22 + $0x80] sm:$0xff]  }
 0x69d   : > { %v1463_v51 = vpop.permute.xlu1 %1462 }
 0x69e   : > { %v1469_v52 = vsel %vm1468_vm6, %v1467_v50, %v1463_v51  ;;  %v3098_v51 = vld [vmem:[#allocation22 + $0x48] sm:$0xff]  }
 0x69f   : > { %v1470_v53 = vpack.c.bf16 %v1469_v52, %v1469_v52  ;;  %v3099_v52 = vld [vmem:[#allocation22 + $0xc8] sm:$0xff]  }
 0x6a1   : > { %2803 = vmatmul.mubr.bf16.vlgmr.msra.gmra.mrb[12].mxu0 %v1470_v53  ;;  %v3100_v53 = vld [vmem:[#allocation22 + $0x8] sm:$0xff]  }
 0x6a2   : > { %1947 = vmatprep.mubr.bf16.mxu0 %v3699_v1  ;;  %v3052_v1 = vld [vmem:[#allocation19 + $0x20] ss:$16 sps:$4 sm:$0xff]   ;;  %1916 = vmatpush1.bf16.msra.mxu0 %v3049_v2  ;;  %v3111_v2 = vld [vmem:[#allocation22 + $0xe0] sm:$0xff]  }
 0x6a3   : > { %1917 = vmatprep.subr.bf16.mxu0 %v3057_v5  ;;  %1877 = vmatpush1.bf16.msra.mxu1 %v3052_v1  ;;  %v3114_v5 = vld [vmem:[#allocation22 + $0x68] sm:$0xff]  }
 0x6a4   : > { %1878 = vmatprep.subr.bf16.mxu1 %v3060_v6  ;;  %v3115_v1 = vld [vmem:[#allocation22 + $0xe8] sm:$0xff]  }
 0x6a5   : > { %v3117_v6 = vld [vmem:[#allocation22 + $0xa8] sm:$0xff]  }
 0x6a6   : > { %1918 = vmatpush1.bf16.msra.mxu0 %v3055_v26  ;;  %v3116_v26 = vld [vmem:[#allocation22 + $0x28] sm:$0xff]  }
 0x6a7   : > { %1919 = vmatprep.subr.bf16.mxu0 %v3063_v7  ;;  %1879 = vmatpush1.bf16.msra.mxu1 %v3058_v8  ;;  %v3118_v7 = vld [vmem:[#allocation22 + $0x70] sm:$0xff]  }
 0x6a8   : > { %1880 = vmatprep.subr.bf16.mxu1 %v3066_v13  ;;  %v3119_v8 = vld [vmem:[#allocation22 + $0xf0] sm:$0xff]   ;;  %v3125_v13 = vld [vmem:[#allocation22 + $0xb8] sm:$0xff]  }
 0x6aa   : > { %1920 = vmatpush1.bf16.msra.mxu0 %v3061_v9  ;;  %v3120_v9 = vld [vmem:[#allocation22 + $0x30] sm:$0xff]  }
 0x6ab   : > { %1921 = vmatprep.subr.bf16.mxu0 %v3069_v14  ;;  %1881 = vmatpush1.bf16.msra.mxu1 %v3064_v15  ;;  %v1704_v14 = vsub.s32 2, %v4266_v28  ;;  %v1626_v15 = vld [vmem:[#allocation21] sm:$0xf] }
 0x6ac   : > { %1882 = vmatprep.subr.bf16.mxu1 %v3072_v17  ;;  %v1697_v17 = vrot.slane %v1626_v15, %v853_v29 }
 0x6ae   : > { %1922 = vmatpush1.bf16.msra.mxu0 %v3067_v16  ;;  %v1708_v16 = vsub.s32 3, %v4266_v28 }
 0x6af   : > { %1923 = vmatprep.subr.bf16.mxu0 %v3075_v18  ;;  %1883 = vmatpush1.bf16.msra.mxu1 %v3070_v19  ;;  %v1705_v18 = vrot.slane %v1626_v15, %v1704_v14  ;;  %v1701_v19 = vrot.slane %v1626_v15, %v857_v31 }
 0x6b0   : > { %1884 = vmatprep.subr.bf16.mxu1 %v3078_v21 }
 0x6b2   : > { %1924 = vmatpush1.bf16.msra.mxu0 %v3073_v20  ;;  %v1709_v20 = vrot.slane %v1626_v15, %v1708_v16 }
 0x6b3   : > { %1925 = vmatprep.subr.bf16.mxu0 %v3081_v22  ;;  %1885 = vmatpush1.bf16.msra.mxu1 %v3076_v23 }
 0x6b4   : > { %1886 = vmatprep.subr.bf16.mxu1 %v3084_v25 }
 0x6b6   : > { %1926 = vmatpush1.bf16.msra.mxu0 %v3079_v24 }
 0x6b7   : > { %1927 = vmatprep.subr.bf16.mxu0 %v3087_v27  ;;  %1887 = vmatpush1.bf16.msra.mxu1 %v3082_v30 }
 0x6b8   : > { %1888 = vmatprep.subr.bf16.mxu1 %v3090_v33 }
 0x6ba   : > { %1928 = vmatpush1.bf16.msra.mxu0 %v3085_v32 }
 0x6bb   : > { %1929 = vmatprep.subr.bf16.mxu0 %v3093_v34  ;;  %1889 = vmatpush1.bf16.msra.mxu1 %v3088_v35 }
 0x6bc   : > { %2674 = vmatprep.subr.bf16.mxu1 %v3094_v37 }
 0x6be   : > { %1930 = vmatpush1.bf16.msra.mxu0 %v3091_v36 }
 0x6bf   : > { %2696 = vmatprep.subr.bf16.mxu0 %v3095_v38 }
 0x774   : > { %v1559_v56 = vpop.f32.mrb[12].mxu0 }
 0x775   : > { %v1560_v57 = vadd.f32 %v2558_v54, %v1559_v56  ;;  %v2804_v58 = vpop.f32.mrb[13].mxu0  ;;  %v3101_v54 = vld [vmem:[#allocation22 + $0x88] sm:$0xff]   ;;  %v3103_v56 = vld [vmem:[#allocation22 + $0xd0] sm:$0xff]  }
 0x776   : > { %v1562_v59 = vpop.f32.mrb[14].mxu0  ;;  %v3105_v58 = vld [vmem:[#allocation22 + $0x90] sm:$0xff]  }
 0x777   : > { %v2805_v60 = vpop.f32.mrb[15].mxu0  ;;  %v1565_v61 = vadd.f32 %v1560_v57, %v702_v55  ;;  %v3102_v55 = vld [vmem:[#allocation22 + $0x50] sm:$0xff]   ;;  %v3106_v59 = vld [vmem:[#allocation22 + $0x58] sm:$0xff]  }
 0x778   : > { %v3104_v57 = vld [vmem:[#allocation22 + $0x10] sm:$0xff]   ;;  %v3107_v60 = vld [vmem:[#allocation22 + $0xd8] sm:$0xff]  }
 0x779   : > { %1568 = vadd.xlane.f32.xlu0 %v1565_v61 }
 0x806   : > { %v1569_v39 = vpop.xlane.xlu0 %1568 }
 0x807   : > { %v1571_v10 = vmul.f32 0.0078125, %v1569_v39  ;;  %v3121_v39 = vld [vmem:[#allocation22 + $0xb0] sm:$0xff]  }
 0x809   : > { %v1572_v11 = vsub.f32 %v1565_v61, %v1571_v10  ;;  %v3108_v61 = vld [vmem:[#allocation22 + $0x18] sm:$0xff]  }
 0x80a   : > { %v3122_v10 = vld [vmem:[#allocation22 + $0x78] sm:$0xff]  }
 0x80b   : > { %v1573_v12 = vmul.f32 %v1572_v11, %v1572_v11 }
 0x80d   : > { %1574 = vadd.xlane.f32.xlu1 %v1573_v12  ;;  %v3124_v12 = vld [vmem:[#allocation22 + $0x38] sm:$0xff]  }
 0x89a   : > { %v1575_v40 = vpop.xlane.xlu1 %1574 }
 0x89b   : > { %v1576_v41 = vmul.f32 0.0078125, %v1575_v40 }
 0x89d   : > { %v1577_v42 = vadd.f32 1e-05, %v1576_v41 }
 0x89f   : > { %3142 = vrsqrt.f32 %v1577_v42 }
 0x8a9   : > { %v3143_v43 = vpop.eup %3142 }
 0x8aa   : > { %v1579_v45 = vmul.f32 %v3143_v43, %v1572_v11  ;;  %v3123_v11 = vld [vmem:[#allocation22 + $0xf8] sm:$0xff]  }
 0x8ac   : > { %v1586_v47 = vmul.f32 %v2567_v44, %v1579_v45  ;;  %v2601_v45 = vld [vmem:[#allocation24] ss:$0 sm:$0xff] }
 0x8ae   : > { %v4363_v48 = vadd.f32 %v2568_v46, %v1586_v47 }
 0x8b0   : > { %v1692_v50 = vpack.c.bf16 %v4363_v48, %v4363_v48 }
 0x8b2   : > { %1907 = vmatmul.mubr.bf16.vlgmr.msra.gmra.mrb[28].mxu1 %v1692_v50  ;;  %1948 = vmatmul.mubr.bf16.vlgmr.msra.gmra.mrb[16].mxu0 %v1692_v50 }
 0x8b3   : > { %2675 = vmatpush3.bf16.msra.mxu1 %v3096_v49  ;;  %2697 = vmatpush3.bf16.msra.mxu0 %v3097_v0 }
 0x8b4   : > { %2676 = vmatprep.subr.bf16.mxu1 %v3098_v51  ;;  %2698 = vmatprep.subr.bf16.mxu0 %v3099_v52 }
 0x8b7   : > { %2677 = vmatpush3.bf16.msra.mxu1 %v3100_v53  ;;  %2699 = vmatpush3.bf16.msra.mxu0 %v3101_v54 }
 0x8b8   : > { %2678 = vmatprep.subr.bf16.mxu1 %v3102_v55  ;;  %2700 = vmatprep.subr.bf16.mxu0 %v3103_v56 }
 0x8bb   : > { %2679 = vmatpush3.bf16.msra.mxu1 %v3104_v57  ;;  %2701 = vmatpush3.bf16.msra.mxu0 %v3105_v58 }
 0x8bc   : > { %2680 = vmatprep.subr.bf16.mxu1 %v3106_v59  ;;  %2702 = vmatprep.subr.bf16.mxu0 %v3107_v60 }
 0x8bf   : > { %2681 = vmatpush3.bf16.msra.mxu1 %v3108_v61  ;;  %2703 = vmatpush3.bf16.msra.mxu0 %v3109_v62 }
 0x8c0   : > { %2682 = vmatprep.subr.bf16.mxu1 %v3110_v63  ;;  %2704 = vmatprep.subr.bf16.mxu0 %v3111_v2 }
 0x8c3   : > { %2683 = vmatpush3.bf16.msra.mxu1 %v3112_v3  ;;  %2705 = vmatpush3.bf16.msra.mxu0 %v3113_v4  ;;  %v2634_v3 = vld [vmem:[#allocation25] ss:$0 sm:$0xff] }
 0x8c4   : > { %2684 = vmatprep.subr.bf16.mxu1 %v3114_v5  ;;  %2706 = vmatprep.subr.bf16.mxu0 %v3115_v1  ;;  %v2635_v5 = vld [vmem:[#allocation27] ss:$0 sm:$0xff] }
 0x8c7   : > { %2685 = vmatpush3.bf16.msra.mxu1 %v3116_v26  ;;  %2707 = vmatpush3.bf16.msra.mxu0 %v3117_v6 }
 0x8c8   : > { %2686 = vmatprep.subr.bf16.mxu1 %v3118_v7  ;;  %2708 = vmatprep.subr.bf16.mxu0 %v3119_v8 }
 0x8cb   : > { %2687 = vmatpush3.bf16.msra.mxu1 %v3120_v9  ;;  %2709 = vmatpush3.bf16.msra.mxu0 %v3121_v39 }
 0x8cc   : > { %2688 = vmatprep.subr.bf16.mxu1 %v3122_v10  ;;  %2710 = vmatprep.subr.bf16.mxu0 %v3123_v11 }
 0x8cf   : > { %2689 = vmatpush3.bf16.msra.mxu1 %v3124_v12  ;;  %2711 = vmatpush3.bf16.msra.mxu0 %v3125_v13 }
 0x985   : > { %v1908_v21 = vpop.f32.mrb[28].mxu1  ;;  %v1949_v22 = vpop.f32.mrb[16].mxu0 }
 0x986   : > { %v1909_v23 = vadd.f32 %v1908_v21, %v1697_v17  ;;  %v1950_v24 = vadd.f32 %v1949_v22, %v1705_v18  ;;  %v1910_v25 = vpop.f32.mrb[29].mxu1  ;;  %v1951_v27 = vpop.f32.mrb[17].mxu0 }
 0x987   : > { %v1911_v30 = vadd.f32 %v1910_v25, %v1701_v19  ;;  %v1952_v32 = vadd.f32 %v1951_v27, %v1709_v20  ;;  %v1912_v33 = vpop.f32.mrb[30].mxu1  ;;  %v1953_v34 = vpop.f32.mrb[18].mxu0 }
 0x988   : > { %v1956_v35 = vmax.f32 %v1909_v23, 0.0  ;;  %v1958_v36 = vmax.f32 %v1950_v24, 0.0  ;;  %v1913_v37 = vpop.f32.mrb[31].mxu1  ;;  %v1954_v38 = vpop.f32.mrb[19].mxu0 }
 0x989   : > { %v1957_v29 = vmax.f32 %v1911_v30, 0.0  ;;  %v1959_v40 = vmax.f32 %v1952_v32, 0.0 }
 0x98a   : > { %v1960_v31 = vpack.c.bf16 %v1956_v35, %v1956_v35  ;;  %v1962_v42 = vpack.c.bf16 %v1958_v36, %v1958_v36 }
 0x98b   : > { %v1961_v41 = vpack.c.bf16 %v1957_v29, %v1957_v29  ;;  %v1963_v28 = vpack.c.bf16 %v1959_v40, %v1959_v40 }
 0x98d   : > { %2194 = vmatprep.mubr.bf16.mxu1 %v1961_v41  ;;  %2234 = vmatprep.mubr.bf16.mxu0 %v1963_v28 }
 0x98e   : > { %2195 = vmatmul.mubr.bf16.vlgmr.msra.gmra.mrb[32].mxu1 %v1960_v31  ;;  %2235 = vmatmul.mubr.bf16.vlgmr.msra.gmra.mrb[20].mxu0 %v1962_v42 }
 0xa61   : > { %v2690_v43 = vpop.f32.mrb[32].mxu1  ;;  %v2712_v44 = vpop.f32.mrb[20].mxu0 }
 0xa62   : > { %v2691_v46 = vpop.f32.mrb[33].mxu1  ;;  %v2713_v47 = vpop.f32.mrb[21].mxu0 }
 0xa63   : > { %v2692_v49 = vadd.f32 %v2691_v46, %v2690_v43  ;;  %v2714_v0 = vadd.f32 %v2713_v47, %v2712_v44  ;;  %v2693_v50 = vpop.f32.mrb[34].mxu1  ;;  %v2715_v51 = vpop.f32.mrb[22].mxu0 }
 0xa64   : > { %v2694_v52 = vpop.f32.mrb[35].mxu1  ;;  %v2716_v53 = vpop.f32.mrb[23].mxu0 }
 0xa65   : > { %v2197_v54 = vadd.f32 %v2692_v49, %v2601_v45 }
 0xa67   : > { %v2237_v55 = vadd.f32 %v2714_v0, %v2197_v54 }
 0xa69   : > { %v2242_v56 = vadd.f32 %v2237_v55, %v4363_v48 }
 0xa6b   : > { %2245 = vadd.xlane.f32.xlu0 %v2242_v56 }
 0xaf8   : > { %v2246_v57 = vpop.xlane.xlu0 %2245 }
 0xaf9   : > { %v2247_v58 = vmul.f32 0.0078125, %v2246_v57 }
 0xafb   : > { %v2248_v59 = vsub.f32 %v2242_v56, %v2247_v58 }
 0xafd   : > { %v2249_v60 = vmul.f32 %v2248_v59, %v2248_v59 }
 0xaff   : > { %2250 = vadd.xlane.f32.xlu0 %v2249_v60 }
 0xb8c   : > { %v2251_v61 = vpop.xlane.xlu0 %2250 }
 0xb8d   : > { %v2252_v62 = vmul.f32 0.0078125, %v2251_v61 }
 0xb8f   : > { %v2253_v63 = vadd.f32 1e-05, %v2252_v62 }
 0xb91   : > { %3144 = vrsqrt.f32 %v2253_v63 }
 0xb9b   : > { %v3145_v2 = vpop.eup %3144 }
 0xb9c   : > { %v2255_v4 = vmul.f32 %v3145_v2, %v2248_v59 }
 0xb9e   : > { %v2262_v1 = vmul.f32 %v2634_v3, %v2255_v4 }
 0xba0   : > { %v2269_v48 = vadd.f32 %v2635_v5, %v2262_v1 }
 0xba2   : > { %v2270_v26 = vpack.c.bf16 %v2269_v48, %v2269_v48 }
 0xba4   : > { %2271 = vst [vmem:[%s699_s29] sm:$0xf] %v2270_v26 }
 0xba5   : > { %3591 = shalt.err (!%p3588_p8)
}
 0xba6   : > { %s3592_s1 = scalar_lea.hbm %s4380_s26, 64  ;;  %s3596_s29 = scalar_lea.hbm %s4507_s21, 128 }
 0xba7   : > { %p3593_p13 = scmp.ne.s32.totalorder %s4380_s26, %s3592_s1  ;;  %p3597_p1 = scmp.lt.u32.totalorder %s4380_s26, %s4507_s21 }
 0xba8   : > { %p3598_p2 = scmp.lt.u32.totalorder %s3596_s29, %s3592_s1  ;;  %p3600_p10 = scmp.lt.u32.totalorder %s3592_s1, %s4380_s26 }
 0xba9   : > { %p3594_p4 = pnand %p3593_p13, %p4508_p12 }
 0xbaa   : > { %p3599_p6 = por %p3598_p2, %p3597_p1 }
 0xbab   : > { %p3595_p0 = pneg %p3594_p4 }
 0xbac   : > { %p3601_p7 = por %p3600_p10, %p3599_p6 }
 0xbae   : > { %p3602_p11 = pnand %p3601_p7, %p3595_p0 }
 0xbb0   : > { %3605 = shalt.err (!%p3602_p11)
}
 0xbb1   : > { %2864 = dma.vmem_to_hbm [thread:$0]  (%p4508_p12), %s4382_s20, 64, %s4380_s26, %s2273_s24  }
 0xbb2 PF: > { %s4509_s23 = sld [smem:[#allocation39_spill]]  ;;  %p4510_p3 = scmp.ne.s32.totalorder %s4484_s22, 0 }
 0xbb3   : > { %p4511_p5 = scmp.ge.s32.totalorder %s3674_s18, 2 }
 0xbb5   : > { %p2914_p9 = pnand %p4511_p5, %p4510_p3 }
 0xbb8   : > { %s2298_s28 = sand.u32 1, %s4509_s23  }
 0xbb9   : > { %s2299_s4 = scalar_lea.sflag [#allocation6], %s2298_s28 }
 0xbba   : > { %3657 = dma.done.wait (!%p2914_p9), %s2299_s4, 64  }
 0xbbb   : > { %3659 = vsyncadd (!%p2914_p9), %s2299_s4, 4294967232  ;;  %s4512_s1 = sld [smem:[#allocation40_spill]]  ;;  %s4513_s0 = sld [smem:[#allocation41_spill]] }
 0xbbc   : > { %p40_p8 = scmp.ge.s32.totalorder %s4127_s25, 4   ;;  %s4514_s17 = smov %s4138_s19 }
 0xbbd   : > { %s4515_s18 = smov %s4127_s25 }
 0xbbe   :  { %42 = sbr.rel (!%p40_p8) target bundleno = 31 (0x1f), region = 181 }
 0xbc5   :  { %2304 = vsyncpa [#allocation5], 1 }
 0xbc6   :  { %2306 = vsyncpa [#allocation5 + $0x1], 1 }
 0xbc7   :  { %2307 = vsyncpa [#allocation8], 1 }
 0xbc8   :  { %2308 = vsyncpa [#allocation11], 1 }
 0xbc9   :  { %2309 = vsyncpa [#allocation14], 1 }
 0xbca   :  { %2310 = vsyncpa [#allocation17], 1 }
 0xbcb   :  { %2311 = vsyncpa [#allocation20], 1 }
 0xbcc   :  { %2312 = vsyncpa [#allocation23], 1 }
 0xbcd   :  { %2313 = vsyncpa [#allocation26], 1 }
 0xbce   :  { %2314 = vsyncpa [#allocation6], 1 }
 0xbcf   :  { %2316 = vsyncpa [#allocation6 + $0x1], 1 }

// kernel: transformer_forward.7
= control target key start
LH: loop header
LB: loop body
LE: loop exit
PB: predicated region body
PF: predicated region fallthrough
CT: control target
= control target key end

     0   :  { %s6851_s0 = inlined_call_operand.hbm [shape: s32[2], index: 0, kind: input, shape index: {}]   ;;  %s6852_s2 = inlined_call_operand.hbm [shape: bf16[2,8,128], index: 2, kind: input, shape index: {}]   ;;  %s6853_s3 = inlined_call_operand.hbm [shape: bf16[2,8,128], index: 3, kind: input, shape index: {}]   ;;  %s6854_s4 = inlined_call_operand.hbm [shape: bf16[128,128], index: 4, kind: input, shape index: {}]   ;;  %s6855_s5 = inlined_call_operand.hbm [shape: f32[1,128], index: 5, kind: input, shape index: {}]   ;;  %s6856_s6 = inlined_call_operand.hbm [shape: bf16[128,256], index: 6, kind: input, shape index: {}]   ;;  %s6857_s7 = inlined_call_operand.hbm [shape: f32[1,256], index: 7, kind: input, shape index: {}]   ;;  %s6858_s8 = inlined_call_operand.hbm [shape: bf16[128,128], index: 8, kind: input, shape index: {}]   ;;  %s6859_s9 = inlined_call_operand.hbm [shape: f32[1,128], index: 9, kind: input, shape index: {}]   ;;  %s6860_s10 = inlined_call_operand.hbm [shape: f32[1,128], index: 10, kind: input, shape index: {}]   ;;  %s6861_s11 = inlined_call_operand.hbm [shape: f32[1,128], index: 11, kind: input, shape index: {}]   ;;  %s6862_s12 = inlined_call_operand.hbm [shape: bf16[128,128], index: 12, kind: input, shape index: {}]   ;;  %s6863_s13 = inlined_call_operand.hbm [shape: f32[1,128], index: 13, kind: input, shape index: {}]   ;;  %s6864_s14 = inlined_call_operand.hbm [shape: bf16[128,256], index: 14, kind: input, shape index: {}]   ;;  %s6865_s15 = inlined_call_operand.hbm [shape: f32[1,256], index: 15, kind: input, shape index: {}]   ;;  %s6866_s16 = inlined_call_operand.hbm [shape: bf16[128,128], index: 16, kind: input, shape index: {}]   ;;  %s6867_s17 = inlined_call_operand.hbm [shape: f32[1,128], index: 17, kind: input, shape index: {}]   ;;  %s6868_s18 = inlined_call_operand.hbm [shape: f32[1,128], index: 18, kind: input, shape index: {}]   ;;  %s6869_s19 = inlined_call_operand.hbm [shape: f32[1,128], index: 19, kind: input, shape index: {}]   ;;  %s6870_s20 = inlined_call_operand.hbm [shape: bf16[128,512], index: 20, kind: input, shape index: {}]   ;;  %s6871_s21 = inlined_call_operand.hbm [shape: f32[1,512], index: 21, kind: input, shape index: {}]   ;;  %s6872_s22 = inlined_call_operand.hbm [shape: bf16[512,128], index: 22, kind: input, shape index: {}]   ;;  %s6873_s23 = inlined_call_operand.hbm [shape: f32[1,128], index: 23, kind: input, shape index: {}]   ;;  %s6874_s24 = inlined_call_operand.hbm [shape: f32[1,128], index: 24, kind: input, shape index: {}]   ;;  %s6875_s25 = inlined_call_operand.hbm [shape: f32[1,128], index: 25, kind: input, shape index: {}]   ;;  %s6876_s26 = inlined_call_operand.hbm [shape: bf16[2,8,128], index: 26, kind: output, shape index: {}]   ;;  %s6877_s1 = inlined_call_operand.hbm [shape: s32[2], index: 1, kind: input, shape index: {}]  }
   0x1   :  { %6916 = sst [smem:[#allocation66_spill]] %s6851_s0 }
   0x2   :  { %6917 = sst [smem:[#allocation67_spill]] %s6852_s2 }
   0x3   :  { %6918 = sst [smem:[#allocation68_spill]] %s6853_s3 }
   0x4   :  { %6919 = sst [smem:[#allocation69_spill]] %s6854_s4 }
   0x5   :  { %6920 = sst [smem:[#allocation70_spill]] %s6855_s5 }
   0x6   :  { %6921 = sst [smem:[#allocation71_spill]] %s6856_s6 }
   0x7   :  { %6922 = sst [smem:[#allocation72_spill]] %s6857_s7 }
   0x8   :  { %6923 = sst [smem:[#allocation73_spill]] %s6858_s8  ;;  %s6937_s8 = sld [smem:[#allocation66_spill]] }
   0x9   :  { %6924 = sst [smem:[#allocation74_spill]] %s6859_s9 }
   0xa   :  { %6925 = sst [smem:[#allocation75_spill]] %s6860_s10 }
   0xb   :  { %6926 = sst [smem:[#allocation76_spill]] %s6861_s11 }
   0xc   :  { %6927 = sst [smem:[#allocation77_spill]] %s6862_s12 }
   0xd   :  { %6928 = sst [smem:[#allocation78_spill]] %s6863_s13 }
   0xe   :  { %6929 = sst [smem:[#allocation79_spill]] %s6864_s14 }
   0xf   :  { %6930 = sst [smem:[#allocation80_spill]] %s6865_s15 }
  0x10   :  { %6931 = sst [smem:[#allocation81_spill]] %s6866_s16 }
  0x11   :  { %6932 = sst [smem:[#allocation82_spill]] %s6867_s17 }
  0x12   :  { %6933 = sst [smem:[#allocation83_spill]] %s6868_s18 }
  0x13   :  { %6934 = sst [smem:[#allocation84_spill]] %s6869_s19 }
  0x14   :  { %6935 = sst [smem:[#allocation85_spill]] %s6870_s20  ;;  %s4852_s20 = scalar_lea.hbm %s6937_s8, 16 }
  0x15   :  { %6936 = sst [smem:[#allocation86_spill]] %s6876_s26  ;;  %p4853_p0 = scmp.ne.s32.totalorder %s6937_s8, %s4852_s20 }
  0x16   :  { %p4856_p1 = scmp.lt.u32.totalorder %s4852_s20, %s6937_s8 }
  0x18   :  { %p4858_p2 = pnand %p4856_p1, %p4853_p0 }
  0x1a   :  { %4861 = shalt.err (!%p4858_p2)  }
  0x1b   :  { %s5670_s0 = smov [#allocation3]   ;;  %s4862_s11 = scalar_lea.hbm %s6877_s1, 16 }
  0x1c   :  { %32 = dma.hbm_to_smem %s6937_s8, 16, %s5670_s0, [#allocation2] }
  0x1d   :  { %p4863_p3 = scmp.ne.s32.totalorder %s6877_s1, %s4862_s11  ;;  %p4866_p4 = scmp.lt.u32.totalorder %s4862_s11, %s6877_s1 }
  0x1f   :  { %p4868_p5 = pnand %p4866_p4, %p4863_p3 }
  0x21   :  { %4871 = shalt.err (!%p4868_p5)  }
  0x22   :  { %s5671_s20 = smov [#allocation4]  }
  0x23   :  { %34 = dma.hbm_to_smem %s6877_s1, 16, %s5671_s20, [#allocation2] }
  0x24   :  { %5592 = dma.done.wait [#allocation2], 32 }
  0x25   :  { %5593 = vsyncadd [#allocation2], 4294967264 }
  0x26   :  { %36 = sfence }
  0x27   :  { %37 = vsyncpa [#allocation6], 0 }
  0x28   :  { %39 = vsyncpa [#allocation6 + $0x1], 0 }
  0x29   :  { %40 = vsyncpa [#allocation9], 0 }
  0x2a   :  { %42 = vsyncpa [#allocation9 + $0x1], 0 }
  0x2b   :  { %43 = vsyncpa [#allocation12], 0 }
  0x2c   :  { %44 = vsyncpa [#allocation15], 0 }
  0x2d   :  { %45 = vsyncpa [#allocation18], 0 }
  0x2e   :  { %46 = vsyncpa [#allocation21], 0 }
  0x2f   :  { %47 = vsyncpa [#allocation24], 0 }
  0x30   :  { %48 = vsyncpa [#allocation27], 0 }
  0x31   :  { %49 = vsyncpa [#allocation30], 0 }
  0x32   :  { %50 = vsyncpa [#allocation33], 0 }
  0x33   :  { %51 = vsyncpa [#allocation36], 0 }
  0x34   :  { %52 = vsyncpa [#allocation39], 0 }
  0x35   :  { %53 = vsyncpa [#allocation42], 0 }
  0x36   :  { %54 = vsyncpa [#allocation7], 0 }
  0x37   :  { %56 = vsyncpa [#allocation7 + $0x1], 0  ;;  %s5868_s1 = smov 0   ;;  %s5870_s8 = smov 0  }
  0x38   :  { %s5872_s5 = smov 0   ;;  %s5874_s29 = smov 0  }
  0x39 LB: > { %6938 = sst [smem:[#allocation60_spill]] %s5656_s1  ;;  %s5672_s0 = smov [#allocation10]   ;;  %s5668_s29 = sphi %s5874_s29, %s6377_s29   ;;  %s5664_s5 = sphi %s5872_s5, %s7026_s5   ;;  %s5660_s8 = sphi %s5870_s8, %s7023_s8   ;;  %s5656_s1 = sphi %s5868_s1, %s7025_s1  }
  0x3a   : > { %6939 = sst [smem:[#allocation61_spill]] %s5660_s8  ;;  %s619_s10 = sshll.u32 %s5672_s0, 4  ;;  %s5894_s10 = int_to_ptr.vmem [resolvable:$true] %s619_s10 }
  0x3b   : > { %6940 = sst [smem:[#allocation62_spill]] %s5664_s5  ;;  %s5889_s30 = sadd.s32 4294967295, %s5668_s29  }
  0x3c   : > { %6941 = sst [smem:[#allocation63_spill]] %s5668_s29  ;;  %p3867_p6 = scmp.ge.s32.totalorder %s5668_s29, 1 }
  0x3d   : > { %6942 = sst [smem:[#allocation64_spill]] %s5889_s30  ;;  %p6905_p7 = scmp.eq.s32.totalorder %s5889_s30, 0 }
  0x3e   : > { %p607_p8 = scmp.lt.s32.totalorder %s5668_s29, 3  ;;  %s5673_s6 = smov [#allocation11]  }
  0x3f   : > { %s633_s11 = sshll.u32 %s5673_s6, 4  ;;  %s5674_s2 = smov [#allocation14]   ;;  %s5909_s11 = int_to_ptr.vmem [resolvable:$true] %s633_s11 }
  0x40   : > { %p5896_p9 = pnand %p3867_p6, %p607_p8  ;;  %s657_s27 = sshll.u32 %s5674_s2, 4  ;;  %s5911_s27 = int_to_ptr.vmem [resolvable:$true] %s657_s27 }
  0x41   : > { %s6946_s28 = sld [smem:[#allocation69_spill]] }
  0x42   : > { %s6943_s3 = scalar_select %p5896_p9, 1, 0 }
  0x43   : > { %p4462_p11 = pneg %p5896_p9 }
  0x44   : > { %6944 = sst [smem:[#allocation65_spill]] %s6943_s3 }
  0x45   : > { %p5905_p12 = pnand %p4462_p11, %p6905_p7 }
  0x47   : > { %s4872_s9 = scalar_lea.hbm %s6946_s28, 1024  ;;  %p5921_p0 = pneg %p5905_p12 }
  0x48   : > { %p4873_p13 = scmp.ne.s32.totalorder %s6946_s28, %s4872_s9  ;;  %p4879_p3 = scmp.lt.u32.totalorder %s4872_s9, %s6946_s28 }
  0x4a   : > { %p4875_p1 = pnand %p5921_p0, %p4873_p13 }
  0x4c   : > { %p4876_p2 = pneg %p4875_p1 }
  0x4e   : > { %p4881_p4 = pnand %p4879_p3, %p4876_p2 }
  0x50   : > { %4884 = shalt.err (!%p4881_p4)
}
  0x51   : > { %s4885_s26 = scalar_lea.vmem %s5894_s10, 1024  ;;  %p4893_p11 = scmp.lt.s32.totalorder %s5894_s10, %s5894_s10 }
  0x52   : > { %p4886_p5 = scmp.ne.s32.totalorder %s5894_s10, %s4885_s26  ;;  %p4894_p10 = scmp.lt.s32.totalorder %s4885_s26, %s4885_s26 }
  0x54   : > { %p4888_p6 = pnand %p4886_p5, %p5921_p0  ;;  %p4895_p13 = por %p4894_p10, %p4893_p11 }
  0x56   : > { %p4889_p8 = pneg %p4888_p6 }
  0x58   : > { %p4896_p1 = pnand %p4895_p13, %p4889_p8 }
  0x5a   : > { %4899 = shalt.err (!%p4896_p1)
}
  0x5b   : > { %s6899_s4 = smov 64   ;;  %s6901_s3 = smov 4  }
  0x5c   : > { %4465 = dma.hbm_to_vmem [thread:$0]  (!%p5905_p12), %s6946_s28, 1024, %s5894_s10, [#allocation9], %s6899_s4, %s6899_s4, %s6901_s3  }
  0x5d   : > { %s6948_s30 = sld [smem:[#allocation70_spill]] }
  0x63   : > { %s4900_s26 = scalar_lea.hbm %s6948_s30, 16 }
  0x64   : > { %p4901_p10 = scmp.ne.s32.totalorder %s6948_s30, %s4900_s26  ;;  %p4907_p4 = scmp.lt.u32.totalorder %s4900_s26, %s6948_s30 }
  0x66   : > { %p4903_p2 = pnand %p4901_p10, %p5921_p0 }
  0x68   : > { %p4904_p3 = pneg %p4903_p2 }
  0x6a   : > { %p4909_p5 = pnand %p4907_p4, %p4904_p3 }
  0x6c   : > { %4912 = shalt.err (!%p4909_p5)
}
  0x6d   : > { %s4913_s10 = scalar_lea.vmem %s5909_s11, 16  ;;  %s4920_s1 = scalar_lea.vmem %s5909_s11, 32 }
  0x6e   : > { %p4914_p6 = scmp.ne.s32.totalorder %s5909_s11, %s4913_s10  ;;  %p4921_p13 = scmp.lt.s32.totalorder %s5909_s11, %s5909_s11 }
  0x6f   : > { %p4922_p1 = scmp.lt.s32.totalorder %s4920_s1, %s4913_s10 }
  0x70   : > { %p4916_p8 = pnand %p4914_p6, %p5921_p0 }
  0x71   : > { %p4923_p10 = por %p4922_p1, %p4921_p13 }
  0x72   : > { %p4917_p11 = pneg %p4916_p8 }
  0x74   : > { %p4924_p2 = pnand %p4923_p10, %p4917_p11 }
  0x76   : > { %4927 = shalt.err (!%p4924_p2)
}
  0x77   : > { %4468 = dma.hbm_to_vmem [thread:$0]  (!%p5905_p12), %s6948_s30, 16, %s5909_s11, [#allocation12]  }
  0x78   : > { %s6949_s9 = sld [smem:[#allocation72_spill]] }
  0x7e   : > { %s4928_s0 = scalar_lea.hbm %s6949_s9, 32 }
  0x7f   : > { %p4929_p3 = scmp.ne.s32.totalorder %s6949_s9, %s4928_s0  ;;  %p4935_p6 = scmp.lt.u32.totalorder %s4928_s0, %s6949_s9 }
  0x81   : > { %p4931_p4 = pnand %p4929_p3, %p5921_p0 }
  0x83   : > { %p4932_p5 = pneg %p4931_p4 }
  0x85   : > { %p4937_p8 = pnand %p4935_p6, %p4932_p5 }
  0x87   : > { %4940 = shalt.err (!%p4937_p8)
}
  0x88   : > { %s4941_s11 = scalar_lea.vmem %s5911_s27, 32  ;;  %p4949_p10 = scmp.lt.s32.totalorder %s5911_s27, %s5911_s27 }
  0x89   : > { %p4942_p11 = scmp.ne.s32.totalorder %s5911_s27, %s4941_s11  ;;  %p4950_p2 = scmp.lt.s32.totalorder %s4941_s11, %s4941_s11 }
  0x8b   : > { %p4944_p13 = pnand %p4942_p11, %p5921_p0  ;;  %p4951_p3 = por %p4950_p2, %p4949_p10 }
  0x8d   : > { %p4945_p1 = pneg %p4944_p13 }
  0x8f   : > { %p4952_p4 = pnand %p4951_p3, %p4945_p1 }
  0x91   : > { %4955 = shalt.err (!%p4952_p4)
}
  0x92   : > { %4474 = dma.hbm_to_vmem [thread:$0]  (!%p5905_p12), %s6949_s9, 32, %s5911_s27, [#allocation15]  }
  0x93   : > { %s5677_s29 = smov [#allocation17]   ;;  %s5678_s0 = smov [#allocation20]  }
  0x94   : > { %s681_s20 = sshll.u32 %s5677_s29, 4  ;;  %s703_s2 = sshll.u32 %s5678_s0, 4  ;;  %s682_s20 = int_to_ptr.vmem [resolvable:$true] %s681_s20  ;;  %s704_s2 = int_to_ptr.vmem [resolvable:$true] %s703_s2 }
  0x95   : > { %s6950_s1 = sld [smem:[#allocation74_spill]] }
  0x9b   : > { %s6951_s4 = smov %s6950_s1  ;;  %s4956_s11 = scalar_lea.hbm %s6950_s1, 16 }
  0x9c   : > { %p4957_p5 = scmp.ne.s32.totalorder %s6951_s4, %s4956_s11  ;;  %p4963_p11 = scmp.lt.u32.totalorder %s4956_s11, %s6951_s4 }
  0x9e   : > { %p4959_p6 = pnand %p4957_p5, %p5921_p0 }
  0xa0   : > { %p4960_p8 = pneg %p4959_p6 }
  0xa2   : > { %p4965_p13 = pnand %p4963_p11, %p4960_p8 }
  0xa4   : > { %4968 = shalt.err (!%p4965_p13)
}
  0xa5   : > { %s4969_s27 = scalar_lea.vmem %s682_s20, 16  ;;  %s4976_s5 = scalar_lea.vmem %s682_s20, 32 }
  0xa6   : > { %p4970_p1 = scmp.ne.s32.totalorder %s682_s20, %s4969_s27  ;;  %p4977_p3 = scmp.lt.s32.totalorder %s682_s20, %s682_s20 }
  0xa7   : > { %p4978_p4 = scmp.lt.s32.totalorder %s4976_s5, %s4969_s27 }
  0xa8   : > { %p4972_p10 = pnand %p4970_p1, %p5921_p0 }
  0xa9   : > { %p4979_p7 = por %p4978_p4, %p4977_p3 }
  0xaa   : > { %p4973_p2 = pneg %p4972_p10 }
  0xac   : > { %p4980_p9 = pnand %p4979_p7, %p4973_p2 }
  0xae   : > { %4983 = shalt.err (!%p4980_p9)
}
  0xaf   : > { %4480 = dma.hbm_to_vmem [thread:$0]  (!%p5905_p12), %s6951_s4, 16, %s682_s20, [#allocation18]  }
  0xb0   : > { %s6952_s0 = sld [smem:[#allocation76_spill]] }
  0xb6   : > { %s4984_s26 = scalar_lea.hbm %s6952_s0, 16 }
  0xb7   : > { %p4985_p5 = scmp.ne.s32.totalorder %s6952_s0, %s4984_s26  ;;  %p4991_p9 = scmp.lt.u32.totalorder %s4984_s26, %s6952_s0 }
  0xb9   : > { %p4987_p6 = pnand %p4985_p5, %p5921_p0 }
  0xbb   : > { %p4988_p7 = pneg %p4987_p6 }
  0xbd   : > { %p4993_p8 = pnand %p4991_p9, %p4988_p7 }
  0xbf   : > { %4996 = shalt.err (!%p4993_p8)
}
  0xc0   : > { %s4997_s27 = scalar_lea.vmem %s704_s2, 16  ;;  %s5004_s20 = scalar_lea.vmem %s704_s2, 32 }
  0xc1   : > { %p4998_p11 = scmp.ne.s32.totalorder %s704_s2, %s4997_s27  ;;  %p5005_p10 = scmp.lt.s32.totalorder %s704_s2, %s704_s2 }
  0xc2   : > { %p5006_p2 = scmp.lt.s32.totalorder %s5004_s20, %s4997_s27 }
  0xc3   : > { %p5000_p13 = pnand %p4998_p11, %p5921_p0 }
  0xc4   : > { %p5007_p3 = por %p5006_p2, %p5005_p10 }
  0xc5   : > { %p5001_p1 = pneg %p5000_p13 }
  0xc7   : > { %p5008_p4 = pnand %p5007_p3, %p5001_p1 }
  0xc9   : > { %5011 = shalt.err (!%p5008_p4)
}
  0xca   : > { %4486 = dma.hbm_to_vmem [thread:$0]  (!%p5905_p12), %s6952_s0, 16, %s704_s2, [#allocation21]  }
  0xcb   : > { %s5679_s3 = smov [#allocation23]   ;;  %s5680_s29 = smov [#allocation26]  }
  0xcc   : > { %s727_s30 = sshll.u32 %s5679_s3, 4  ;;  %s751_s26 = sshll.u32 %s5680_s29, 4  ;;  %s728_s30 = int_to_ptr.vmem [resolvable:$true] %s727_s30  ;;  %s752_s26 = int_to_ptr.vmem [resolvable:$true] %s751_s26 }
  0xcd   : > { %s6953_s13 = sld [smem:[#allocation78_spill]] }
  0xd3   : > { %s5012_s11 = scalar_lea.hbm %s6953_s13, 16 }
  0xd4   : > { %p5013_p5 = scmp.ne.s32.totalorder %s6953_s13, %s5012_s11  ;;  %p5019_p9 = scmp.lt.u32.totalorder %s5012_s11, %s6953_s13 }
  0xd6   : > { %p5015_p6 = pnand %p5013_p5, %p5921_p0 }
  0xd8   : > { %p5016_p7 = pneg %p5015_p6 }
  0xda   : > { %p5021_p8 = pnand %p5019_p9, %p5016_p7 }
  0xdc   : > { %5024 = shalt.err (!%p5021_p8)
}
  0xdd   : > { %s5025_s2 = scalar_lea.vmem %s728_s30, 16  ;;  %s5032_s28 = scalar_lea.vmem %s728_s30, 32 }
  0xde   : > { %p5026_p11 = scmp.ne.s32.totalorder %s728_s30, %s5025_s2  ;;  %p5033_p10 = scmp.lt.s32.totalorder %s728_s30, %s728_s30 }
  0xdf   : > { %p5034_p2 = scmp.lt.s32.totalorder %s5032_s28, %s5025_s2 }
  0xe0   : > { %p5028_p13 = pnand %p5026_p11, %p5921_p0 }
  0xe1   : > { %p5035_p3 = por %p5034_p2, %p5033_p10 }
  0xe2   : > { %p5029_p1 = pneg %p5028_p13 }
  0xe4   : > { %p5036_p4 = pnand %p5035_p3, %p5029_p1 }
  0xe6   : > { %5039 = shalt.err (!%p5036_p4)
}
  0xe7   : > { %4492 = dma.hbm_to_vmem [thread:$0]  (!%p5905_p12), %s6953_s13, 16, %s728_s30, [#allocation24]  }
  0xe8   : > { %s6954_s15 = sld [smem:[#allocation80_spill]] }
  0xee   : > { %s5040_s11 = scalar_lea.hbm %s6954_s15, 32 }
  0xef   : > { %p5041_p5 = scmp.ne.s32.totalorder %s6954_s15, %s5040_s11  ;;  %p5047_p9 = scmp.lt.u32.totalorder %s5040_s11, %s6954_s15 }
  0xf1   : > { %p5043_p6 = pnand %p5041_p5, %p5921_p0 }
  0xf3   : > { %p5044_p7 = pneg %p5043_p6 }
  0xf5   : > { %p5049_p8 = pnand %p5047_p9, %p5044_p7 }
  0xf7   : > { %5052 = shalt.err (!%p5049_p8)
}
  0xf8   : > { %s5053_s2 = scalar_lea.vmem %s752_s26, 32  ;;  %p5061_p10 = scmp.lt.s32.totalorder %s752_s26, %s752_s26 }
  0xf9   : > { %p5054_p11 = scmp.ne.s32.totalorder %s752_s26, %s5053_s2  ;;  %p5062_p2 = scmp.lt.s32.totalorder %s5053_s2, %s5053_s2 }
  0xfb   : > { %p5056_p13 = pnand %p5054_p11, %p5921_p0  ;;  %p5063_p3 = por %p5062_p2, %p5061_p10 }
  0xfd   : > { %p5057_p1 = pneg %p5056_p13 }
  0xff   : > { %p5064_p4 = pnand %p5063_p3, %p5057_p1 }
 0x101   : > { %5067 = shalt.err (!%p5064_p4)
}
 0x102   : > { %4498 = dma.hbm_to_vmem [thread:$0]  (!%p5905_p12), %s6954_s15, 32, %s752_s26, [#allocation27]  }
 0x103   : > { %s5681_s3 = smov [#allocation29]   ;;  %s5682_s10 = smov [#allocation32]  }
 0x104   : > { %s775_s29 = sshll.u32 %s5681_s3, 4  ;;  %s797_s1 = sshll.u32 %s5682_s10, 4  ;;  %s776_s29 = int_to_ptr.vmem [resolvable:$true] %s775_s29  ;;  %s798_s1 = int_to_ptr.vmem [resolvable:$true] %s797_s1 }
 0x105   : > { %s6955_s17 = sld [smem:[#allocation82_spill]] }
 0x10b   : > { %s5068_s27 = scalar_lea.hbm %s6955_s17, 16 }
 0x10c   : > { %p5069_p5 = scmp.ne.s32.totalorder %s6955_s17, %s5068_s27  ;;  %p5075_p9 = scmp.lt.u32.totalorder %s5068_s27, %s6955_s17 }
 0x10e   : > { %p5071_p6 = pnand %p5069_p5, %p5921_p0 }
 0x110   : > { %p5072_p7 = pneg %p5071_p6 }
 0x112   : > { %p5077_p8 = pnand %p5075_p9, %p5072_p7 }
 0x114   : > { %5080 = shalt.err (!%p5077_p8)
}
 0x115   : > { %s5081_s26 = scalar_lea.vmem %s776_s29, 16  ;;  %s5088_s28 = scalar_lea.vmem %s776_s29, 32 }
 0x116   : > { %p5082_p11 = scmp.ne.s32.totalorder %s776_s29, %s5081_s26  ;;  %p5089_p10 = scmp.lt.s32.totalorder %s776_s29, %s776_s29 }
 0x117   : > { %p5090_p2 = scmp.lt.s32.totalorder %s5088_s28, %s5081_s26 }
 0x118   : > { %p5084_p13 = pnand %p5082_p11, %p5921_p0 }
 0x119   : > { %p5091_p3 = por %p5090_p2, %p5089_p10 }
 0x11a   : > { %p5085_p1 = pneg %p5084_p13 }
 0x11c   : > { %p5092_p4 = pnand %p5091_p3, %p5085_p1 }
 0x11e   : > { %5095 = shalt.err (!%p5092_p4)
}
 0x11f   : > { %4504 = dma.hbm_to_vmem [thread:$0]  (!%p5905_p12), %s6955_s17, 16, %s776_s29, [#allocation30]  }
 0x120   : > { %s6956_s19 = sld [smem:[#allocation84_spill]] }
 0x126   : > { %s5096_s27 = scalar_lea.hbm %s6956_s19, 16 }
 0x127   : > { %p5097_p5 = scmp.ne.s32.totalorder %s6956_s19, %s5096_s27  ;;  %p5103_p9 = scmp.lt.u32.totalorder %s5096_s27, %s6956_s19 }
 0x129   : > { %p5099_p6 = pnand %p5097_p5, %p5921_p0 }
 0x12b   : > { %p5100_p7 = pneg %p5099_p6 }
 0x12d   : > { %p5105_p8 = pnand %p5103_p9, %p5100_p7 }
 0x12f   : > { %5108 = shalt.err (!%p5105_p8)
}
 0x130   : > { %s5109_s26 = scalar_lea.vmem %s798_s1, 16  ;;  %s5116_s29 = scalar_lea.vmem %s798_s1, 32 }
 0x131   : > { %p5110_p11 = scmp.ne.s32.totalorder %s798_s1, %s5109_s26  ;;  %p5117_p10 = scmp.lt.s32.totalorder %s798_s1, %s798_s1 }
 0x132   : > { %p5118_p2 = scmp.lt.s32.totalorder %s5116_s29, %s5109_s26 }
 0x133   : > { %p5112_p13 = pnand %p5110_p11, %p5921_p0 }
 0x134   : > { %p5119_p3 = por %p5118_p2, %p5117_p10 }
 0x135   : > { %p5113_p1 = pneg %p5112_p13 }
 0x137   : > { %p5120_p4 = pnand %p5119_p3, %p5113_p1 }
 0x139   : > { %5123 = shalt.err (!%p5120_p4)
}
 0x13a   : > { %4510 = dma.hbm_to_vmem [thread:$0]  (!%p5905_p12), %s6956_s19, 16, %s798_s1, [#allocation33]  }
 0x13b   : > { %s5683_s10 = smov [#allocation35]   ;;  %s5684_s8 = smov [#allocation38]  }
 0x13c   : > { %s821_s11 = sshll.u32 %s5683_s10, 4  ;;  %s845_s27 = sshll.u32 %s5684_s8, 4  ;;  %s822_s11 = int_to_ptr.vmem [resolvable:$true] %s821_s11  ;;  %s846_s27 = int_to_ptr.vmem [resolvable:$true] %s845_s27 }
 0x13d   : > { %s5124_s2 = scalar_lea.hbm %s6871_s21, 64 }
 0x13e   : > { %p5125_p5 = scmp.ne.s32.totalorder %s6871_s21, %s5124_s2  ;;  %p5131_p9 = scmp.lt.u32.totalorder %s5124_s2, %s6871_s21 }
 0x140   : > { %p5127_p6 = pnand %p5125_p5, %p5921_p0 }
 0x142   : > { %p5128_p7 = pneg %p5127_p6 }
 0x144   : > { %p5133_p8 = pnand %p5131_p9, %p5128_p7 }
 0x146   : > { %5136 = shalt.err (!%p5133_p8)
}
 0x147   : > { %s5137_s1 = scalar_lea.vmem %s822_s11, 64  ;;  %p5145_p10 = scmp.lt.s32.totalorder %s822_s11, %s822_s11 }
 0x148   : > { %p5138_p11 = scmp.ne.s32.totalorder %s822_s11, %s5137_s1  ;;  %p5146_p2 = scmp.lt.s32.totalorder %s5137_s1, %s5137_s1 }
 0x14a   : > { %p5140_p13 = pnand %p5138_p11, %p5921_p0  ;;  %p5147_p3 = por %p5146_p2, %p5145_p10 }
 0x14c   : > { %p5141_p1 = pneg %p5140_p13 }
 0x14e   : > { %p5148_p4 = pnand %p5147_p3, %p5141_p1 }
 0x150   : > { %5151 = shalt.err (!%p5148_p4)
}
 0x151   : > { %4516 = dma.hbm_to_vmem [thread:$0]  (!%p5905_p12), %s6871_s21, 64, %s822_s11, [#allocation36]  }
 0x152   : > { %s5152_s5 = scalar_lea.hbm %s6873_s23, 16 }
 0x153   : > { %p5153_p5 = scmp.ne.s32.totalorder %s6873_s23, %s5152_s5  ;;  %p5159_p9 = scmp.lt.u32.totalorder %s5152_s5, %s6873_s23 }
 0x155   : > { %p5155_p6 = pnand %p5153_p5, %p5921_p0 }
 0x157   : > { %p5156_p7 = pneg %p5155_p6 }
 0x159   : > { %p5161_p8 = pnand %p5159_p9, %p5156_p7 }
 0x15b   : > { %5164 = shalt.err (!%p5161_p8)
}
 0x15c   : > { %s5165_s28 = scalar_lea.vmem %s846_s27, 16  ;;  %s5172_s11 = scalar_lea.vmem %s846_s27, 32 }
 0x15d   : > { %p5166_p11 = scmp.ne.s32.totalorder %s846_s27, %s5165_s28  ;;  %p5173_p10 = scmp.lt.s32.totalorder %s846_s27, %s846_s27 }
 0x15e   : > { %p5174_p2 = scmp.lt.s32.totalorder %s5172_s11, %s5165_s28 }
 0x15f   : > { %p5168_p13 = pnand %p5166_p11, %p5921_p0 }
 0x160   : > { %p5175_p3 = por %p5174_p2, %p5173_p10 }
 0x161   : > { %p5169_p1 = pneg %p5168_p13 }
 0x163   : > { %p5176_p4 = pnand %p5175_p3, %p5169_p1 }
 0x165   : > { %5179 = shalt.err (!%p5176_p4)
}
 0x166   : > { %4522 = dma.hbm_to_vmem [thread:$0]  (!%p5905_p12), %s6873_s23, 16, %s846_s27, [#allocation39]  }
 0x167   : > { %s5685_s10 = smov [#allocation13]   ;;  %s6957_s2 = sld [smem:[#allocation71_spill]] }
 0x168   : > { %s643_s8 = sshll.u32 %s5685_s10, 4  ;;  %s644_s8 = int_to_ptr.vmem [resolvable:$true] %s643_s8 }
 0x16d   : > { %s5180_s30 = scalar_lea.hbm %s6957_s2, 2048 }
 0x16e   : > { %p5181_p5 = scmp.ne.s32.totalorder %s6957_s2, %s5180_s30  ;;  %p5187_p9 = scmp.lt.u32.totalorder %s5180_s30, %s6957_s2 }
 0x170   : > { %p5183_p6 = pnand %p5181_p5, %p5921_p0 }
 0x172   : > { %p5184_p7 = pneg %p5183_p6 }
 0x174   : > { %p5189_p8 = pnand %p5187_p9, %p5184_p7 }
 0x176   : > { %5192 = shalt.err (!%p5189_p8)
}
 0x177   : > { %s5193_s27 = scalar_lea.vmem %s644_s8, 2048  ;;  %p5201_p10 = scmp.lt.s32.totalorder %s644_s8, %s644_s8 }
 0x178   : > { %p5194_p11 = scmp.ne.s32.totalorder %s644_s8, %s5193_s27  ;;  %p5202_p2 = scmp.lt.s32.totalorder %s5193_s27, %s5193_s27 }
 0x17a   : > { %p5196_p13 = pnand %p5194_p11, %p5921_p0  ;;  %p5203_p3 = por %p5202_p2, %p5201_p10 }
 0x17c   : > { %p5197_p1 = pneg %p5196_p13 }
 0x17e   : > { %p5204_p4 = pnand %p5203_p3, %p5197_p1 }
 0x180   : > { %5207 = shalt.err (!%p5204_p4)
}
 0x181   : > { %s6910_s1 = smov 128   ;;  %s6911_s3 = smov 8  }
 0x182   : > { %4471 = dma.hbm_to_vmem [thread:$0]  (!%p5905_p12), %s6957_s2, 2048, %s644_s8, [#allocation12], %s6910_s1, %s6910_s1, %s6911_s3  }
 0x183   : > { %s5688_s5 = smov [#allocation16]   ;;  %s5689_s26 = smov [#allocation19]  }
 0x184   : > { %s667_s30 = sshll.u32 %s5688_s5, 4  ;;  %s692_s29 = sshll.u32 %s5689_s26, 4  ;;  %s668_s30 = int_to_ptr.vmem [resolvable:$true] %s667_s30  ;;  %s6157_s29 = int_to_ptr.vmem [resolvable:$true] %s692_s29 }
 0x185   : > { %s6958_s27 = sld [smem:[#allocation73_spill]] }
 0x18b   : > { %s5208_s0 = scalar_lea.hbm %s6958_s27, 1024 }
 0x18c   : > { %p5209_p5 = scmp.ne.s32.totalorder %s6958_s27, %s5208_s0  ;;  %p5215_p9 = scmp.lt.u32.totalorder %s5208_s0, %s6958_s27 }
 0x18e   : > { %p5211_p6 = pnand %p5209_p5, %p5921_p0 }
 0x190   : > { %p5212_p7 = pneg %p5211_p6 }
 0x192   : > { %p5217_p8 = pnand %p5215_p9, %p5212_p7 }
 0x194   : > { %5220 = shalt.err (!%p5217_p8)
}
 0x195   : > { %s5221_s20 = scalar_lea.vmem %s668_s30, 1024  ;;  %p5229_p10 = scmp.lt.s32.totalorder %s668_s30, %s668_s30 }
 0x196   : > { %p5222_p11 = scmp.ne.s32.totalorder %s668_s30, %s5221_s20  ;;  %p5230_p2 = scmp.lt.s32.totalorder %s5221_s20, %s5221_s20 }
 0x198   : > { %p5224_p13 = pnand %p5222_p11, %p5921_p0  ;;  %p5231_p3 = por %p5230_p2, %p5229_p10 }
 0x19a   : > { %p5225_p1 = pneg %p5224_p13 }
 0x19c   : > { %p5232_p4 = pnand %p5231_p3, %p5225_p1 }
 0x19e   : > { %5235 = shalt.err (!%p5232_p4)
}
 0x19f   : > { %s6959_s4 = smov 4   ;;  %s6960_s9 = smov 64  }
 0x1a0   : > { %4477 = dma.hbm_to_vmem [thread:$0]  (!%p5905_p12), %s6958_s27, 1024, %s668_s30, [#allocation15], %s6960_s9, %s6960_s9, %s6959_s4  }
 0x1a1   : > { %s6961_s11 = sld [smem:[#allocation75_spill]] }
 0x1a7   : > { %s5236_s10 = scalar_lea.hbm %s6961_s11, 16 }
 0x1a8   : > { %p5237_p5 = scmp.ne.s32.totalorder %s6961_s11, %s5236_s10  ;;  %p5243_p9 = scmp.lt.u32.totalorder %s5236_s10, %s6961_s11 }
 0x1aa   : > { %p5239_p6 = pnand %p5237_p5, %p5921_p0 }
 0x1ac   : > { %p5240_p7 = pneg %p5239_p6 }
 0x1ae   : > { %p5245_p8 = pnand %p5243_p9, %p5240_p7 }
 0x1b0   : > { %5248 = shalt.err (!%p5245_p8)
}
 0x1b1   : > { %s5249_s30 = scalar_lea.vmem %s6157_s29, 16  ;;  %s5256_s1 = scalar_lea.vmem %s6157_s29, 32 }
 0x1b2   : > { %p5250_p11 = scmp.ne.s32.totalorder %s6157_s29, %s5249_s30  ;;  %p5257_p10 = scmp.lt.s32.totalorder %s6157_s29, %s6157_s29 }
 0x1b3   : > { %p5258_p2 = scmp.lt.s32.totalorder %s5256_s1, %s5249_s30 }
 0x1b4   : > { %p5252_p13 = pnand %p5250_p11, %p5921_p0 }
 0x1b5   : > { %p5259_p3 = por %p5258_p2, %p5257_p10 }
 0x1b6   : > { %p5253_p1 = pneg %p5252_p13 }
 0x1b8   : > { %p5260_p4 = pnand %p5259_p3, %p5253_p1 }
 0x1ba   : > { %5263 = shalt.err (!%p5260_p4)
}
 0x1bb   : > { %4483 = dma.hbm_to_vmem [thread:$0]  (!%p5905_p12), %s6961_s11, 16, %s6157_s29, [#allocation18]  }
 0x1bc   : > { %s5690_s0 = smov [#allocation22]   ;;  %s5691_s28 = smov [#allocation25]  }
 0x1bd   : > { %s713_s26 = sshll.u32 %s5690_s0, 4  ;;  %s737_s10 = sshll.u32 %s5691_s28, 4  ;;  %s714_s26 = int_to_ptr.vmem [resolvable:$true] %s713_s26  ;;  %s6204_s10 = int_to_ptr.vmem [resolvable:$true] %s737_s10 }
 0x1be   : > { %s6962_s12 = sld [smem:[#allocation77_spill]] }
 0x1c4   : > { %s5264_s30 = scalar_lea.hbm %s6962_s12, 1024 }
 0x1c5   : > { %p5265_p5 = scmp.ne.s32.totalorder %s6962_s12, %s5264_s30  ;;  %p5271_p9 = scmp.lt.u32.totalorder %s5264_s30, %s6962_s12 }
 0x1c7   : > { %p5267_p6 = pnand %p5265_p5, %p5921_p0 }
 0x1c9   : > { %p5268_p7 = pneg %p5267_p6 }
 0x1cb   : > { %p5273_p8 = pnand %p5271_p9, %p5268_p7 }
 0x1cd   : > { %5276 = shalt.err (!%p5273_p8)
}
 0x1ce   : > { %s5277_s5 = scalar_lea.vmem %s714_s26, 1024  ;;  %p5285_p10 = scmp.lt.s32.totalorder %s714_s26, %s714_s26 }
 0x1cf   : > { %p5278_p11 = scmp.ne.s32.totalorder %s714_s26, %s5277_s5  ;;  %p5286_p2 = scmp.lt.s32.totalorder %s5277_s5, %s5277_s5 }
 0x1d1   : > { %p5280_p13 = pnand %p5278_p11, %p5921_p0  ;;  %p5287_p3 = por %p5286_p2, %p5285_p10 }
 0x1d3   : > { %p5281_p1 = pneg %p5280_p13 }
 0x1d5   : > { %p5288_p4 = pnand %p5287_p3, %p5281_p1 }
 0x1d7   : > { %5291 = shalt.err (!%p5288_p4)
}
 0x1d8   : > { %4489 = dma.hbm_to_vmem [thread:$0]  (!%p5905_p12), %s6962_s12, 1024, %s714_s26, [#allocation21], %s6960_s9, %s6960_s9, %s6959_s4  }
 0x1d9   : > { %s6963_s14 = sld [smem:[#allocation79_spill]] }
 0x1df   : > { %s5292_s20 = scalar_lea.hbm %s6963_s14, 2048 }
 0x1e0   : > { %p5293_p5 = scmp.ne.s32.totalorder %s6963_s14, %s5292_s20  ;;  %p5299_p9 = scmp.lt.u32.totalorder %s5292_s20, %s6963_s14 }
 0x1e2   : > { %p5295_p6 = pnand %p5293_p5, %p5921_p0 }
 0x1e4   : > { %p5296_p7 = pneg %p5295_p6 }
 0x1e6   : > { %p5301_p8 = pnand %p5299_p9, %p5296_p7 }
 0x1e8   : > { %5304 = shalt.err (!%p5301_p8)
}
 0x1e9   : > { %s5305_s26 = scalar_lea.vmem %s6204_s10, 2048  ;;  %p5313_p10 = scmp.lt.s32.totalorder %s6204_s10, %s6204_s10 }
 0x1ea   : > { %p5306_p11 = scmp.ne.s32.totalorder %s6204_s10, %s5305_s26  ;;  %p5314_p2 = scmp.lt.s32.totalorder %s5305_s26, %s5305_s26 }
 0x1ec   : > { %p5308_p13 = pnand %p5306_p11, %p5921_p0  ;;  %p5315_p3 = por %p5314_p2, %p5313_p10 }
 0x1ee   : > { %p5309_p1 = pneg %p5308_p13 }
 0x1f0   : > { %p5316_p4 = pnand %p5315_p3, %p5309_p1 }
 0x1f2   : > { %5319 = shalt.err (!%p5316_p4)
}
 0x1f3   : > { %s6964_s5 = smov 8   ;;  %s6965_s2 = smov 128  }
 0x1f4   : > { %4495 = dma.hbm_to_vmem [thread:$0]  (!%p5905_p12), %s6963_s14, 2048, %s6204_s10, [#allocation24], %s6965_s2, %s6965_s2, %s6964_s5  }
 0x1f5   : > { %s5692_s8 = smov [#allocation28]   ;;  %s5693_s30 = smov [#allocation31]  }
 0x1f6   : > { %s761_s20 = sshll.u32 %s5692_s8, 4  ;;  %s786_s1 = sshll.u32 %s5693_s30, 4  ;;  %s762_s20 = int_to_ptr.vmem [resolvable:$true] %s761_s20  ;;  %s6253_s1 = int_to_ptr.vmem [resolvable:$true] %s786_s1 }
 0x1f7   : > { %s6966_s16 = sld [smem:[#allocation81_spill]] }
 0x1fd   : > { %s5320_s26 = scalar_lea.hbm %s6966_s16, 1024 }
 0x1fe   : > { %p5321_p5 = scmp.ne.s32.totalorder %s6966_s16, %s5320_s26  ;;  %p5327_p9 = scmp.lt.u32.totalorder %s5320_s26, %s6966_s16 }
 0x200   : > { %p5323_p6 = pnand %p5321_p5, %p5921_p0 }
 0x202   : > { %p5324_p7 = pneg %p5323_p6 }
 0x204   : > { %p5329_p8 = pnand %p5327_p9, %p5324_p7 }
 0x206   : > { %5332 = shalt.err (!%p5329_p8)
}
 0x207   : > { %s5333_s5 = scalar_lea.vmem %s762_s20, 1024  ;;  %p5341_p10 = scmp.lt.s32.totalorder %s762_s20, %s762_s20 }
 0x208   : > { %p5334_p11 = scmp.ne.s32.totalorder %s762_s20, %s5333_s5  ;;  %p5342_p2 = scmp.lt.s32.totalorder %s5333_s5, %s5333_s5 }
 0x20a   : > { %p5336_p13 = pnand %p5334_p11, %p5921_p0  ;;  %p5343_p3 = por %p5342_p2, %p5341_p10 }
 0x20c   : > { %p5337_p1 = pneg %p5336_p13 }
 0x20e   : > { %p5344_p4 = pnand %p5343_p3, %p5337_p1 }
 0x210   : > { %5347 = shalt.err (!%p5344_p4)
}
 0x211   : > { %4501 = dma.hbm_to_vmem [thread:$0]  (!%p5905_p12), %s6966_s16, 1024, %s762_s20, [#allocation27], %s6960_s9, %s6960_s9, %s6959_s4  }
 0x212   : > { %s6967_s18 = sld [smem:[#allocation83_spill]] }
 0x218   : > { %s5348_s8 = scalar_lea.hbm %s6967_s18, 16 }
 0x219   : > { %p5349_p5 = scmp.ne.s32.totalorder %s6967_s18, %s5348_s8  ;;  %p5355_p9 = scmp.lt.u32.totalorder %s5348_s8, %s6967_s18 }
 0x21b   : > { %p5351_p6 = pnand %p5349_p5, %p5921_p0 }
 0x21d   : > { %p5352_p7 = pneg %p5351_p6 }
 0x21f   : > { %p5357_p8 = pnand %p5355_p9, %p5352_p7 }
 0x221   : > { %5360 = shalt.err (!%p5357_p8)
}
 0x222   : > { %s5361_s20 = scalar_lea.vmem %s6253_s1, 16  ;;  %s5368_s0 = scalar_lea.vmem %s6253_s1, 32 }
 0x223   : > { %p5362_p11 = scmp.ne.s32.totalorder %s6253_s1, %s5361_s20  ;;  %p5369_p10 = scmp.lt.s32.totalorder %s6253_s1, %s6253_s1 }
 0x224   : > { %p5370_p2 = scmp.lt.s32.totalorder %s5368_s0, %s5361_s20 }
 0x225   : > { %p5364_p13 = pnand %p5362_p11, %p5921_p0 }
 0x226   : > { %p5371_p3 = por %p5370_p2, %p5369_p10 }
 0x227   : > { %p5365_p1 = pneg %p5364_p13 }
 0x229   : > { %p5372_p4 = pnand %p5371_p3, %p5365_p1 }
 0x22b   : > { %5375 = shalt.err (!%p5372_p4)
}
 0x22c   : > { %4507 = dma.hbm_to_vmem [thread:$0]  (!%p5905_p12), %s6967_s18, 16, %s6253_s1, [#allocation30]  }
 0x22d   : > { %s5694_s12 = smov [#allocation34]   ;;  %s6968_s8 = sld [smem:[#allocation85_spill]] }
 0x22e   : > { %s807_s11 = sshll.u32 %s5694_s12, 4  ;;  %s808_s11 = int_to_ptr.vmem [resolvable:$true] %s807_s11 }
 0x233   : > { %s6969_s30 = smov %s6968_s8  ;;  %s5376_s3 = scalar_lea.hbm %s6968_s8, 4096 }
 0x234   : > { %p5377_p5 = scmp.ne.s32.totalorder %s6969_s30, %s5376_s3  ;;  %p5383_p9 = scmp.lt.u32.totalorder %s5376_s3, %s6969_s30 }
 0x236   : > { %p5379_p6 = pnand %p5377_p5, %p5921_p0 }
 0x238   : > { %p5380_p7 = pneg %p5379_p6 }
 0x23a   : > { %p5385_p8 = pnand %p5383_p9, %p5380_p7 }
 0x23c   : > { %5388 = shalt.err (!%p5385_p8)
}
 0x23d   : > { %s5389_s1 = scalar_lea.vmem %s808_s11, 4096  ;;  %p5397_p10 = scmp.lt.s32.totalorder %s808_s11, %s808_s11 }
 0x23e   : > { %p5390_p11 = scmp.ne.s32.totalorder %s808_s11, %s5389_s1  ;;  %p5398_p2 = scmp.lt.s32.totalorder %s5389_s1, %s5389_s1 }
 0x240   : > { %p5392_p13 = pnand %p5390_p11, %p5921_p0  ;;  %p5399_p3 = por %p5398_p2, %p5397_p10 }
 0x242   : > { %p5393_p1 = pneg %p5392_p13 }
 0x244   : > { %p5400_p4 = pnand %p5399_p3, %p5393_p1 }
 0x246   : > { %5403 = shalt.err (!%p5400_p4)
}
 0x247   : > { %s5695_s10 = smov 256   ;;  %s5696_s5 = smov 16  }
 0x248   : > { %4513 = dma.hbm_to_vmem [thread:$0]  (!%p5905_p12), %s6969_s30, 4096, %s808_s11, [#allocation33], %s5695_s10, %s5695_s10, %s5696_s5  }
 0x249   : > { %s5697_s28 = smov [#allocation37]   ;;  %s5698_s3 = smov [#allocation40]  }
 0x24a   : > { %s831_s8 = sshll.u32 %s5697_s28, 4  ;;  %s856_s29 = sshll.u32 %s5698_s3, 4  ;;  %s832_s8 = int_to_ptr.vmem [resolvable:$true] %s831_s8  ;;  %s857_s29 = int_to_ptr.vmem [resolvable:$true] %s856_s29 }
 0x24b   : > { %s5404_s0 = scalar_lea.hbm %s6872_s22, 4096 }
 0x24c   : > { %p5405_p5 = scmp.ne.s32.totalorder %s6872_s22, %s5404_s0  ;;  %p5411_p9 = scmp.lt.u32.totalorder %s5404_s0, %s6872_s22 }
 0x24e   : > { %p5407_p6 = pnand %p5405_p5, %p5921_p0 }
 0x250   : > { %p5408_p7 = pneg %p5407_p6 }
 0x252   : > { %p5413_p8 = pnand %p5411_p9, %p5408_p7 }
 0x254   : > { %5416 = shalt.err (!%p5413_p8)
}
 0x255   : > { %s5417_s11 = scalar_lea.vmem %s832_s8, 4096  ;;  %p5425_p10 = scmp.lt.s32.totalorder %s832_s8, %s832_s8 }
 0x256   : > { %p5418_p11 = scmp.ne.s32.totalorder %s832_s8, %s5417_s11  ;;  %p5426_p2 = scmp.lt.s32.totalorder %s5417_s11, %s5417_s11 }
 0x258   : > { %p5420_p13 = pnand %p5418_p11, %p5921_p0  ;;  %p5427_p3 = por %p5426_p2, %p5425_p10 }
 0x25a   : > { %p5421_p1 = pneg %p5420_p13 }
 0x25c   : > { %p5428_p4 = pnand %p5427_p3, %p5421_p1 }
 0x25e   : > { %5431 = shalt.err (!%p5428_p4)
}
 0x25f   : > { %4519 = dma.hbm_to_vmem [thread:$0]  (!%p5905_p12), %s6872_s22, 4096, %s832_s8, [#allocation36], %s6960_s9, %s6960_s9, %s6959_s4  }
 0x260   : > { %s5432_s5 = scalar_lea.hbm %s6874_s24, 16 }
 0x261   : > { %p5433_p5 = scmp.ne.s32.totalorder %s6874_s24, %s5432_s5  ;;  %p5439_p9 = scmp.lt.u32.totalorder %s5432_s5, %s6874_s24 }
 0x263   : > { %p5435_p6 = pnand %p5433_p5, %p5921_p0 }
 0x265   : > { %p5436_p7 = pneg %p5435_p6 }
 0x267   : > { %p5441_p8 = pnand %p5439_p9, %p5436_p7 }
 0x269   : > { %5444 = shalt.err (!%p5441_p8)
}
 0x26a   : > { %s5445_s26 = scalar_lea.vmem %s857_s29, 16  ;;  %s5452_s4 = scalar_lea.vmem %s857_s29, 32 }
 0x26b   : > { %p5446_p11 = scmp.ne.s32.totalorder %s857_s29, %s5445_s26  ;;  %p5453_p10 = scmp.lt.s32.totalorder %s857_s29, %s857_s29 }
 0x26c   : > { %p5454_p2 = scmp.lt.s32.totalorder %s5452_s4, %s5445_s26 }
 0x26d   : > { %p5448_p13 = pnand %p5446_p11, %p5921_p0 }
 0x26e   : > { %p5455_p3 = por %p5454_p2, %p5453_p10 }
 0x26f   : > { %p5449_p1 = pneg %p5448_p13 }
 0x271   : > { %p5456_p4 = pnand %p5455_p3, %p5449_p1 }
 0x273   : > { %5459 = shalt.err (!%p5456_p4)
}
 0x274   : > { %4525 = dma.hbm_to_vmem [thread:$0]  (!%p5905_p12), %s6874_s24, 16, %s857_s29, [#allocation39]  }
 0x275   : > { %s5699_s20 = smov [#allocation41]   ;;  %s5460_s13 = scalar_lea.hbm %s6875_s25, 16 }
 0x276   : > { %s867_s0 = sshll.u32 %s5699_s20, 4  ;;  %p5461_p5 = scmp.ne.s32.totalorder %s6875_s25, %s5460_s13  ;;  %s868_s0 = int_to_ptr.vmem [resolvable:$true] %s867_s0 }
 0x277   : > { %p5467_p9 = scmp.lt.u32.totalorder %s5460_s13, %s6875_s25 }
 0x278   : > { %p5463_p6 = pnand %p5461_p5, %p5921_p0 }
 0x27a   : > { %p5464_p7 = pneg %p5463_p6 }
 0x27c   : > { %p5469_p8 = pnand %p5467_p9, %p5464_p7 }
 0x27e   : > { %5472 = shalt.err (!%p5469_p8)
}
 0x27f   : > { %s5473_s29 = scalar_lea.vmem %s868_s0, 16  ;;  %s5480_s12 = scalar_lea.vmem %s868_s0, 32 }
 0x280   : > { %p5474_p11 = scmp.ne.s32.totalorder %s868_s0, %s5473_s29  ;;  %p5481_p10 = scmp.lt.s32.totalorder %s868_s0, %s868_s0 }
 0x281   : > { %p5482_p2 = scmp.lt.s32.totalorder %s5480_s12, %s5473_s29 }
 0x282   : > { %p5476_p13 = pnand %p5474_p11, %p5921_p0 }
 0x283   : > { %p5483_p3 = por %p5482_p2, %p5481_p10 }
 0x284   : > { %p5477_p1 = pneg %p5476_p13 }
 0x286   : > { %p5484_p4 = pnand %p5483_p3, %p5477_p1 }
 0x288   : > { %5487 = shalt.err (!%p5484_p4)
}
 0x289   : > { %s6970_s3 = sld [smem:[#allocation63_spill]]  ;;  %s6971_s26 = sld [smem:[#allocation62_spill]] }
 0x28a   : > { %s6972_s4 = sld [smem:[#allocation61_spill]]  ;;  %s6973_s6 = sld [smem:[#allocation60_spill]] }
 0x28b   : > { %s6974_s9 = sld [smem:[#allocation64_spill]] }
 0x28c   : > { %4528 = dma.hbm_to_vmem [thread:$0]  (!%p5905_p12), %s6875_s25, 16, %s868_s0, [#allocation42]  }
 0x28d   : > { %s6980_s28 = sld [smem:[#allocation67_spill]] }
 0x28f   : > { %s3866_s8 = sadd.s32 4294967294, %s6970_s3   ;;  %s6377_s29 = sadd.s32 1, %s6970_s3  }
 0x290   : > { %s66_s7 = ssub.s32 %s6970_s3, %s6377_s29  ;;  %s69_s20 = sadd.s32 1, %s6971_s26 }
 0x291   : > { %p67_p0 = scmp.eq.s32.totalorder %s66_s7, 0  ;;  %p76_p5 = scmp.ne.s32.totalorder %s6971_s26, %s6972_s4 }
 0x292   : > { %p77_p6 = scmp.eq.s32.totalorder %s6970_s3, 0  ;;  %p82_p7 = scmp.ne.s32.totalorder %s6972_s4, %s6973_s6 }
 0x293   : > { %s6388_s1 = scalar_select %p67_p0, %s6971_s26, %s69_s20  }
 0x294   : > { %p6390_p9 = por %p77_p6, %p76_p5  ;;  %p6976_p8 = scmp.eq.s32.totalorder %s6974_s9, 0 }
 0x295   : > { %p594_p11 = scmp.eq.s32.totalorder %s6974_s9, 1  ;;  %p600_p13 = scmp.eq.s32.totalorder %s3866_s8, 1 }
 0x296   : > { %p6396_p12 = por %p6976_p8, %p82_p7  ;;  %p4562_p1 = scmp.lt.s32.totalorder %s6970_s3, 2 }
 0x297   : > { %s878_s13 = sand.u32 1, %s6971_s26   ;;  %p6403_p10 = por %p594_p11, %p76_p5 }
 0x298   : > { %s6977_s0 = scalar_select %p6396_p12, 1, 0 }
 0x299   : > { %s6978_s14 = scalar_select %p6403_p10, 1, 0 }
 0x29a   : > { %p6407_p2 = por %p600_p13, %p82_p7  ;;  %s6411_s10 = sshll.u32 %s878_s13, 2 }
 0x29b   : > { %s3892_s5 = sshll.u32 %s6970_s3, 6  ;;  %s882_s26 = scalar_lea.vmem [#allocation5], %s6411_s10 }
 0x29c   : > { %s6979_s15 = scalar_select %p6407_p2, 1, 0 }
 0x29d   : > { %s6417_s4 = scalar_lea.hbm %s6980_s28, %s3892_s5  ;;  %s889_s6 = sshll.u32 %s882_s26, 4  ;;  %s6420_s6 = int_to_ptr.vmem [resolvable:$true] %s889_s6 }
 0x29e   : > { %p6424_p3 = pnand %p4562_p1, %p6390_p9  ;;  %s6982_s20 = sld [smem:[#allocation68_spill]] }
 0x29f   : > { %s896_s2 = sand.u32 1, %s6970_s3   ;;  %s879_s16 = scalar_lea.sflag [#allocation6], %s878_s13 }
 0x2a0   : > { %s5488_s17 = scalar_lea.hbm %s6417_s4, 64  ;;  %p5490_p0 = pneg %p6424_p3 }
 0x2a1   : > { %p5489_p4 = scmp.ne.s32.totalorder %s6417_s4, %s5488_s17  ;;  %s5493_s18 = scalar_lea.hbm %s6980_s28, 128 }
 0x2a2   : > { %p5494_p7 = scmp.lt.u32.totalorder %s6417_s4, %s6980_s28  ;;  %p5495_p9 = scmp.lt.u32.totalorder %s5493_s18, %s5488_s17 }
 0x2a3   : > { %p5491_p5 = pnand %p5490_p0, %p5489_p4  ;;  %p5497_p11 = scmp.lt.u32.totalorder %s5488_s17, %s6417_s4 }
 0x2a4   : > { %s6431_s12 = scalar_lea.hbm %s6982_s20, %s3892_s5  ;;  %p5496_p8 = por %p5495_p9, %p5494_p7 }
 0x2a5   : > { %p5492_p6 = pneg %p5491_p5 }
 0x2a6   : > { %p5498_p13 = por %p5497_p11, %p5496_p8 }
 0x2a8   : > { %p5499_p1 = pnand %p5498_p13, %p5492_p6 }
 0x2aa   : > { %5502 = shalt.err (!%p5499_p1)
}
 0x2ab   : > { %s5503_s13 = scalar_lea.vmem %s6420_s6, 64  ;;  %s5700_s5 = smov [#allocation5]  }
 0x2ac   : > { %p5504_p4 = scmp.ne.s32.totalorder %s6420_s6, %s5503_s13  ;;  %s5508_s7 = sshll.u32 %s5700_s5, 4  ;;  %s5509_s7 = int_to_ptr.vmem [resolvable:$false] %s5508_s7 }
 0x2ad   : > { %s5510_s19 = scalar_lea.vmem %s5509_s7, 128  ;;  %p5511_p10 = scmp.lt.s32.totalorder %s6420_s6, %s5509_s7 }
 0x2ae   : > { %p5506_p5 = pnand %p5504_p4, %p5490_p0  ;;  %p5512_p7 = scmp.lt.s32.totalorder %s5510_s19, %s5503_s13 }
 0x2b0   : > { %p5507_p2 = pneg %p5506_p5  ;;  %p5513_p9 = por %p5512_p7, %p5511_p10 }
 0x2b2   : > { %p5514_p8 = pnand %p5513_p9, %p5507_p2 }
 0x2b4   : > { %5517 = shalt.err (!%p5514_p8)
}
 0x2b5   : > { %4532 = dma.hbm_to_vmem [thread:$0]  (!%p6424_p3), %s6417_s4, 64, %s6420_s6, %s879_s16  }
 0x2b6   : > { %s900_s17 = scalar_lea.vmem [#allocation8], %s6411_s10  ;;  %s897_s11 = scalar_lea.sflag [#allocation9], %s896_s2 }
 0x2b7   : > { %s907_s18 = sshll.u32 %s900_s17, 4  ;;  %s5518_s26 = scalar_lea.hbm %s6431_s12, 64  ;;  %s908_s18 = int_to_ptr.vmem [resolvable:$true] %s907_s18 }
 0x2b8   : > { %p5519_p10 = scmp.ne.s32.totalorder %s6431_s12, %s5518_s26  ;;  %s5523_s5 = scalar_lea.hbm %s6982_s20, 128 }
 0x2b9   : > { %p5524_p11 = scmp.lt.u32.totalorder %s6431_s12, %s6982_s20  ;;  %p5525_p13 = scmp.lt.u32.totalorder %s5523_s5, %s5518_s26 }
 0x2ba   : > { %p5521_p2 = pnand %p5519_p10, %p5490_p0  ;;  %p5527_p4 = scmp.lt.u32.totalorder %s5518_s26, %s6431_s12 }
 0x2bb   : > { %p5526_p1 = por %p5525_p13, %p5524_p11 }
 0x2bc   : > { %p5522_p6 = pneg %p5521_p2 }
 0x2bd   : > { %p5528_p5 = por %p5527_p4, %p5526_p1 }
 0x2bf   : > { %p5529_p7 = pnand %p5528_p5, %p5522_p6 }
 0x2c1   : > { %5532 = shalt.err (!%p5529_p7)
}
 0x2c2   : > { %s5533_s16 = scalar_lea.vmem %s908_s18, 64  ;;  %s5701_s3 = smov [#allocation8]  }
 0x2c3   : > { %p5534_p9 = scmp.ne.s32.totalorder %s908_s18, %s5533_s16  ;;  %s5538_s10 = sshll.u32 %s5701_s3, 4  ;;  %s5539_s10 = int_to_ptr.vmem [resolvable:$false] %s5538_s10 }
 0x2c4   : > { %s5540_s4 = scalar_lea.vmem %s5539_s10, 128  ;;  %p5541_p2 = scmp.lt.s32.totalorder %s908_s18, %s5539_s10 }
 0x2c5   : > { %p5536_p8 = pnand %p5534_p9, %p5490_p0  ;;  %p5542_p12 = scmp.lt.s32.totalorder %s5540_s4, %s5533_s16 }
 0x2c7   : > { %p5537_p10 = pneg %p5536_p8  ;;  %p5543_p11 = por %p5542_p12, %p5541_p2 }
 0x2c9   : > { %p5544_p13 = pnand %p5543_p11, %p5537_p10 }
 0x2cb   : > { %5547 = shalt.err (!%p5544_p13)
}
 0x2cc   : > { %4535 = dma.hbm_to_vmem [thread:$0]  (!%p6424_p3), %s6431_s12, 64, %s908_s18, %s897_s11  }
 0x2cd   : > { %s6983_s6 = sld [smem:[#allocation65_spill]] }
 0x2d3   : > { %p6984_p6 = scmp.ne.s32.totalorder %s6983_s6, 0 }
 0x2d4   : > { %s6985_s2 = sld [smem:[#allocation61_spill]] (!%p6984_p6)  ;;  %p6986_p12 = scmp.ne.s32.totalorder (!%p6984_p6), %s6977_s0, 0 }
 0x2d5   : > { %916 = sbr.rel (%p6984_p6) target bundleno = 5062 (0x13c6), region = 116 }
 0x2da   : > { %s6484_s17 = sand.u32 (!%p6984_p6), 1, %s6985_s2  }
 0x2db   : > { %s6487_s26 = sshll.u32 (!%p6984_p6), %s6484_s17, 2  ;;  %s919_s8 = scalar_lea.sflag (!%p6984_p6), [#allocation6], %s6484_s17 }
 0x2dc   : > { %s922_s13 = scalar_lea.vmem [#allocation5], %s6487_s26 }
 0x2dd   : > { %5595 = dma.done.wait (%p6986_p12), %s919_s8, 64  }
 0x2de   : > { %5597 = vsyncadd (%p6986_p12), %s919_s8, 4294967232  ;;  %s6987_s9 = sld [smem:[#allocation64_spill]]  ;;  %s931_s11 = scalar_lea.vmem [#allocation8], %s6487_s26 }
 0x2e4   : > { %s927_s12 = sand.u32 1, %s6987_s9  }
 0x2e5   : > { %s928_s18 = scalar_lea.sflag [#allocation9], %s927_s12 }
 0x2e6   : > { %5599 = dma.done.wait (%p6986_p12), %s928_s18, 64  }
 0x2e7   : > { %5601 = vsyncadd (%p6986_p12), %s928_s18, 4294967232  ;;  %p6988_p3 = scmp.eq.s32.totalorder %s6987_s9, 0 }
 0x2e9   : > { %5603 = dma.done.wait (%p6988_p3), [#allocation9], 1024   ;;  %p6989_p0 = pmov %p6988_p3 }
 0x2eb   : > { %5605 = vsyncadd (%p6989_p0), [#allocation9], 4294966272  ;;  %p6990_p1 = pmov %p6989_p0 }
 0x2ec   : > { %p6991_p4 = pmov %p6989_p0 }
 0x2ed   : > { %5607 = dma.done.wait (%p6990_p1), [#allocation12], 2064  }
 0x2ee   : > { %5609 = vsyncadd (%p6991_p4), [#allocation12], 4294965232  ;;  %p6992_p5 = pmov %p6989_p0 }
 0x2ef   : > { %p6993_p7 = pmov %p6989_p0 }
 0x2f0   : > { %5611 = dma.done.wait (%p6992_p5), [#allocation15], 1056  }
 0x2f1   : > { %5613 = vsyncadd (%p6993_p7), [#allocation15], 4294966240  ;;  %p6994_p9 = pmov %p6989_p0 }
 0x2f2   : > { %p6995_p8 = pmov %p6989_p0 }
 0x2f3   : > { %5615 = dma.done.wait (%p6994_p9), [#allocation18], 32  }
 0x2f4   : > { %5617 = vsyncadd (%p6995_p8), [#allocation18], 4294967264  ;;  %p6996_p10 = pmov %p6989_p0 }
 0x2f5   : > { %p6997_p2 = pmov %p6989_p0 }
 0x2f6   : > { %5619 = dma.done.wait (%p6996_p10), [#allocation21], 1040  }
 0x2f7   : > { %5621 = vsyncadd (%p6997_p2), [#allocation21], 4294966256  ;;  %p6998_p11 = pmov %p6989_p0 }
 0x2f8   : > { %p6999_p13 = pmov %p6989_p0 }
 0x2f9   : > { %5623 = dma.done.wait (%p6998_p11), [#allocation24], 2064  }
 0x2fa   : > { %5625 = vsyncadd (%p6999_p13), [#allocation24], 4294965232  ;;  %p7000_p6 = pmov %p6989_p0 }
 0x2fb   : > { %p7001_p12 = pmov %p6989_p0 }
 0x2fc   : > { %5627 = dma.done.wait (%p7000_p6), [#allocation27], 1056  }
 0x2fd   : > { %5629 = vsyncadd (%p7001_p12), [#allocation27], 4294966240  ;;  %p7002_p3 = pmov %p6989_p0 }
 0x2ff   : > { %5631 = dma.done.wait (%p7002_p3), [#allocation30], 32  }
 0x300   : > { %5633 = vsyncadd (%p6989_p0), [#allocation30], 4294967264  ;;  %p7003_p1 = pmov %p6989_p0 }
 0x301   : > { %p7004_p4 = pmov %p6989_p0 }
 0x302   : > { %5635 = dma.done.wait (%p7003_p1), [#allocation33], 4112  }
 0x303   : > { %5637 = vsyncadd (%p7004_p4), [#allocation33], 4294963184  ;;  %p7005_p5 = pmov %p6989_p0 }
 0x304   : > { %p7006_p7 = pmov %p6989_p0 }
 0x305   : > { %5639 = dma.done.wait (%p7005_p5), [#allocation36], 4160  }
 0x306   : > { %5641 = vsyncadd (%p7006_p7), [#allocation36], 4294963136  ;;  %p7007_p9 = pmov %p6989_p0 }
 0x307   : > { %p7008_p8 = pmov %p6989_p0 }
 0x308   : > { %5643 = dma.done.wait (%p7007_p9), [#allocation39], 32  }
 0x309   : > { %5645 = vsyncadd (%p7008_p8), [#allocation39], 4294967264  ;;  %p7009_p10 = pmov %p6989_p0 }
 0x30a   : > { %p7010_p2 = pmov %p6989_p0 }
 0x30b   : > { %5647 = dma.done.wait (%p7009_p10), [#allocation42], 16  }
 0x30c   : > { %5649 = vsyncadd (%p7010_p2), [#allocation42], 4294967280  ;;  %v5702_v0 = vmov 0.0   ;;  %v5703_v1 = vmov 0   ;;  %vm5704_vm0 = vmmov 0   ;;  %v4657_v4 = vld [vmem:[#allocation10] sm:$0xff]   ;;  %v1241_v27 = vlaneseq }
 0x30d   : > { %4192 = vmatprep.subr.bf16.mxu0 %v5702_v0  ;;  %1363 = vmatprep.mubr.bf16.mxu1 %v5703_v1  ;;  %v4654_v2 = vld [vmem:[#allocation13 + $0x4] ss:$8 sps:$4 sm:$0xff]   ;;  %v4656_v3 = vld [vmem:[#allocation13] ss:$8 sps:$4 sm:$0xff]   ;;  %v4658_v5 = vld [vmem:[#allocation13 + $0x14] ss:$8 sps:$4 sm:$0xff]  }
 0x30e   : > { %4208 = vmatprep.mubr.msk.bf16.mxu0 %vm5704_vm0, %v5702_v0  ;;  %1331 = vmatprep.subr.bf16.mxu1 %v4654_v2  ;;  %v4660_v6 = vld [vmem:[#allocation13 + $0x10] ss:$8 sps:$4 sm:$0xff]   ;;  %v4661_v7 = vld [vmem:[#allocation10 + $0x8] sm:$0xff]   ;;  %v4666_v11 = vld [vmem:[#allocation13 + $0x34] ss:$8 sps:$4 sm:$0xff]   ;;  %v6573_v28 = vshrl.u32 %v1241_v27, 7 }
 0x30f   : > { %1332 = vmatpush1.bf16.msra.mxu1 %v4656_v3  ;;  %4193 = vmatpush3.bf16.msra.mxu0 %v4657_v4  ;;  %v4662_v8 = vld [vmem:[#allocation13 + $0x24] ss:$8 sps:$4 sm:$0xff]   ;;  %v4664_v9 = vld [vmem:[#allocation13 + $0x20] ss:$8 sps:$4 sm:$0xff]   ;;  %v4668_v12 = vld [vmem:[#allocation13 + $0x30] ss:$8 sps:$4 sm:$0xff]  }
 0x310   : > { %1333 = vmatprep.subr.bf16.mxu1 %v4658_v5  ;;  %4194 = vmatprep.subr.bf16.mxu0 %v5702_v0  ;;  %v4665_v10 = vld [vmem:[#allocation10 + $0x10] sm:$0xff]   ;;  %v4669_v13 = vld [vmem:[#allocation10 + $0x18] sm:$0xff]   ;;  %v4672_v15 = vld [vmem:[#allocation13 + $0x40] ss:$8 sps:$4 sm:$0xff]   ;;  %v6576_v29 = vsub.s32 0, %v6573_v28  ;;  %v6579_v31 = vsub.s32 1, %v6573_v28 }
 0x311   : > { %v4670_v14 = vld [vmem:[#allocation13 + $0x44] ss:$8 sps:$4 sm:$0xff]   ;;  %v4674_v17 = vld [vmem:[#allocation13 + $0x54] ss:$8 sps:$4 sm:$0xff]   ;;  %v4676_v18 = vld [vmem:[#allocation13 + $0x50] ss:$8 sps:$4 sm:$0xff]  }
 0x312   : > { %v4673_v16 = vld [vmem:[#allocation10 + $0x20] sm:$0xff]   ;;  %v4677_v19 = vld [vmem:[#allocation10 + $0x28] sm:$0xff]   ;;  %v4681_v22 = vld [vmem:[#allocation10 + $0x30] sm:$0xff]   ;;  %vm1414_vm1 = vcmask 261120   ;;  %s5705_s0 = smov 64   ;;  %s5706_s5 = smov 96  }
 0x313   : > { %1334 = vmatpush1.bf16.msra.mxu1 %v4660_v6  ;;  %4195 = vmatpush3.bf16.msra.mxu0 %v4661_v7  ;;  %v4678_v20 = vld [vmem:[#allocation13 + $0x64] ss:$8 sps:$4 sm:$0xff]   ;;  %v4680_v21 = vld [vmem:[#allocation13 + $0x60] ss:$8 sps:$4 sm:$0xff]   ;;  %v4682_v23 = vld [vmem:[#allocation13 + $0x74] ss:$8 sps:$4 sm:$0xff]  }
 0x314   : > { %1335 = vmatprep.subr.bf16.mxu1 %v4662_v8  ;;  %4196 = vmatprep.subr.bf16.mxu0 %v5702_v0  ;;  %v4684_v24 = vld [vmem:[#allocation13 + $0x70] ss:$8 sps:$4 sm:$0xff]   ;;  %v1127_v30 = vld [vmem:[#allocation14] sm:$0x3]  ;;  %v3921_v34 = vld [vmem:[#allocation11] ss:$0 sm:$0xff] }
 0x315   : > { %v4685_v25 = vld [vmem:[#allocation10 + $0x38] sm:$0xff]   ;;  %v6562_v26 = vld [vmem:[%s922_s13] sm:$0xf]  ;;  %v1244_v32 = vrot.slane %v1127_v30, %v6576_v29  ;;  %v1248_v33 = vrot.slane %v1127_v30, %v6579_v31  ;;  %vm1665_vm2 = vcmask 1043456   ;;  %s5707_s7 = smov 32   ;;  %s1093_s19 = sld [smem:[#allocation3 + %s6987_s9]] }
 0x316   : > { %v6617_v5 = vand.u32 127, %v1241_v27  ;;  %vm1613_vm6 = vcmask 64512   ;;  %vm1860_vm7 = vcmask 523264   ;;  %vm1862_vm8 = vcmask 785408   ;;  %s1988_s16 = sld [smem:[#allocation4 + %s6987_s9]]  ;;  %s4077_s3 = sshll.u32 %s6987_s9, 6 }
 0x317   : > { %1336 = vmatpush1.bf16.msra.mxu1 %v4664_v9  ;;  %4197 = vmatpush3.bf16.msra.mxu0 %v4665_v10  ;;  %s1088_s10 = scalar_lea.vmem [#allocation43], %s6487_s26  ;;  %s7015_s8 = sld [smem:[#allocation86_spill]] }
 0x318   : > { %1337 = vmatprep.subr.bf16.mxu1 %v4666_v11  ;;  %4198 = vmatprep.subr.bf16.mxu0 %v5702_v0  ;;  %vm1605_vm4 = vcmp.ge.s32.totalorder %v6573_v28, %v6617_v5  ;;  %s3564_s4 = sshll.u32 %s1088_s10, 4  ;;  %s3551_s18 = scalar_lea.sflag [#allocation7], %s6484_s17  ;;  %s6809_s4 = int_to_ptr.vmem [resolvable:$true] %s3564_s4 }
 0x319   : > { %p7017_p13 = scmp.ne.s32.totalorder %s6978_s14, 0  ;;  %s5708_s26 = smov [#allocation43]  }
 0x31a   : > { %s5552_s9 = sshll.u32 %s5708_s26, 4  ;;  %s5553_s9 = int_to_ptr.vmem [resolvable:$false] %s5552_s9 }
 0x31b   : > { %1338 = vmatpush1.bf16.msra.mxu1 %v4668_v12  ;;  %4199 = vmatpush3.bf16.msra.mxu0 %v4669_v13  ;;  %v1601_v6 = vstv %s1093_s19  ;;  %p5555_p3 = scmp.lt.s32.totalorder %s6809_s4, %s5553_s9 }
 0x31c   : > { %1339 = vmatprep.subr.bf16.mxu1 %v4670_v14  ;;  %4200 = vmatprep.subr.bf16.mxu0 %v5702_v0  ;;  %vm1602_vm3 = vcmp.lt.s32.totalorder %v6617_v5, %v1601_v6 }
 0x31d   : > { %vm6622_vm5 = vmand %vm1602_vm3, %vm1605_vm4  ;;  %s7016_s13 = smov %s7015_s8  ;;  %s6807_s12 = scalar_lea.hbm %s7015_s8, %s4077_s3 }
 0x31f   : > { %1340 = vmatpush1.bf16.msra.mxu1 %v4672_v15  ;;  %4201 = vmatpush3.bf16.msra.mxu0 %v4673_v16 }
 0x320   : > { %1341 = vmatprep.subr.bf16.mxu1 %v4674_v17  ;;  %4202 = vmatprep.subr.bf16.mxu0 %v5702_v0 }
 0x323   : > { %1342 = vmatpush1.bf16.msra.mxu1 %v4676_v18  ;;  %4203 = vmatpush3.bf16.msra.mxu0 %v4677_v19 }
 0x324   : > { %1343 = vmatprep.subr.bf16.mxu1 %v4678_v20  ;;  %4204 = vmatprep.subr.bf16.mxu0 %v5702_v0 }
 0x327   : > { %1344 = vmatpush1.bf16.msra.mxu1 %v4680_v21  ;;  %4205 = vmatpush3.bf16.msra.mxu0 %v4681_v22 }
 0x328   : > { %1345 = vmatprep.subr.bf16.mxu1 %v4682_v23  ;;  %4206 = vmatprep.subr.bf16.mxu0 %v5702_v0 }
 0x32b   : > { %1346 = vmatpush1.bf16.msra.mxu1 %v4684_v24  ;;  %4207 = vmatpush3.bf16.msra.mxu0 %v4685_v25 }
 0x32c   : > { %4212 = vmatprep.subr.bf16.mxu1 %v5702_v0  ;;  %4236 = vmatprep.subr.bf16.mxu0 %v5702_v0 }
 0x32e   : > { %1364 = vmatmul.mubr.bf16.vlgmr.msra.gmra.mrb[0].mxu1 %v6562_v26  ;;  %4209 = vmatmul.mubr.bf16.vlgmr.msra.gmra.mrb[0].mxu0 %v6562_v26 }
 0x32f   : > { %4214 = vmatprep.mubr.msk.bf16.mxu1 %vm5704_vm0, %v5702_v0  ;;  %4238 = vmatprep.mubr.msk.bf16.mxu0 %vm5704_vm0, %v5702_v0 }
 0x401   : > { %v1365_v35 = vpop.f32.mrb[0].mxu1  ;;  %v1233_v38 = vpop.f32.mrb[0].mxu0 }
 0x402   : > { %v1366_v36 = vadd.f32 %v1365_v35, %v1244_v32  ;;  %v1367_v37 = vpop.f32.mrb[1].mxu1  ;;  %v1234_v40 = vadd.f32 %v3921_v34, %v1233_v38  ;;  %v4210_v42 = vpop.f32.mrb[1].mxu0 }
 0x403   : > { %v6583_v39 = vadd.f32 %v1367_v37, %v1248_v33  ;;  %v1369_v41 = vpop.f32.mrb[2].mxu1  ;;  %v1236_v44 = vpop.f32.mrb[2].mxu0 }
 0x404   : > { %v1370_v43 = vpop.f32.mrb[3].mxu1  ;;  %1390 = vrot.lane.b32.xlu1 %v1366_v36, %s5705_s0  ;;  %1387 = vrot.lane.b32.xlu0 %v1366_v36, %s5706_s5  ;;  %v1396_v45 = vpack.c.bf16 %v1366_v36, %v1366_v36  ;;  %v1239_v46 = vmul.f32 0.17677669, %v1234_v40  ;;  %v4211_v47 = vpop.f32.mrb[3].mxu0 }
 0x405   : > { %v1410_v48 = vpack.c.bf16 %v6583_v39, %v6583_v39 }
 0x406   : > { %v1419_v49 = vsel %vm1414_vm1, %v1396_v45, 0  ;;  %v1382_v51 = vpack.c.bf16 %v1239_v46, %v1239_v46 }
 0x407   : > { %4213 = vmatpush3.bf16.xpose.msra.mxu1 %v1419_v49  ;;  %v1667_v50 = vsel %vm1665_vm2, %v1410_v48, 0 }
 0x408   : > { %4237 = vmatpush3.bf16.msra.mxu0 %v1667_v50  ;;  %1376 = vrot.lane.b32.xlu1 %v1239_v46, %s5705_s0 }
 0x409   : > { %1373 = vrot.lane.b32.xlu0 %v1239_v46, %s5706_s5  ;;  %4218 = vmatprep.subr.bf16.mxu1 %v5702_v0 }
 0x40a   : > { %4248 = vmatprep.subr.bf16.mxu0 %v5702_v0 }
 0x40c   : > { %1379 = vrot.lane.b32.xlu1 %v1239_v46, %s5707_s7 }
 0x40d   : > { %1393 = vrot.lane.b32.xlu0 %v1366_v36, %s5707_s7 }
 0x40e   : > { %4215 = vmatmul.mubr.msk.bf16.vlgmr.msra.gmra.mrb[4].mxu1 %vm1414_vm1, %v1382_v51 }
 0x40f   : > { %4220 = vmatprep.mubr.msk.bf16.mxu1 %vm5704_vm0, %v5702_v0 }
 0x476   : > { %v1388_v52 = vpop.permute.xlu0 %1387  ;;  %v1391_v55 = vpop.permute.xlu1 %1390 }
 0x477   : > { %v1397_v53 = vpack.c.bf16 %v1388_v52, %v1388_v52  ;;  %v1398_v57 = vpack.c.bf16 %v1391_v55, %v1391_v55 }
 0x479   : > { %v1465_v54 = vsel %vm1414_vm1, %v1397_v53, 0  ;;  %v1511_v59 = vsel %vm1414_vm1, %v1398_v57, 0 }
 0x47a   : > { %4219 = vmatpush3.bf16.xpose.msra.mxu1 %v1465_v54  ;;  %v1377_v62 = vpop.permute.xlu1 %1376 }
 0x47b   : > { %4224 = vmatprep.subr.bf16.mxu1 %v5702_v0  ;;  %v1374_v56 = vpop.permute.xlu0 %1373  ;;  %v1384_v63 = vpack.c.bf16 %v1377_v62, %v1377_v62 }
 0x47c   : > { %v1383_v58 = vpack.c.bf16 %v1374_v56, %v1374_v56 }
 0x47e   : > { %v1380_v3 = vpop.permute.xlu1 %1379 }
 0x47f   : > { %v1394_v60 = vpop.permute.xlu0 %1393  ;;  %v1385_v4 = vpack.c.bf16 %v1380_v3, %v1380_v3 }
 0x480   : > { %v1399_v61 = vpack.c.bf16 %v1394_v60, %v1394_v60 }
 0x481   : > { %4221 = vmatmul.mubr.msk.bf16.vlgmr.msra.gmra.mrb[8].mxu1 %vm1414_vm1, %v1383_v58 }
 0x482   : > { %4225 = vmatpush3.bf16.xpose.msra.mxu1 %v1511_v59  ;;  %4226 = vmatprep.mubr.msk.bf16.mxu1 %vm5704_vm0, %v5702_v0  ;;  %v1557_v2 = vsel %vm1414_vm1, %v1399_v61, 0 }
 0x483   : > { %4230 = vmatprep.subr.bf16.mxu1 %v5702_v0 }
 0x489   : > { %4227 = vmatmul.mubr.msk.bf16.vlgmr.msra.gmra.mrb[12].mxu1 %vm1414_vm1, %v1384_v63 }
 0x48a   : > { %4231 = vmatpush3.bf16.xpose.msra.mxu1 %v1557_v2  ;;  %4232 = vmatprep.mubr.msk.bf16.mxu1 %vm5704_vm0, %v5702_v0 }
 0x48b   : > { %4242 = vmatprep.subr.bf16.mxu1 %v5702_v0 }
 0x491   : > { %4233 = vmatmul.mubr.msk.bf16.vlgmr.msra.gmra.mrb[16].mxu1 %vm1414_vm1, %v1385_v4 }
 0x492   : > { %4244 = vmatprep.mubr.msk.bf16.mxu1 %vm5704_vm0, %v5702_v0 }
 0x4e1   : > { %v1455_v8 = vpop.f32.mrb[4].mxu1 }
 0x4e2   : > { %v1609_v9 = vsel %vm6622_vm5, %v1455_v8, -1e+09  ;;  %v4216_v10 = vpop.f32.mrb[5].mxu1 }
 0x4e3   : > { %v1458_v11 = vpop.f32.mrb[6].mxu1  ;;  %v1614_v12 = vsel %vm1613_vm6, %v1609_v9, -inf }
 0x4e4   : > { %1615 = vmax.xlane.f32.xlu0 %v1614_v12  ;;  %v4217_v13 = vpop.f32.mrb[7].mxu1 }
 0x554   : > { %v1501_v14 = vpop.f32.mrb[8].mxu1 }
 0x555   : > { %v1610_v15 = vsel %vm6622_vm5, %v1501_v14, -1e+09  ;;  %v4222_v16 = vpop.f32.mrb[9].mxu1 }
 0x556   : > { %v1504_v17 = vpop.f32.mrb[10].mxu1  ;;  %v1617_v18 = vsel %vm1613_vm6, %v1610_v15, -inf }
 0x557   : > { %1618 = vmax.xlane.f32.xlu1 %v1617_v18  ;;  %v4223_v19 = vpop.f32.mrb[11].mxu1 }
 0x55c   : > { %v1547_v20 = vpop.f32.mrb[12].mxu1 }
 0x55d   : > { %v1611_v21 = vsel %vm6622_vm5, %v1547_v20, -1e+09  ;;  %v4228_v22 = vpop.f32.mrb[13].mxu1  ;;  %v4686_v20 = vld [vmem:[#allocation16] sm:$0xff]  }
 0x55e   : > { %v1550_v23 = vpop.f32.mrb[14].mxu1  ;;  %v1620_v24 = vsel %vm1613_vm6, %v1611_v21, -inf }
 0x55f   : > { %1621 = vmax.xlane.f32.xlu0 %v1620_v24  ;;  %v4229_v25 = vpop.f32.mrb[15].mxu1 }
 0x560   : > { %v4688_v25 = vld [vmem:[#allocation16 + $0x10] sm:$0xff]  }
 0x564   : > { %v1593_v27 = vpop.f32.mrb[16].mxu1 }
 0x565   : > { %v1612_v30 = vsel %vm6622_vm5, %v1593_v27, -1e+09  ;;  %v4234_v32 = vpop.f32.mrb[17].mxu1 }
 0x566   : > { %v1596_v33 = vpop.f32.mrb[18].mxu1  ;;  %v1623_v34 = vsel %vm1613_vm6, %v1612_v30, -inf  ;;  %v4690_v32 = vld [vmem:[#allocation16 + $0x20] sm:$0xff]  }
 0x567   : > { %1624 = vmax.xlane.f32.xlu0 %v1623_v34  ;;  %v4235_v35 = vpop.f32.mrb[19].mxu1  ;;  %v4691_v33 = vld [vmem:[#allocation16 + $0x28] sm:$0xff]   ;;  %v4692_v34 = vld [vmem:[#allocation16 + $0x30] sm:$0xff]  }
 0x568   : > { %1401 = vrot.lane.b32.xlu1 %v6583_v39, %s5706_s5 }
 0x571   : > { %v1616_v36 = vpop.xlane.xlu0 %1615 }
 0x572   : > { %v1626_v37 = vsub.f32 %v1609_v9, %v1616_v36 }
 0x574   : > { %v1630_v38 = vmul.f32 1.442695, %v1626_v37 }
 0x576   : > { %4814 = vpow2.f32 %v1630_v38 }
 0x580   : > { %v4815_v40 = vpop.eup %4814 }
 0x581   : > { %v1638_v41 = vsel %vm1613_vm6, %v4815_v40, 0.0 }
 0x58c   : > { %1639 = vadd.xlane.f32.xlu1 %v1638_v41 }
 0x5e4   : > { %v1619_v42 = vpop.xlane.xlu1 %1618 }
 0x5e5   : > { %v1627_v43 = vsub.f32 %v1610_v15, %v1619_v42 }
 0x5e7   : > { %v1632_v44 = vmul.f32 1.442695, %v1627_v43 }
 0x5e8   : > { %v1402_v45 = vpop.permute.xlu1 %1401 }
 0x5e9   : > { %4816 = vpow2.f32 %v1632_v44  ;;  %v1411_v46 = vpack.c.bf16 %v1402_v45, %v1402_v45 }
 0x5eb   : > { %v1713_v47 = vsel %vm1665_vm2, %v1411_v46, 0 }
 0x5ec   : > { %4243 = vmatpush3.bf16.msra.mxu1 %v1713_v47  ;;  %v1622_v48 = vpop.xlane.xlu0 %1621 }
 0x5ed   : > { %v1628_v49 = vsub.f32 %v1611_v21, %v1622_v48  ;;  %4254 = vmatprep.subr.bf16.mxu1 %v5702_v0  ;;  %v4687_v21 = vld [vmem:[#allocation16 + $0x8] sm:$0xff]  }
 0x5ef   : > { %v1634_v50 = vmul.f32 1.442695, %v1628_v49 }
 0x5f1   : > { %4818 = vpow2.f32 %v1634_v50 }
 0x5f3   : > { %v4817_v51 = vpop.eup %4816 }
 0x5f4   : > { %v1625_v52 = vpop.xlane.xlu0 %1624  ;;  %v1641_v53 = vsel %vm1613_vm6, %v4817_v51, 0.0 }
 0x5f5   : > { %v1629_v54 = vsub.f32 %v1612_v30, %v1625_v52  ;;  %1642 = vadd.xlane.f32.xlu0 %v1641_v53  ;;  %v4689_v30 = vld [vmem:[#allocation16 + $0x18] sm:$0xff]  }
 0x5f7   : > { %v1636_v55 = vmul.f32 1.442695, %v1629_v54 }
 0x5f9   : > { %4820 = vpow2.f32 %v1636_v55 }
 0x5fb   : > { %v4819_v56 = vpop.eup %4818 }
 0x5fc   : > { %v1644_v57 = vsel %vm1613_vm6, %v4819_v56, 0.0 }
 0x5fd   : > { %1645 = vadd.xlane.f32.xlu1 %v1644_v57  ;;  %v1091_v57 = vunpack.c.l.bf16 %v6562_v26  ;;  %v4700_v26 = vld [vmem:[#allocation25 + $0x20] ss:$8 sps:$4 sm:$0xff]  }
 0x603   : > { %v4821_v58 = vpop.eup %4820 }
 0x604   : > { %v1647_v59 = vsel %vm1613_vm6, %v4821_v58, 0.0 }
 0x605   : > { %1648 = vadd.xlane.f32.xlu0 %v1647_v59 }
 0x60e   : > { %1407 = vrot.lane.b32.xlu1 %v6583_v39, %s5707_s7 }
 0x619   : > { %v1640_v60 = vpop.xlane.xlu1 %1639 }
 0x61a   : > { %4822 = vrcp.f32 %v1640_v60 }
 0x61b   : > { %1404 = vrot.lane.b32.xlu0 %v6583_v39, %s5705_s0 }
 0x624   : > { %v4823_v61 = vpop.eup %4822 }
 0x625   : > { %v1654_v62 = vmul.f32 %v4823_v61, %v4815_v40  ;;  %v4693_v40 = vld [vmem:[#allocation16 + $0x38] sm:$0xff]  }
 0x627   : > { %v1658_v63 = vpack.c.bf16 %v1654_v62, %v1654_v62 }
 0x629   : > { %4239 = vmatmul.mubr.msk.bf16.vlgmr.msra.gmra.mrb[4].mxu0 %vm1613_vm6, %v1658_v63 }
 0x62a   : > { %4250 = vmatprep.mubr.msk.bf16.mxu0 %vm5704_vm0, %v5702_v0 }
 0x682   : > { %v1643_v2 = vpop.xlane.xlu0 %1642 }
 0x683   : > { %4824 = vrcp.f32 %v1643_v2  ;;  %v4694_v2 = vld [vmem:[#allocation25] ss:$8 sps:$4 sm:$0xff]  }
 0x68a   : > { %v1646_v3 = vpop.xlane.xlu1 %1645 }
 0x68b   : > { %4826 = vrcp.f32 %v1646_v3  ;;  %v4696_v3 = vld [vmem:[#allocation25 + $0x4] ss:$8 sps:$4 sm:$0xff]  }
 0x68d   : > { %v4825_v4 = vpop.eup %4824 }
 0x68e   : > { %v1655_v6 = vmul.f32 %v4825_v4, %v4817_v51  ;;  %v1408_v7 = vpop.permute.xlu1 %1407  ;;  %v4699_v4 = vld [vmem:[#allocation25 + $0x14] ss:$8 sps:$4 sm:$0xff]  }
 0x68f   : > { %v1413_v8 = vpack.c.bf16 %v1408_v7, %v1408_v7  ;;  %v4697_v7 = vld [vmem:[#allocation25 + $0x10] ss:$8 sps:$4 sm:$0xff]  }
 0x690   : > { %v1659_v9 = vpack.c.bf16 %v1655_v6, %v1655_v6  ;;  %v4706_v6 = vld [vmem:[#allocation22] sm:$0xff]  }
 0x691   : > { %v1805_v10 = vsel %vm1665_vm2, %v1413_v8, 0  ;;  %v4702_v8 = vld [vmem:[#allocation25 + $0x24] ss:$8 sps:$4 sm:$0xff]  }
 0x692   : > { %4245 = vmatmul.mubr.msk.bf16.vlgmr.msra.gmra.mrb[20].mxu1 %vm1613_vm6, %v1659_v9  ;;  %v1649_v39 = vpop.xlane.xlu0 %1648  ;;  %v4710_v9 = vld [vmem:[#allocation22 + $0x8] sm:$0xff]  }
 0x693   : > { %4255 = vmatpush3.bf16.msra.mxu1 %v1805_v10  ;;  %4828 = vrcp.f32 %v1649_v39  ;;  %4256 = vmatprep.mubr.msk.bf16.mxu1 %vm5704_vm0, %v5702_v0  ;;  %v4705_v10 = vld [vmem:[#allocation25 + $0x34] ss:$8 sps:$4 sm:$0xff]   ;;  %v4703_v39 = vld [vmem:[#allocation25 + $0x30] ss:$8 sps:$4 sm:$0xff]  }
 0x694   : > { %4280 = vmatprep.subr.bf16.mxu1 %v5702_v0 }
 0x695   : > { %v4827_v11 = vpop.eup %4826 }
 0x696   : > { %v1405_v12 = vpop.permute.xlu0 %1404  ;;  %v1656_v13 = vmul.f32 %v4827_v11, %v4819_v56  ;;  %v3954_v56 = vld [vmem:[#allocation17] ss:$0 sm:$0xff]  ;;  %v4709_v11 = vld [vmem:[#allocation25 + $0x44] ss:$8 sps:$4 sm:$0xff]  }
 0x697   : > { %v1412_v14 = vpack.c.bf16 %v1405_v12, %v1405_v12  ;;  %v4707_v12 = vld [vmem:[#allocation25 + $0x40] ss:$8 sps:$4 sm:$0xff]  }
 0x698   : > { %v1660_v16 = vpack.c.bf16 %v1656_v13, %v1656_v13  ;;  %v4713_v13 = vld [vmem:[#allocation25 + $0x54] ss:$8 sps:$4 sm:$0xff]  }
 0x699   : > { %v1759_v15 = vsel %vm1665_vm2, %v1412_v14, 0  ;;  %v4711_v14 = vld [vmem:[#allocation25 + $0x50] ss:$8 sps:$4 sm:$0xff]  }
 0x69a   : > { %4249 = vmatpush3.bf16.msra.mxu0 %v1759_v15 }
 0x69b   : > { %4260 = vmatprep.subr.bf16.mxu0 %v5702_v0 }
 0x69d   : > { %v4829_v17 = vpop.eup %4828  ;;  %4251 = vmatmul.mubr.msk.bf16.vlgmr.msra.gmra.mrb[8].mxu0 %vm1613_vm6, %v1660_v16 }
 0x69e   : > { %v1657_v18 = vmul.f32 %v4829_v17, %v4821_v58  ;;  %4276 = vmatprep.mubr.msk.bf16.mxu0 %vm5704_vm0, %v5702_v0  ;;  %4261 = vmatpush3.bf16.msra.mxu0 %v4686_v20  ;;  %v4717_v20 = vld [vmem:[#allocation25 + $0x64] ss:$8 sps:$4 sm:$0xff]  }
 0x69f   : > { %4262 = vmatprep.subr.bf16.mxu0 %v5702_v0 }
 0x6a0   : > { %v1661_v19 = vpack.c.bf16 %v1657_v18, %v1657_v18 }
 0x6a2   : > { %4257 = vmatmul.mubr.msk.bf16.vlgmr.msra.gmra.mrb[24].mxu1 %vm1613_vm6, %v1661_v19  ;;  %4263 = vmatpush3.bf16.msra.mxu0 %v4687_v21  ;;  %v4714_v19 = vld [vmem:[#allocation22 + $0x10] sm:$0xff]   ;;  %v4715_v21 = vld [vmem:[#allocation25 + $0x60] ss:$8 sps:$4 sm:$0xff]  }
 0x6a3   : > { %4296 = vmatprep.mubr.msk.bf16.mxu1 %vm5704_vm0, %v5702_v0  ;;  %4264 = vmatprep.subr.bf16.mxu0 %v5702_v0 }
 0x6a4   : > { %4281 = vmatpush3.bf16.msra.mxu1 %v4706_v6 }
 0x6a5   : > { %4282 = vmatprep.subr.bf16.mxu1 %v5702_v0 }
 0x6a6   : > { %4265 = vmatpush3.bf16.msra.mxu0 %v4688_v25  ;;  %v4722_v25 = vld [vmem:[#allocation22 + $0x20] sm:$0xff]  }
 0x6a7   : > { %4266 = vmatprep.subr.bf16.mxu0 %v5702_v0 }
 0x6a8   : > { %4283 = vmatpush3.bf16.msra.mxu1 %v4710_v9 }
 0x6a9   : > { %4284 = vmatprep.subr.bf16.mxu1 %v5702_v0 }
 0x6aa   : > { %4267 = vmatpush3.bf16.msra.mxu0 %v4689_v30  ;;  %v4723_v30 = vld [vmem:[#allocation22 + $0x28] sm:$0xff]  }
 0x6ab   : > { %4268 = vmatprep.subr.bf16.mxu0 %v5702_v0 }
 0x6ac   : > { %4285 = vmatpush3.bf16.msra.mxu1 %v4714_v19 }
 0x6ad   : > { %4286 = vmatprep.subr.bf16.mxu1 %v5702_v0 }
 0x6ae   : > { %4269 = vmatpush3.bf16.msra.mxu0 %v4690_v32  ;;  %v4724_v32 = vld [vmem:[#allocation22 + $0x30] sm:$0xff]  }
 0x6af   : > { %4270 = vmatprep.subr.bf16.mxu0 %v5702_v0 }
 0x6b2   : > { %4271 = vmatpush3.bf16.msra.mxu0 %v4691_v33  ;;  %v4725_v33 = vld [vmem:[#allocation22 + $0x38] sm:$0xff]  }
 0x6b3   : > { %4272 = vmatprep.subr.bf16.mxu0 %v5702_v0 }
 0x6b6   : > { %4273 = vmatpush3.bf16.msra.mxu0 %v4692_v34 }
 0x6b7   : > { %4274 = vmatprep.subr.bf16.mxu0 %v5702_v0 }
 0x6ba   : > { %4275 = vmatpush3.bf16.msra.mxu0 %v4693_v40 }
 0x6bb   : > { %2227 = vmatprep.subr.bf16.mxu0 %v4696_v3 }
 0x6fc   : > { %v1703_v22 = vpop.f32.mrb[4].mxu0 }
 0x6fd   : > { %v4240_v23 = vpop.f32.mrb[5].mxu0 }
 0x6fe   : > { %v1706_v24 = vpop.f32.mrb[6].mxu0  ;;  %v4721_v23 = vld [vmem:[#allocation25 + $0x74] ss:$8 sps:$4 sm:$0xff]  }
 0x6ff   : > { %v4241_v27 = vpop.f32.mrb[7].mxu0  ;;  %v4719_v24 = vld [vmem:[#allocation25 + $0x70] ss:$8 sps:$4 sm:$0xff]  }
 0x700   : > { %v1092_v27 = vld [vmem:[%s931_s11] sm:$0xf]  ;;  %s5548_s11 = scalar_lea.vmem %s6809_s4, 64 }
 0x701   : > { %p5549_p11 = scmp.ne.s32.totalorder %s6809_s4, %s5548_s11 }
 0x703   : > { %p5550_p6 = pnand %p5549_p11, %p7017_p13 }
 0x705   : > { %p5551_p12 = pneg %p5550_p6 }
 0x765   : > { %v1749_v35 = vpop.f32.mrb[20].mxu1 }
 0x766   : > { %1848 = vrot.lane.b32.xlu1 %v1749_v35, %s5707_s7  ;;  %v4246_v36 = vpop.f32.mrb[21].mxu1 }
 0x767   : > { %v1752_v37 = vpop.f32.mrb[22].mxu1 }
 0x768   : > { %v4247_v38 = vpop.f32.mrb[23].mxu1 }
 0x769   : > { %v3963_v38 = vld [vmem:[#allocation19] ss:$0 sm:$0xff] }
 0x770   : > { %v1795_v41 = vpop.f32.mrb[8].mxu0 }
 0x771   : > { %1852 = vrot.lane.b32.xlu0 %v1795_v41, %s5705_s0  ;;  %v4252_v42 = vpop.f32.mrb[9].mxu0  ;;  %v3964_v41 = vld [vmem:[#allocation20] ss:$0 sm:$0xff] }
 0x772   : > { %v1798_v43 = vpop.f32.mrb[10].mxu0 }
 0x773   : > { %v4253_v44 = vpop.f32.mrb[11].mxu0 }
 0x775   : > { %v1841_v45 = vpop.f32.mrb[24].mxu1 }
 0x776   : > { %1856 = vrot.lane.b32.xlu1 %v1841_v45, %s5706_s5  ;;  %v4258_v46 = vpop.f32.mrb[25].mxu1  ;;  %v2022_v45 = vld [vmem:[#allocation26] sm:$0x3] }
 0x777   : > { %v1844_v47 = vpop.f32.mrb[26].mxu1  ;;  %v2140_v46 = vrot.slane %v2022_v45, %v6576_v29 }
 0x778   : > { %v4259_v48 = vpop.f32.mrb[27].mxu1 }
 0x7d8   : > { %v1849_v49 = vpop.permute.xlu1 %1848 }
 0x7d9   : > { %v1859_v51 = vsel %vm1414_vm1, %v1703_v22, %v1849_v49  ;;  %v4718_v22 = vld [vmem:[#allocation22 + $0x18] sm:$0xff]  }
 0x7da   : > { %4287 = vmatpush3.bf16.msra.mxu1 %v4718_v22 }
 0x7db   : > { %4288 = vmatprep.subr.bf16.mxu1 %v5702_v0 }
 0x7de   : > { %4289 = vmatpush3.bf16.msra.mxu1 %v4722_v25 }
 0x7df   : > { %4290 = vmatprep.subr.bf16.mxu1 %v5702_v0 }
 0x7e2   : > { %4291 = vmatpush3.bf16.msra.mxu1 %v4723_v30 }
 0x7e3   : > { %v1853_v50 = vpop.permute.xlu0 %1852  ;;  %4292 = vmatprep.subr.bf16.mxu1 %v5702_v0 }
 0x7e4   : > { %v1861_v52 = vsel %vm1860_vm7, %v1859_v51, %v1853_v50  ;;  %v2144_v51 = vrot.slane %v2022_v45, %v6579_v31 }
 0x7e6   : > { %4293 = vmatpush3.bf16.msra.mxu1 %v4724_v32 }
 0x7e7   : > { %4294 = vmatprep.subr.bf16.mxu1 %v5702_v0 }
 0x7e8   : > { %v1857_v53 = vpop.permute.xlu1 %1856 }
 0x7e9   : > { %v1863_v54 = vsel %vm1862_vm8, %v1861_v52, %v1857_v53 }
 0x7ea   : > { %v1864_v55 = vpack.c.bf16 %v1863_v54, %v1863_v54  ;;  %4295 = vmatpush3.bf16.msra.mxu1 %v4725_v33 }
 0x7eb   : > { %4300 = vmatprep.subr.bf16.mxu1 %v5702_v0 }
 0x7ec   : > { %4277 = vmatmul.mubr.bf16.vlgmr.msra.gmra.mrb[12].mxu0 %v1864_v55 }
 0x7ed   : > { %2259 = vmatprep.mubr.bf16.mxu0 %v5703_v1  ;;  %2228 = vmatpush1.bf16.msra.mxu0 %v4694_v2 }
 0x7ee   : > { %2229 = vmatprep.subr.bf16.mxu0 %v4699_v4 }
 0x7f1   : > { %2230 = vmatpush1.bf16.msra.mxu0 %v4697_v7 }
 0x7f2   : > { %2231 = vmatprep.subr.bf16.mxu0 %v4702_v8 }
 0x7f5   : > { %2232 = vmatpush1.bf16.msra.mxu0 %v4700_v26 }
 0x7f6   : > { %2233 = vmatprep.subr.bf16.mxu0 %v4705_v10 }
 0x7f9   : > { %2234 = vmatpush1.bf16.msra.mxu0 %v4703_v39 }
 0x7fa   : > { %2235 = vmatprep.subr.bf16.mxu0 %v4709_v11 }
 0x7fd   : > { %2236 = vmatpush1.bf16.msra.mxu0 %v4707_v12 }
 0x7fe   : > { %2237 = vmatprep.subr.bf16.mxu0 %v4713_v13 }
 0x801   : > { %2238 = vmatpush1.bf16.msra.mxu0 %v4711_v14 }
 0x802   : > { %2239 = vmatprep.subr.bf16.mxu0 %v4717_v20 }
 0x805   : > { %2240 = vmatpush1.bf16.msra.mxu0 %v4715_v21 }
 0x806   : > { %2241 = vmatprep.subr.bf16.mxu0 %v4721_v23 }
 0x809   : > { %2242 = vmatpush1.bf16.msra.mxu0 %v4719_v24 }
 0x80a   : > { %4324 = vmatprep.subr.bf16.mxu0 %v5702_v0 }
 0x80c   : > { %2260 = vmatmul.mubr.bf16.vlgmr.msra.gmra.mrb[16].mxu0 %v1092_v27 }
 0x80d   : > { %4326 = vmatprep.mubr.msk.bf16.mxu0 %vm5704_vm0, %v5702_v0 }
 0x8bf   : > { %v1953_v58 = vpop.f32.mrb[12].mxu0 }
 0x8c0   : > { %v1954_v59 = vadd.f32 %v3954_v56, %v1953_v58  ;;  %v4278_v60 = vpop.f32.mrb[13].mxu0  ;;  %v3965_v58 = vld [vmem:[#allocation23] ss:$0 sm:$0xff] }
 0x8c1   : > { %v1956_v61 = vpop.f32.mrb[14].mxu0 }
 0x8c2   : > { %v4279_v62 = vpop.f32.mrb[15].mxu0  ;;  %v1959_v63 = vadd.f32 %v1954_v59, %v1091_v57 }
 0x8c4   : > { %1962 = vadd.xlane.f32.xlu0 %v1959_v63 }
 0x8df   : > { %v2261_v47 = vpop.f32.mrb[16].mxu0 }
 0x8e0   : > { %v2262_v48 = vadd.f32 %v2261_v47, %v2140_v46  ;;  %v2263_v49 = vpop.f32.mrb[17].mxu0 }
 0x8e1   : > { %v2265_v50 = vpop.f32.mrb[18].mxu0  ;;  %v6703_v53 = vadd.f32 %v2263_v49, %v2144_v51 }
 0x8e2   : > { %2283 = vrot.lane.b32.xlu0 %v2262_v48, %s5706_s5  ;;  %v2266_v52 = vpop.f32.mrb[19].mxu0  ;;  %v2292_v54 = vpack.c.bf16 %v2262_v48, %v2262_v48 }
 0x8e3   : > { %v2306_v55 = vpack.c.bf16 %v6703_v53, %v6703_v53 }
 0x8e4   : > { %v2314_v56 = vsel %vm1414_vm1, %v2292_v54, 0 }
 0x8e5   : > { %v2554_v57 = vsel %vm1665_vm2, %v2306_v55, 0 }
 0x8e6   : > { %2286 = vrot.lane.b32.xlu0 %v2262_v48, %s5705_s0  ;;  %4325 = vmatpush3.bf16.msra.mxu0 %v2554_v57 }
 0x8e7   : > { %4336 = vmatprep.subr.bf16.mxu0 %v5702_v0 }
 0x8ea   : > { %2289 = vrot.lane.b32.xlu0 %v2262_v48, %s5707_s7 }
 0x951   : > { %v1963_v15 = vpop.xlane.xlu0 %1962 }
 0x952   : > { %v1965_v16 = vmul.f32 0.0078125, %v1963_v15 }
 0x954   : > { %v1966_v17 = vsub.f32 %v1959_v63, %v1965_v16 }
 0x955   : > { %v2284_v60 = vpop.permute.xlu0 %2283 }
 0x956   : > { %v1967_v18 = vmul.f32 %v1966_v17, %v1966_v17  ;;  %v2293_v63 = vpack.c.bf16 %v2284_v60, %v2284_v60 }
 0x958   : > { %1968 = vadd.xlane.f32.xlu1 %v1967_v18  ;;  %v2360_v7 = vsel %vm1414_vm1, %v2293_v63, 0  ;;  %v2494_v18 = vstv %s1988_s16 }
 0x959   : > { %v2287_v8 = vpop.permute.xlu0 %2286  ;;  %vm6736_vm9 = vcmp.lt.s32.totalorder %v6617_v5, %v2494_v18 }
 0x95a   : > { %v2294_v9 = vpack.c.bf16 %v2287_v8, %v2287_v8 }
 0x95c   : > { %v2406_v39 = vsel %vm1414_vm1, %v2294_v9, 0 }
 0x95d   : > { %v2290_v11 = vpop.permute.xlu0 %2289 }
 0x95e   : > { %v2295_v13 = vpack.c.bf16 %v2290_v11, %v2290_v11 }
 0x960   : > { %v2452_v15 = vsel %vm1414_vm1, %v2295_v13, 0 }
 0x9e5   : > { %v1969_v34 = vpop.xlane.xlu1 %1968 }
 0x9e6   : > { %v1970_v35 = vmul.f32 0.0078125, %v1969_v34 }
 0x9e8   : > { %v1971_v36 = vadd.f32 1e-05, %v1970_v35 }
 0x9ea   : > { %4830 = vrsqrt.f32 %v1971_v36 }
 0x9f4   : > { %v4831_v37 = vpop.eup %4830 }
 0x9f5   : > { %v1973_v40 = vmul.f32 %v4831_v37, %v1966_v17 }
 0x9f7   : > { %v1980_v42 = vmul.f32 %v3963_v38, %v1973_v40 }
 0x9f9   : > { %v6694_v43 = vadd.f32 %v3964_v41, %v1980_v42 }
 0x9fb   : > { %v2040_v44 = vpack.c.bf16 %v6694_v43, %v6694_v43 }
 0x9fd   : > { %4297 = vmatmul.mubr.bf16.vlgmr.msra.gmra.mrb[28].mxu1 %v2040_v44 }
 0x9fe   : > { %4302 = vmatprep.mubr.msk.bf16.mxu1 %vm5704_vm0, %v5702_v0  ;;  %4301 = vmatpush3.bf16.xpose.msra.mxu1 %v2314_v56 }
 0x9ff   : > { %4306 = vmatprep.subr.bf16.mxu1 %v5702_v0 }
 0xad0   : > { %v2129_v59 = vpop.f32.mrb[28].mxu1 }
 0xad1   : > { %v2130_v61 = vadd.f32 %v3965_v58, %v2129_v59  ;;  %v4298_v62 = vpop.f32.mrb[29].mxu1 }
 0xad2   : > { %v2132_v2 = vpop.f32.mrb[30].mxu1 }
 0xad3   : > { %v2135_v3 = vmul.f32 0.17677669, %v2130_v61  ;;  %v4299_v4 = vpop.f32.mrb[31].mxu1 }
 0xad5   : > { %v2278_v6 = vpack.c.bf16 %v2135_v3, %v2135_v3  ;;  %2269 = vrot.lane.b32.xlu1 %v2135_v3, %s5706_s5 }
 0xad7   : > { %4303 = vmatmul.mubr.msk.bf16.vlgmr.msra.gmra.mrb[32].mxu1 %vm1414_vm1, %v2278_v6 }
 0xad8   : > { %4307 = vmatpush3.bf16.xpose.msra.mxu1 %v2360_v7  ;;  %4308 = vmatprep.mubr.msk.bf16.mxu1 %vm5704_vm0, %v5702_v0 }
 0xad9   : > { %2272 = vrot.lane.b32.xlu1 %v2135_v3, %s5705_s0  ;;  %4312 = vmatprep.subr.bf16.mxu1 %v5702_v0 }
 0xadd   : > { %2275 = vrot.lane.b32.xlu1 %v2135_v3, %s5707_s7 }
 0xb47   : > { %v2270_v26 = vpop.permute.xlu1 %2269 }
 0xb48   : > { %v2279_v10 = vpack.c.bf16 %v2270_v26, %v2270_v26 }
 0xb4a   : > { %4309 = vmatmul.mubr.msk.bf16.vlgmr.msra.gmra.mrb[36].mxu1 %vm1414_vm1, %v2279_v10 }
 0xb4b   : > { %4313 = vmatpush3.bf16.xpose.msra.mxu1 %v2406_v39  ;;  %4314 = vmatprep.mubr.msk.bf16.mxu1 %vm5704_vm0, %v5702_v0  ;;  %v2273_v12 = vpop.permute.xlu1 %2272 }
 0xb4c   : > { %4318 = vmatprep.subr.bf16.mxu1 %v5702_v0  ;;  %v2280_v14 = vpack.c.bf16 %v2273_v12, %v2273_v12 }
 0xb4f   : > { %v2276_v16 = vpop.permute.xlu1 %2275 }
 0xb50   : > { %v2281_v17 = vpack.c.bf16 %v2276_v16, %v2276_v16 }
 0xb52   : > { %4315 = vmatmul.mubr.msk.bf16.vlgmr.msra.gmra.mrb[40].mxu1 %vm1414_vm1, %v2280_v14 }
 0xb53   : > { %4319 = vmatpush3.bf16.xpose.msra.mxu1 %v2452_v15  ;;  %4320 = vmatprep.mubr.msk.bf16.mxu1 %vm5704_vm0, %v5702_v0 }
 0xb54   : > { %4330 = vmatprep.subr.bf16.mxu1 %v5702_v0 }
 0xb5a   : > { %4321 = vmatmul.mubr.msk.bf16.vlgmr.msra.gmra.mrb[44].mxu1 %vm1414_vm1, %v2281_v17 }
 0xb5b   : > { %4332 = vmatprep.mubr.msk.bf16.mxu1 %vm5704_vm0, %v5702_v0 }
 0xbaa   : > { %v2350_v20 = vpop.f32.mrb[32].mxu1 }
 0xbab   : > { %v2498_v21 = vsel %vm6736_vm9, %v2350_v20, -1e+09  ;;  %v4304_v22 = vpop.f32.mrb[33].mxu1 }
 0xbac   : > { %v2353_v23 = vpop.f32.mrb[34].mxu1  ;;  %v2502_v24 = vsel %vm1613_vm6, %v2498_v21, -inf }
 0xbad   : > { %2503 = vmax.xlane.f32.xlu0 %v2502_v24  ;;  %v4305_v25 = vpop.f32.mrb[35].mxu1 }
 0xc1d   : > { %v2396_v27 = vpop.f32.mrb[36].mxu1 }
 0xc1e   : > { %v2499_v30 = vsel %vm6736_vm9, %v2396_v27, -1e+09  ;;  %v4310_v32 = vpop.f32.mrb[37].mxu1 }
 0xc1f   : > { %v2399_v33 = vpop.f32.mrb[38].mxu1  ;;  %v2505_v5 = vsel %vm1613_vm6, %v2499_v30, -inf }
 0xc20   : > { %2506 = vmax.xlane.f32.xlu1 %v2505_v5  ;;  %v4311_v34 = vpop.f32.mrb[39].mxu1 }
 0xc21   : > { %v4726_v34 = vld [vmem:[#allocation28] sm:$0xff]  }
 0xc25   : > { %v2442_v35 = vpop.f32.mrb[40].mxu1 }
 0xc26   : > { %v2500_v36 = vsel %vm6736_vm9, %v2442_v35, -1e+09  ;;  %v4316_v37 = vpop.f32.mrb[41].mxu1  ;;  %v4727_v35 = vld [vmem:[#allocation28 + $0x8] sm:$0xff]  }
 0xc27   : > { %v2445_v38 = vpop.f32.mrb[42].mxu1  ;;  %v2508_v40 = vsel %vm1613_vm6, %v2500_v36, -inf }
 0xc28   : > { %2509 = vmax.xlane.f32.xlu0 %v2508_v40  ;;  %v4317_v41 = vpop.f32.mrb[43].mxu1  ;;  %v4728_v40 = vld [vmem:[#allocation28 + $0x10] sm:$0xff]  }
 0xc2d   : > { %v2488_v42 = vpop.f32.mrb[44].mxu1 }
 0xc2e   : > { %v2501_v44 = vsel %vm6736_vm9, %v2488_v42, -1e+09  ;;  %v4322_v45 = vpop.f32.mrb[45].mxu1  ;;  %v4729_v42 = vld [vmem:[#allocation28 + $0x18] sm:$0xff]  }
 0xc2f   : > { %v2491_v46 = vpop.f32.mrb[46].mxu1  ;;  %v2511_v47 = vsel %vm1613_vm6, %v2501_v44, -inf  ;;  %v4731_v45 = vld [vmem:[#allocation28 + $0x28] sm:$0xff]  }
 0xc30   : > { %2512 = vmax.xlane.f32.xlu0 %v2511_v47  ;;  %v4323_v48 = vpop.f32.mrb[47].mxu1  ;;  %v4732_v46 = vld [vmem:[#allocation28 + $0x30] sm:$0xff]  }
 0xc31   : > { %2297 = vrot.lane.b32.xlu1 %v6703_v53, %s5706_s5 }
 0xc3a   : > { %v2504_v49 = vpop.xlane.xlu0 %2503 }
 0xc3b   : > { %v2514_v50 = vsub.f32 %v2498_v21, %v2504_v49 }
 0xc3d   : > { %v2518_v51 = vmul.f32 1.442695, %v2514_v50 }
 0xc3f   : > { %4832 = vpow2.f32 %v2518_v51  ;;  %v4733_v51 = vld [vmem:[#allocation28 + $0x38] sm:$0xff]  }
 0xc49   : > { %v4833_v52 = vpop.eup %4832 }
 0xc4a   : > { %v2526_v54 = vsel %vm1613_vm6, %v4833_v52, 0.0 }
 0xc55   : > { %2527 = vadd.xlane.f32.xlu1 %v2526_v54 }
 0xcad   : > { %v2507_v55 = vpop.xlane.xlu1 %2506 }
 0xcae   : > { %v2515_v56 = vsub.f32 %v2499_v30, %v2507_v55 }
 0xcb0   : > { %v2520_v57 = vmul.f32 1.442695, %v2515_v56 }
 0xcb1   : > { %v2298_v58 = vpop.permute.xlu1 %2297 }
 0xcb2   : > { %4834 = vpow2.f32 %v2520_v57  ;;  %v2307_v59 = vpack.c.bf16 %v2298_v58, %v2298_v58 }
 0xcb4   : > { %v2600_v60 = vsel %vm1665_vm2, %v2307_v59, 0 }
 0xcb5   : > { %4331 = vmatpush3.bf16.msra.mxu1 %v2600_v60  ;;  %v2510_v61 = vpop.xlane.xlu0 %2509 }
 0xcb6   : > { %v2516_v62 = vsub.f32 %v2500_v36, %v2510_v61  ;;  %4342 = vmatprep.subr.bf16.mxu1 %v5702_v0 }
 0xcb8   : > { %v2522_v63 = vmul.f32 1.442695, %v2516_v62 }
 0xcba   : > { %4836 = vpow2.f32 %v2522_v63 }
 0xcbc   : > { %v4835_v2 = vpop.eup %4834 }
 0xcbd   : > { %v2513_v3 = vpop.xlane.xlu0 %2512  ;;  %v2529_v4 = vsel %vm1613_vm6, %v4835_v2, 0.0 }
 0xcbe   : > { %v2517_v6 = vsub.f32 %v2501_v44, %v2513_v3  ;;  %2530 = vadd.xlane.f32.xlu0 %v2529_v4  ;;  %v4730_v44 = vld [vmem:[#allocation28 + $0x20] sm:$0xff]  }
 0xcc0   : > { %v2524_v7 = vmul.f32 1.442695, %v2517_v6  ;;  %v3998_v6 = vld [vmem:[#allocation29] ss:$0 sm:$0xff] }
 0xcc2   : > { %4838 = vpow2.f32 %v2524_v7 }
 0xcc4   : > { %v4837_v8 = vpop.eup %4836 }
 0xcc5   : > { %v2532_v9 = vsel %vm1613_vm6, %v4837_v8, 0.0 }
 0xcc6   : > { %2533 = vadd.xlane.f32.xlu1 %v2532_v9 }
 0xccc   : > { %v4839_v26 = vpop.eup %4838 }
 0xccd   : > { %v2535_v10 = vsel %vm1613_vm6, %v4839_v26, 0.0 }
 0xcce   : > { %2536 = vadd.xlane.f32.xlu0 %v2535_v10 }
 0xcd7   : > { %2303 = vrot.lane.b32.xlu1 %v6703_v53, %s5707_s7 }
 0xce2   : > { %v2528_v39 = vpop.xlane.xlu1 %2527 }
 0xce3   : > { %4840 = vrcp.f32 %v2528_v39 }
 0xce4   : > { %2300 = vrot.lane.b32.xlu0 %v6703_v53, %s5705_s0 }
 0xced   : > { %v4841_v11 = vpop.eup %4840 }
 0xcee   : > { %v2542_v12 = vmul.f32 %v4841_v11, %v4833_v52  ;;  %v4734_v11 = vld [vmem:[#allocation34] ss:$16 sps:$4 sm:$0xff]  }
 0xcf0   : > { %v2546_v13 = vpack.c.bf16 %v2542_v12, %v2542_v12  ;;  %v4736_v12 = vld [vmem:[#allocation34 + $0x4] ss:$16 sps:$4 sm:$0xff]  }
 0xcf2   : > { %4327 = vmatmul.mubr.msk.bf16.vlgmr.msra.gmra.mrb[20].mxu0 %vm1613_vm6, %v2546_v13  ;;  %v4737_v13 = vld [vmem:[#allocation34 + $0x8] ss:$16 sps:$4 sm:$0xff]  }
 0xcf3   : > { %4338 = vmatprep.mubr.msk.bf16.mxu0 %vm5704_vm0, %v5702_v0 }
 0xd4b   : > { %v2531_v14 = vpop.xlane.xlu0 %2530 }
 0xd4c   : > { %4842 = vrcp.f32 %v2531_v14  ;;  %v4739_v14 = vld [vmem:[#allocation34 + $0xc] ss:$16 sps:$4 sm:$0xff]  }
 0xd53   : > { %v2534_v15 = vpop.xlane.xlu1 %2533 }
 0xd54   : > { %4844 = vrcp.f32 %v2534_v15  ;;  %v4742_v15 = vld [vmem:[#allocation34 + $0x24] ss:$16 sps:$4 sm:$0xff]  }
 0xd56   : > { %v4843_v16 = vpop.eup %4842 }
 0xd57   : > { %v2543_v17 = vmul.f32 %v4843_v16, %v4835_v2  ;;  %v2304_v18 = vpop.permute.xlu1 %2303  ;;  %v4745_v16 = vld [vmem:[#allocation34 + $0x2c] ss:$16 sps:$4 sm:$0xff]  }
 0xd58   : > { %v2309_v19 = vpack.c.bf16 %v2304_v18, %v2304_v18  ;;  %v4748_v18 = vld [vmem:[#allocation34 + $0x44] ss:$16 sps:$4 sm:$0xff]  }
 0xd59   : > { %v2547_v20 = vpack.c.bf16 %v2543_v17, %v2543_v17  ;;  %v4740_v17 = vld [vmem:[#allocation34 + $0x20] ss:$16 sps:$4 sm:$0xff]  }
 0xd5a   : > { %v2692_v21 = vsel %vm1665_vm2, %v2309_v19, 0  ;;  %v4751_v19 = vld [vmem:[#allocation34 + $0x4c] ss:$16 sps:$4 sm:$0xff]  }
 0xd5b   : > { %4333 = vmatmul.mubr.msk.bf16.vlgmr.msra.gmra.mrb[48].mxu1 %vm1613_vm6, %v2547_v20  ;;  %v2537_v53 = vpop.xlane.xlu0 %2536  ;;  %v4746_v20 = vld [vmem:[#allocation34 + $0x40] ss:$16 sps:$4 sm:$0xff]  }
 0xd5c   : > { %4343 = vmatpush3.bf16.msra.mxu1 %v2692_v21  ;;  %4846 = vrcp.f32 %v2537_v53  ;;  %4344 = vmatprep.mubr.msk.bf16.mxu1 %vm5704_vm0, %v5702_v0 }
 0xd5d   : > { %3152 = vmatprep.subr.bf16.mxu1 %v4736_v12  ;;  %v4798_v12 = vld [vmem:[#allocation37 + $0x60] sm:$0xff]  }
 0xd5e   : > { %v4845_v22 = vpop.eup %4844 }
 0xd5f   : > { %v2301_v23 = vpop.permute.xlu0 %2300  ;;  %v2544_v24 = vmul.f32 %v4845_v22, %v4837_v8 }
 0xd60   : > { %v2308_v25 = vpack.c.bf16 %v2301_v23, %v2301_v23 }
 0xd61   : > { %v2548_v30 = vpack.c.bf16 %v2544_v24, %v2544_v24  ;;  %v4754_v24 = vld [vmem:[#allocation34 + $0x64] ss:$16 sps:$4 sm:$0xff]  }
 0xd62   : > { %v2646_v27 = vsel %vm1665_vm2, %v2308_v25, 0  ;;  %v4757_v25 = vld [vmem:[#allocation34 + $0x6c] ss:$16 sps:$4 sm:$0xff]  }
 0xd63   : > { %4337 = vmatpush3.bf16.msra.mxu0 %v2646_v27  ;;  %v4752_v27 = vld [vmem:[#allocation34 + $0x60] ss:$16 sps:$4 sm:$0xff]  }
 0xd64   : > { %4348 = vmatprep.subr.bf16.mxu0 %v5702_v0 }
 0xd66   : > { %v4847_v32 = vpop.eup %4846  ;;  %4339 = vmatmul.mubr.msk.bf16.vlgmr.msra.gmra.mrb[24].mxu0 %vm1613_vm6, %v2548_v30  ;;  %v4755_v30 = vld [vmem:[#allocation34 + $0x68] ss:$16 sps:$4 sm:$0xff]  }
 0xd67   : > { %v2545_v33 = vmul.f32 %v4847_v32, %v4839_v26  ;;  %4364 = vmatprep.mubr.msk.bf16.mxu0 %vm5704_vm0, %v5702_v0  ;;  %4349 = vmatpush3.bf16.msra.mxu0 %v4726_v34  ;;  %v4760_v32 = vld [vmem:[#allocation34 + $0x84] ss:$16 sps:$4 sm:$0xff]   ;;  %v4761_v34 = vld [vmem:[#allocation34 + $0x88] ss:$16 sps:$4 sm:$0xff]  }
 0xd68   : > { %4350 = vmatprep.subr.bf16.mxu0 %v5702_v0 }
 0xd69   : > { %v2549_v5 = vpack.c.bf16 %v2545_v33, %v2545_v33  ;;  %v4763_v33 = vld [vmem:[#allocation34 + $0x8c] ss:$16 sps:$4 sm:$0xff]  }
 0xd6b   : > { %4345 = vmatmul.mubr.msk.bf16.vlgmr.msra.gmra.mrb[52].mxu1 %vm1613_vm6, %v2549_v5  ;;  %4351 = vmatpush3.bf16.msra.mxu0 %v4727_v35  ;;  %v4758_v5 = vld [vmem:[#allocation34 + $0x80] ss:$16 sps:$4 sm:$0xff]   ;;  %v4766_v35 = vld [vmem:[#allocation34 + $0xa4] ss:$16 sps:$4 sm:$0xff]  }
 0xd6c   : > { %3184 = vmatprep.mubr.bf16.mxu1 %v5703_v1  ;;  %4352 = vmatprep.subr.bf16.mxu0 %v5702_v0 }
 0xd6d   : > { %3153 = vmatpush1.bf16.msra.mxu1 %v4734_v11  ;;  %v4797_v11 = vld [vmem:[#allocation37 + $0x98] sm:$0xff]  }
 0xd6e   : > { %3154 = vmatprep.subr.bf16.mxu1 %v4742_v15  ;;  %v4801_v15 = vld [vmem:[#allocation37 + $0xa0] sm:$0xff]  }
 0xd6f   : > { %4353 = vmatpush3.bf16.msra.mxu0 %v4728_v40  ;;  %v4772_v40 = vld [vmem:[#allocation34 + $0xc4] ss:$16 sps:$4 sm:$0xff]  }
 0xd70   : > { %4354 = vmatprep.subr.bf16.mxu0 %v5702_v0 }
 0xd71   : > { %3155 = vmatpush1.bf16.msra.mxu1 %v4740_v17  ;;  %v4803_v17 = vld [vmem:[#allocation37 + $0xe8] sm:$0xff]  }
 0xd72   : > { %3156 = vmatprep.subr.bf16.mxu1 %v4748_v18  ;;  %v4805_v18 = vld [vmem:[#allocation37 + $0xa8] sm:$0xff]  }
 0xd73   : > { %4355 = vmatpush3.bf16.msra.mxu0 %v4729_v42  ;;  %v4770_v42 = vld [vmem:[#allocation34 + $0xc0] ss:$16 sps:$4 sm:$0xff]  }
 0xd74   : > { %4356 = vmatprep.subr.bf16.mxu0 %v5702_v0 }
 0xd75   : > { %3157 = vmatpush1.bf16.msra.mxu1 %v4746_v20  ;;  %v4807_v20 = vld [vmem:[#allocation37 + $0xf0] sm:$0xff]  }
 0xd76   : > { %3158 = vmatprep.subr.bf16.mxu1 %v4754_v24  ;;  %v4813_v24 = vld [vmem:[#allocation37 + $0xb8] sm:$0xff]  }
 0xd77   : > { %4357 = vmatpush3.bf16.msra.mxu0 %v4730_v44  ;;  %v4773_v44 = vld [vmem:[#allocation34 + $0xc8] ss:$16 sps:$4 sm:$0xff]  }
 0xd78   : > { %4358 = vmatprep.subr.bf16.mxu0 %v5702_v0 }
 0xd79   : > { %3159 = vmatpush1.bf16.msra.mxu1 %v4752_v27  ;;  %v2904_v27 = vld [vmem:[#allocation35] sm:$0xf] }
 0xd7a   : > { %3160 = vmatprep.subr.bf16.mxu1 %v4760_v32  ;;  %v2975_v32 = vrot.slane %v2904_v27, %v6576_v29 }
 0xd7b   : > { %4359 = vmatpush3.bf16.msra.mxu0 %v4731_v45  ;;  %v4778_v45 = vld [vmem:[#allocation34 + $0xe4] ss:$16 sps:$4 sm:$0xff]  }
 0xd7c   : > { %4360 = vmatprep.subr.bf16.mxu0 %v5702_v0 }
 0xd7d   : > { %3161 = vmatpush1.bf16.msra.mxu1 %v4758_v5  ;;  %v2979_v5 = vrot.slane %v2904_v27, %v6579_v31 }
 0xd7e   : > { %3162 = vmatprep.subr.bf16.mxu1 %v4766_v35 }
 0xd7f   : > { %4361 = vmatpush3.bf16.msra.mxu0 %v4732_v46  ;;  %v4781_v46 = vld [vmem:[#allocation34 + $0xec] ss:$16 sps:$4 sm:$0xff]  }
 0xd80   : > { %4362 = vmatprep.subr.bf16.mxu0 %v5702_v0 }
 0xd83   : > { %4363 = vmatpush3.bf16.msra.mxu0 %v4733_v51 }
 0xd84   : > { %3193 = vmatprep.subr.bf16.mxu0 %v4739_v14  ;;  %v4800_v14 = vld [vmem:[#allocation37 + $0x20] sm:$0xff]  }
 0xdc5   : > { %v2590_v36 = vpop.f32.mrb[20].mxu0 }
 0xdc6   : > { %v4328_v37 = vpop.f32.mrb[21].mxu0 }
 0xdc7   : > { %v2593_v38 = vpop.f32.mrb[22].mxu0  ;;  %v4764_v37 = vld [vmem:[#allocation34 + $0xa0] ss:$16 sps:$4 sm:$0xff]  }
 0xdc8   : > { %v4329_v41 = vpop.f32.mrb[23].mxu0  ;;  %v4767_v38 = vld [vmem:[#allocation34 + $0xa8] ss:$16 sps:$4 sm:$0xff]   ;;  %3163 = vmatpush1.bf16.msra.mxu1 %v4764_v37 }
 0xdc9   : > { %v4775_v41 = vld [vmem:[#allocation34 + $0xcc] ss:$16 sps:$4 sm:$0xff]   ;;  %3164 = vmatprep.subr.bf16.mxu1 %v4772_v40 }
 0xdcc   : > { %3165 = vmatpush1.bf16.msra.mxu1 %v4770_v42 }
 0xdcd   : > { %3166 = vmatprep.subr.bf16.mxu1 %v4778_v45 }
 0xe2e   : > { %v2636_v47 = vpop.f32.mrb[48].mxu1 }
 0xe2f   : > { %2735 = vrot.lane.b32.xlu1 %v2636_v47, %s5707_s7  ;;  %v4334_v48 = vpop.f32.mrb[49].mxu1  ;;  %v4776_v47 = vld [vmem:[#allocation34 + $0xe0] ss:$16 sps:$4 sm:$0xff]  }
 0xe30   : > { %v2639_v49 = vpop.f32.mrb[50].mxu1  ;;  %v4779_v48 = vld [vmem:[#allocation34 + $0xe8] ss:$16 sps:$4 sm:$0xff]   ;;  %3167 = vmatpush1.bf16.msra.mxu1 %v4776_v47 }
 0xe31   : > { %v4335_v50 = vpop.f32.mrb[51].mxu1  ;;  %v4782_v49 = vld [vmem:[#allocation37 + $0x40] sm:$0xff]  }
 0xe32   : > { %v4783_v50 = vld [vmem:[#allocation37 + $0xc0] sm:$0xff]   ;;  %4148 = vmatprep.subr.bf16.mxu1 %v4782_v49 }
 0xe39   : > { %v2682_v52 = vpop.f32.mrb[24].mxu0 }
 0xe3a   : > { %2739 = vrot.lane.b32.xlu0 %v2682_v52, %s5705_s0  ;;  %v4340_v54 = vpop.f32.mrb[25].mxu0  ;;  %s5554_s0 = scalar_lea.vmem %s5553_s9, 128 }
 0xe3b   : > { %v2685_v55 = vpop.f32.mrb[26].mxu0  ;;  %p5556_p0 = scmp.lt.s32.totalorder %s5554_s0, %s5548_s11 }
 0xe3c   : > { %v4341_v56 = vpop.f32.mrb[27].mxu0 }
 0xe3d   : > { %v4007_v56 = vld [vmem:[#allocation31] ss:$0 sm:$0xff]  ;;  %p5557_p1 = por %p5556_p0, %p5555_p3 }
 0xe3e   : > { %v2728_v57 = vpop.f32.mrb[52].mxu1 }
 0xe3f   : > { %2743 = vrot.lane.b32.xlu1 %v2728_v57, %s5706_s5  ;;  %v4346_v58 = vpop.f32.mrb[53].mxu1  ;;  %p5558_p4 = pnand %p5557_p1, %p5551_p12 }
 0xe40   : > { %v2731_v59 = vpop.f32.mrb[54].mxu1  ;;  %v4008_v58 = vld [vmem:[#allocation32] ss:$0 sm:$0xff] }
 0xe41   : > { %v4347_v60 = vpop.f32.mrb[55].mxu1 }
 0xea1   : > { %v2736_v61 = vpop.permute.xlu1 %2735 }
 0xea2   : > { %v2746_v63 = vsel %vm1414_vm1, %v2590_v36, %v2736_v61  ;;  %v4769_v36 = vld [vmem:[#allocation34 + $0xac] ss:$16 sps:$4 sm:$0xff]   ;;  %v4784_v61 = vld [vmem:[#allocation37] sm:$0xff]  }
 0xeac   : > { %v2740_v62 = vpop.permute.xlu0 %2739 }
 0xead   : > { %v2747_v0 = vsel %vm1860_vm7, %v2746_v63, %v2740_v62  ;;  %v4785_v62 = vld [vmem:[#allocation37 + $0x80] sm:$0xff]  }
 0xeb1   : > { %v2744_v2 = vpop.permute.xlu1 %2743 }
 0xeb2   : > { %v2748_v3 = vsel %vm1862_vm8, %v2747_v0, %v2744_v2  ;;  %v4786_v0 = vld [vmem:[#allocation37 + $0x48] sm:$0xff]  }
 0xeb3   : > { %v2749_v4 = vpack.c.bf16 %v2748_v3, %v2748_v3  ;;  %v4787_v2 = vld [vmem:[#allocation37 + $0xc8] sm:$0xff]  }
 0xeb4   : > { %v4788_v3 = vld [vmem:[#allocation37 + $0x8] sm:$0xff]  }
 0xeb5   : > { %4365 = vmatmul.mubr.bf16.vlgmr.msra.gmra.mrb[28].mxu0 %v2749_v4  ;;  %v4789_v4 = vld [vmem:[#allocation37 + $0x88] sm:$0xff]  }
 0xeb6   : > { %3225 = vmatprep.mubr.bf16.mxu0 %v5703_v1  ;;  %3194 = vmatpush1.bf16.msra.mxu0 %v4737_v13  ;;  %v4743_v1 = vld [vmem:[#allocation34 + $0x28] ss:$16 sps:$4 sm:$0xff]  }
 0xeb7   : > { %3195 = vmatprep.subr.bf16.mxu0 %v4745_v16  ;;  %v4799_v13 = vld [vmem:[#allocation37 + $0xe0] sm:$0xff]   ;;  %v4802_v16 = vld [vmem:[#allocation37 + $0x68] sm:$0xff]  }
 0xeba   : > { %3196 = vmatpush1.bf16.msra.mxu0 %v4743_v1  ;;  %v4804_v1 = vld [vmem:[#allocation37 + $0x28] sm:$0xff]  }
 0xebb   : > { %3197 = vmatprep.subr.bf16.mxu0 %v4751_v19  ;;  %v4806_v19 = vld [vmem:[#allocation37 + $0x70] sm:$0xff]  }
 0xf88   : > { %v2838_v7 = vpop.f32.mrb[28].mxu0 }
 0xf89   : > { %v2839_v8 = vadd.f32 %v3998_v6, %v2838_v7  ;;  %v4366_v9 = vpop.f32.mrb[29].mxu0  ;;  %v4790_v6 = vld [vmem:[#allocation37 + $0x50] sm:$0xff]  }
 0xf8a   : > { %v2841_v26 = vpop.f32.mrb[30].mxu0  ;;  %v4791_v7 = vld [vmem:[#allocation37 + $0xd0] sm:$0xff]  }
 0xf8b   : > { %v4367_v10 = vpop.f32.mrb[31].mxu0  ;;  %v2844_v39 = vadd.f32 %v2839_v8, %v6694_v43  ;;  %v4749_v43 = vld [vmem:[#allocation34 + $0x48] ss:$16 sps:$4 sm:$0xff]   ;;  %v4794_v26 = vld [vmem:[#allocation37 + $0x58] sm:$0xff]  }
 0xf8c   : > { %3198 = vmatpush1.bf16.msra.mxu0 %v4749_v43  ;;  %v4792_v8 = vld [vmem:[#allocation37 + $0x10] sm:$0xff]   ;;  %v4795_v10 = vld [vmem:[#allocation37 + $0xd8] sm:$0xff]  }
 0xf8d   : > { %2847 = vadd.xlane.f32.xlu0 %v2844_v39  ;;  %3199 = vmatprep.subr.bf16.mxu0 %v4757_v25  ;;  %v4793_v9 = vld [vmem:[#allocation37 + $0x90] sm:$0xff]   ;;  %v2982_v25 = vsub.s32 2, %v6573_v28 }
 0xf8e   : > { %v4808_v43 = vld [vmem:[#allocation37 + $0x30] sm:$0xff]  }
 0xf90   : > { %3200 = vmatpush1.bf16.msra.mxu0 %v4755_v30  ;;  %v2986_v30 = vsub.s32 3, %v6573_v28 }
 0xf91   : > { %3201 = vmatprep.subr.bf16.mxu0 %v4763_v33  ;;  %v2983_v33 = vrot.slane %v2904_v27, %v2982_v25 }
 0xf94   : > { %3202 = vmatpush1.bf16.msra.mxu0 %v4761_v34  ;;  %v2987_v34 = vrot.slane %v2904_v27, %v2986_v30 }
 0xf95   : > { %3203 = vmatprep.subr.bf16.mxu0 %v4769_v36 }
 0xf98   : > { %3204 = vmatpush1.bf16.msra.mxu0 %v4767_v38 }
 0xf99   : > { %3205 = vmatprep.subr.bf16.mxu0 %v4775_v41 }
 0xf9c   : > { %3206 = vmatpush1.bf16.msra.mxu0 %v4773_v44 }
 0xf9d   : > { %3207 = vmatprep.subr.bf16.mxu0 %v4781_v46 }
 0xfa0   : > { %3208 = vmatpush1.bf16.msra.mxu0 %v4779_v48 }
 0xfa1   : > { %4170 = vmatprep.subr.bf16.mxu0 %v4783_v50 }
0x101a   : > { %v2848_v21 = vpop.xlane.xlu0 %2847 }
0x101b   : > { %v2849_v53 = vmul.f32 0.0078125, %v2848_v21  ;;  %v4809_v21 = vld [vmem:[#allocation37 + $0xb0] sm:$0xff]  }
0x101d   : > { %v2850_v22 = vsub.f32 %v2844_v39, %v2849_v53  ;;  %v4796_v39 = vld [vmem:[#allocation37 + $0x18] sm:$0xff]  }
0x101e   : > { %v4810_v53 = vld [vmem:[#allocation37 + $0x78] sm:$0xff]  }
0x101f   : > { %v2851_v23 = vmul.f32 %v2850_v22, %v2850_v22 }
0x1021   : > { %2852 = vadd.xlane.f32.xlu1 %v2851_v23  ;;  %v4812_v23 = vld [vmem:[#allocation37 + $0x38] sm:$0xff]  }
0x10ae   : > { %v2853_v51 = vpop.xlane.xlu1 %2852 }
0x10af   : > { %v2854_v52 = vmul.f32 0.0078125, %v2853_v51 }
0x10b1   : > { %v2855_v54 = vadd.f32 1e-05, %v2854_v52 }
0x10b3   : > { %4848 = vrsqrt.f32 %v2855_v54 }
0x10bd   : > { %v4849_v55 = vpop.eup %4848 }
0x10be   : > { %v2857_v57 = vmul.f32 %v4849_v55, %v2850_v22  ;;  %v4811_v22 = vld [vmem:[#allocation37 + $0xf8] sm:$0xff]  }
0x10c0   : > { %v2864_v59 = vmul.f32 %v4007_v56, %v2857_v57  ;;  %v4041_v57 = vld [vmem:[#allocation38] ss:$0 sm:$0xff] }
0x10c2   : > { %v6793_v60 = vadd.f32 %v4008_v58, %v2864_v59 }
0x10c4   : > { %v2970_v63 = vpack.c.bf16 %v6793_v60, %v6793_v60 }
0x10c6   : > { %3185 = vmatmul.mubr.bf16.vlgmr.msra.gmra.mrb[56].mxu1 %v2970_v63  ;;  %3226 = vmatmul.mubr.bf16.vlgmr.msra.gmra.mrb[32].mxu0 %v2970_v63 }
0x10c7   : > { %4149 = vmatpush3.bf16.msra.mxu1 %v4784_v61  ;;  %4171 = vmatpush3.bf16.msra.mxu0 %v4785_v62 }
0x10c8   : > { %4150 = vmatprep.subr.bf16.mxu1 %v4786_v0  ;;  %4172 = vmatprep.subr.bf16.mxu0 %v4787_v2 }
0x10cb   : > { %4151 = vmatpush3.bf16.msra.mxu1 %v4788_v3  ;;  %4173 = vmatpush3.bf16.msra.mxu0 %v4789_v4 }
0x10cc   : > { %4152 = vmatprep.subr.bf16.mxu1 %v4790_v6  ;;  %4174 = vmatprep.subr.bf16.mxu0 %v4791_v7 }
0x10cf   : > { %4153 = vmatpush3.bf16.msra.mxu1 %v4792_v8  ;;  %4175 = vmatpush3.bf16.msra.mxu0 %v4793_v9 }
0x10d0   : > { %4154 = vmatprep.subr.bf16.mxu1 %v4794_v26  ;;  %4176 = vmatprep.subr.bf16.mxu0 %v4795_v10 }
0x10d3   : > { %4155 = vmatpush3.bf16.msra.mxu1 %v4796_v39  ;;  %4177 = vmatpush3.bf16.msra.mxu0 %v4797_v11 }
0x10d4   : > { %4156 = vmatprep.subr.bf16.mxu1 %v4798_v12  ;;  %4178 = vmatprep.subr.bf16.mxu0 %v4799_v13 }
0x10d7   : > { %4157 = vmatpush3.bf16.msra.mxu1 %v4800_v14  ;;  %4179 = vmatpush3.bf16.msra.mxu0 %v4801_v15  ;;  %v4074_v14 = vld [vmem:[#allocation40] ss:$0 sm:$0xff] }
0x10d8   : > { %4158 = vmatprep.subr.bf16.mxu1 %v4802_v16  ;;  %4180 = vmatprep.subr.bf16.mxu0 %v4803_v17  ;;  %v4075_v16 = vld [vmem:[#allocation41] ss:$0 sm:$0xff] }
0x10db   : > { %4159 = vmatpush3.bf16.msra.mxu1 %v4804_v1  ;;  %4181 = vmatpush3.bf16.msra.mxu0 %v4805_v18 }
0x10dc   : > { %4160 = vmatprep.subr.bf16.mxu1 %v4806_v19  ;;  %4182 = vmatprep.subr.bf16.mxu0 %v4807_v20 }
0x10df   : > { %4161 = vmatpush3.bf16.msra.mxu1 %v4808_v43  ;;  %4183 = vmatpush3.bf16.msra.mxu0 %v4809_v21 }
0x10e0   : > { %4162 = vmatprep.subr.bf16.mxu1 %v4810_v53  ;;  %4184 = vmatprep.subr.bf16.mxu0 %v4811_v22 }
0x10e3   : > { %4163 = vmatpush3.bf16.msra.mxu1 %v4812_v23  ;;  %4185 = vmatpush3.bf16.msra.mxu0 %v4813_v24 }
0x1199   : > { %v3186_v35 = vpop.f32.mrb[56].mxu1  ;;  %v3227_v36 = vpop.f32.mrb[32].mxu0 }
0x119a   : > { %v3187_v37 = vadd.f32 %v3186_v35, %v2975_v32  ;;  %v3228_v38 = vadd.f32 %v3227_v36, %v2983_v33  ;;  %v3188_v40 = vpop.f32.mrb[57].mxu1  ;;  %v3229_v41 = vpop.f32.mrb[33].mxu0 }
0x119b   : > { %v3189_v42 = vadd.f32 %v3188_v40, %v2979_v5  ;;  %v3230_v44 = vadd.f32 %v3229_v41, %v2987_v34  ;;  %v3190_v45 = vpop.f32.mrb[58].mxu1  ;;  %v3231_v46 = vpop.f32.mrb[34].mxu0 }
0x119c   : > { %v3234_v47 = vmax.f32 %v3187_v37, 0.0  ;;  %v3236_v48 = vmax.f32 %v3228_v38, 0.0  ;;  %v3191_v49 = vpop.f32.mrb[59].mxu1  ;;  %v3232_v28 = vpop.f32.mrb[35].mxu0 }
0x119d   : > { %v3235_v50 = vmax.f32 %v3189_v42, 0.0  ;;  %v3237_v29 = vmax.f32 %v3230_v44, 0.0 }
0x119e   : > { %v3238_v31 = vpack.c.bf16 %v3234_v47, %v3234_v47  ;;  %v3240_v54 = vpack.c.bf16 %v3236_v48, %v3236_v48 }
0x119f   : > { %v3239_v51 = vpack.c.bf16 %v3235_v50, %v3235_v50  ;;  %v3241_v52 = vpack.c.bf16 %v3237_v29, %v3237_v29 }
0x11a1   : > { %3472 = vmatprep.mubr.bf16.mxu1 %v3239_v51  ;;  %3512 = vmatprep.mubr.bf16.mxu0 %v3241_v52 }
0x11a2   : > { %3473 = vmatmul.mubr.bf16.vlgmr.msra.gmra.mrb[60].mxu1 %v3238_v31  ;;  %3513 = vmatmul.mubr.bf16.vlgmr.msra.gmra.mrb[36].mxu0 %v3240_v54 }
0x1275   : > { %v4164_v55 = vpop.f32.mrb[60].mxu1  ;;  %v4186_v56 = vpop.f32.mrb[36].mxu0 }
0x1276   : > { %v4165_v58 = vpop.f32.mrb[61].mxu1  ;;  %v4187_v59 = vpop.f32.mrb[37].mxu0 }
0x1277   : > { %v4166_v61 = vadd.f32 %v4165_v58, %v4164_v55  ;;  %v4188_v62 = vadd.f32 %v4187_v59, %v4186_v56  ;;  %v4167_v63 = vpop.f32.mrb[62].mxu1  ;;  %v4189_v0 = vpop.f32.mrb[38].mxu0 }
0x1278   : > { %v4168_v2 = vpop.f32.mrb[63].mxu1  ;;  %v4190_v3 = vpop.f32.mrb[39].mxu0 }
0x1279   : > { %v3475_v4 = vadd.f32 %v4166_v61, %v4041_v57 }
0x127b   : > { %v3515_v6 = vadd.f32 %v4188_v62, %v3475_v4 }
0x127d   : > { %v3520_v7 = vadd.f32 %v3515_v6, %v6793_v60 }
0x127f   : > { %3523 = vadd.xlane.f32.xlu0 %v3520_v7 }
0x130c   : > { %v3524_v8 = vpop.xlane.xlu0 %3523 }
0x130d   : > { %v3525_v9 = vmul.f32 0.0078125, %v3524_v8 }
0x130f   : > { %v3526_v26 = vsub.f32 %v3520_v7, %v3525_v9 }
0x1311   : > { %v3527_v10 = vmul.f32 %v3526_v26, %v3526_v26 }
0x1313   : > { %3528 = vadd.xlane.f32.xlu0 %v3527_v10 }
0x13a0   : > { %v3529_v39 = vpop.xlane.xlu0 %3528 }
0x13a1   : > { %v3530_v11 = vmul.f32 0.0078125, %v3529_v39 }
0x13a3   : > { %v3531_v12 = vadd.f32 1e-05, %v3530_v11 }
0x13a5   : > { %4850 = vrsqrt.f32 %v3531_v12 }
0x13af   : > { %v4851_v13 = vpop.eup %4850 }
0x13b0   : > { %v3533_v15 = vmul.f32 %v4851_v13, %v3526_v26 }
0x13b2   : > { %v3540_v17 = vmul.f32 %v4074_v14, %v3533_v15 }
0x13b4   : > { %v3547_v60 = vadd.f32 %v4075_v16, %v3540_v17 }
0x13b6   : > { %v3548_v1 = vpack.c.bf16 %v3547_v60, %v3547_v60 }
0x13b8   : > { %3549 = vst [vmem:[%s1088_s10] sm:$0xf] %v3548_v1 }
0x13b9   : > { %5561 = shalt.err (!%p5558_p4)
}
0x13ba   : > { %s5562_s17 = scalar_lea.hbm %s6807_s12, 64  ;;  %s5566_s19 = scalar_lea.hbm %s7016_s13, 128 }
0x13bb   : > { %p5563_p5 = scmp.ne.s32.totalorder %s6807_s12, %s5562_s17  ;;  %p5567_p8 = scmp.lt.u32.totalorder %s6807_s12, %s7016_s13 }
0x13bc   : > { %p5568_p10 = scmp.lt.u32.totalorder %s5566_s19, %s5562_s17  ;;  %p5570_p11 = scmp.lt.u32.totalorder %s5562_s17, %s6807_s12 }
0x13bd   : > { %p5564_p7 = pnand %p5563_p5, %p7017_p13 }
0x13be   : > { %p5569_p2 = por %p5568_p10, %p5567_p8 }
0x13bf   : > { %p5565_p9 = pneg %p5564_p7 }
0x13c0   : > { %p5571_p6 = por %p5570_p11, %p5569_p2 }
0x13c2   : > { %p5572_p12 = pnand %p5571_p6, %p5565_p9 }
0x13c4   : > { %5575 = shalt.err (!%p5572_p12)
}
0x13c5   : > { %4460 = dma.vmem_to_hbm [thread:$0]  (%p7017_p13), %s6809_s4, 64, %s6807_s12, %s3551_s18  }
0x13c6 PF: > { %s7018_s10 = sld [smem:[#allocation60_spill]]  ;;  %s7019_s6 = sld [smem:[#allocation63_spill]] }
0x13c7   : > { %p7020_p3 = scmp.ne.s32.totalorder %s6979_s15, 0 }
0x13cc   : > { %s3576_s2 = sand.u32 1, %s7018_s10   ;;  %p7021_p0 = scmp.ge.s32.totalorder %s7019_s6, 2 }
0x13cd   : > { %s3577_s8 = scalar_lea.sflag [#allocation7], %s3576_s2 }
0x13ce   : > { %p4537_p1 = pnand %p7021_p0, %p7020_p3 }
0x13d0   : > { %5651 = dma.done.wait (!%p4537_p1), %s3577_s8, 64  }
0x13d1   : > { %5653 = vsyncadd (!%p4537_p1), %s3577_s8, 4294967232  ;;  %s7022_s11 = sld [smem:[#allocation61_spill]]  ;;  %s7023_s8 = sld [smem:[#allocation62_spill]] }
0x13d2   : > { %s7024_s26 = smov %s6388_s1  ;;  %p59_p4 = scmp.ge.s32.totalorder %s6377_s29, 4  }
0x13d3   : > { %s7026_s5 = smov %s7024_s26 }
0x13d4   :  { %61 = sbr.rel (!%p59_p4) target bundleno = 57 (0x39), region = 262 }
0x13d7   : > { %s7025_s1 = smov %s7022_s11 }
0x13db   :  { %3582 = vsyncpa [#allocation6], 1 }
0x13dc   :  { %3584 = vsyncpa [#allocation6 + $0x1], 1 }
0x13dd   :  { %3585 = vsyncpa [#allocation9], 1 }
0x13de   :  { %3587 = vsyncpa [#allocation9 + $0x1], 1 }
0x13df   :  { %3588 = vsyncpa [#allocation12], 1 }
0x13e0   :  { %3589 = vsyncpa [#allocation15], 1 }
0x13e1   :  { %3590 = vsyncpa [#allocation18], 1 }
0x13e2   :  { %3591 = vsyncpa [#allocation21], 1 }
0x13e3   :  { %3592 = vsyncpa [#allocation24], 1 }
0x13e4   :  { %3593 = vsyncpa [#allocation27], 1 }
0x13e5   :  { %3594 = vsyncpa [#allocation30], 1 }
0x13e6   :  { %3595 = vsyncpa [#allocation33], 1 }
0x13e7   :  { %3596 = vsyncpa [#allocation36], 1 }
0x13e8   :  { %3597 = vsyncpa [#allocation39], 1 }
0x13e9   :  { %3598 = vsyncpa [#allocation42], 1 }
0x13ea   :  { %3599 = vsyncpa [#allocation7], 1 }
0x13eb   :  { %3601 = vsyncpa [#allocation7 + $0x1], 1 }

</bundles_post_ra>
